<compile_context>
chip_gen: v7x
topology: tpu7x:2x2x1
jax: 0.10.0
libtpu: 0.0.40
codegen_flags: <defaults>
</compile_context>

<pallas_src>
import jax
import jax.numpy as jnp
from jax import lax
from jax.experimental import pallas as pl
from jax.experimental.pallas import tpu as pltpu

# ----------------------------- config --------------------------------------
B = 2                 # batch
C_IN = 3              # image channels
IMG = 32              # image size (square)
PATCH = 16            # patch size
H_P = IMG // PATCH    # patch-grid height = 2
W_P = IMG // PATCH    # patch-grid width  = 2
NP = H_P * W_P        # number of patch tokens = 4
N = NP + 1            # +cls token = 5
T = B * N             # batch-fused token count = 10
D = 32                # embed dim
NH = 4                # attention heads
HD = D // NH          # head dim = 8
MLP = 4 * D           # mlp hidden dim = 128
DEPTH = 4             # transformer blocks (layer = DEPTH - 1 is returned)
EPS = 1e-6            # LayerNorm eps (timm ViT default)
CPP = C_IN * PATCH * PATCH
SCALE = HD ** -0.5
F32 = jnp.float32


def _layernorm(x, g, b):
    mu = jnp.mean(x, axis=-1, keepdims=True)
    var = jnp.mean(jnp.square(x - mu), axis=-1, keepdims=True)
    return (x - mu) * lax.rsqrt(var + EPS) * g + b


# ---------------------- fused DeIT forward kernel ---------------------------
def _deit_kernel(p_ref, mask_ref, wpe_ref, emb_ref, wqkv_ref, bqkv_ref,
                 wproj_ref, wf1_ref, bf1_ref, wf2_ref, vec_ref, o_ref):
    # Token assembly in one matmul + one add:
    #   rows 0..B-1 of p_ref are zero (cls rows), rows B.. are patch pixel vecs
    #   emb slab = [cls]*B ++ tile(b_patch + pos_embed, B)
    x = jnp.dot(p_ref[...].astype(F32), wpe_ref[...],
                preferred_element_type=F32) + emb_ref[...]            # (T, D)
    mask = mask_ref[...]                                              # (T, T)

    # ---- DEPTH LayerScale blocks; stacked weights are VMEM-resident ----
    for l in range(DEPTH):
        vec = vec_ref[l]                                              # (8, D)
        ln1_g, ln1_b, b_proj = vec[0:1, :], vec[1:2, :], vec[2:3, :]
        ln2_g, ln2_b, b_fc2 = vec[3:4, :], vec[4:5, :], vec[5:6, :]

        # attention branch: x = x + gamma1*Attn(LN1(x))  (gamma1 folded in Wproj)
        xn = _layernorm(x, ln1_g, ln1_b)
        # single fused QKV matmul (attention scale pre-folded into q columns)
        qkv = jnp.dot(xn, wqkv_ref[l],
                      preferred_element_type=F32) + bqkv_ref[l]       # (T, 3D)
        o_heads = []
        for h in range(NH):
            qh = qkv[:, h * HD:(h + 1) * HD]                          # (T, HD)
            kh = qkv[:, D + h * HD:D + (h + 1) * HD]
            vh = qkv[:, 2 * D + h * HD:2 * D + (h + 1) * HD]
            s = lax.dot_general(qh, kh, (((1,), (1,)), ((), ())),
                                preferred_element_type=F32) + mask    # (T, T)
            s = s - jnp.max(s, axis=-1, keepdims=True)
            e = jnp.exp(s)
            prob = e * pl.reciprocal(jnp.sum(e, axis=-1, keepdims=True),
                                     approx=True)
            o_heads.append(jnp.dot(prob, vh,
                                   preferred_element_type=F32))       # (T, HD)
        o = jnp.concatenate(o_heads, axis=-1)                         # (T, D)
        x = x + jnp.dot(o, wproj_ref[l], preferred_element_type=F32) + b_proj

        # mlp branch: x = x + gamma2*MLP(LN2(x))  (gamma2 folded into Wfc2)
        xn = _layernorm(x, ln2_g, ln2_b)
        h1 = jnp.dot(xn, wf1_ref[l], preferred_element_type=F32) + bf1_ref[l]
        # TODO(synk): timm DeiT uses exact erf GELU; tanh approximation here.
        h1 = jax.nn.gelu(h1, approximate=True)
        x = x + jnp.dot(h1, wf2_ref[l], preferred_element_type=F32) + b_fc2

    o_ref[...] = x.astype(o_ref.dtype)                                # (T, D)


def deit_forward(images, packed):
    # TODO(synk): resize_pos_embed / bicubic F.interpolate branch (mismatched
    # input resolution) is not implemented; here (h, w) == embed_size.
    patches = extract_patches(images)                                 # (B*NP, CPP)
    # prepend B zero rows: the cls tokens get no patch-embed contribution
    patches = jnp.concatenate([jnp.zeros((B, CPP), F32), patches], axis=0)  # (T, CPP)

    out = pl.pallas_call(
        _deit_kernel,
        out_shape=jax.ShapeDtypeStruct((T, D), F32),
        grid=(1,),
        in_specs=[
            pl.BlockSpec((T, CPP), lambda i: (0, 0)),                 # padded patches
            pl.BlockSpec((T, T), lambda i: (0, 0)),                   # batch mask
            pl.BlockSpec((CPP, D), lambda i: (0, 0)),                 # patch-embed W
            pl.BlockSpec((T, D), lambda i: (0, 0)),                   # cls/bias/pos slab
            pl.BlockSpec((DEPTH, D, 3 * D), lambda i: (0, 0, 0)),     # fused Wqkv
            pl.BlockSpec((DEPTH, 1, 3 * D), lambda i: (0, 0, 0)),     # qkv bias
            pl.BlockSpec((DEPTH, D, D), lambda i: (0, 0, 0)),         # Wproj (*gamma1)
            pl.BlockSpec((DEPTH, D, MLP), lambda i: (0, 0, 0)),       # W_fc1
            pl.BlockSpec((DEPTH, 1, MLP), lambda i: (0, 0, 0)),       # fc1 bias
            pl.BlockSpec((DEPTH, MLP, D), lambda i: (0, 0, 0)),       # W_fc2 (*gamma2)
            pl.BlockSpec((DEPTH, 8, D), lambda i: (0, 0, 0)),         # D-wide vec slab
        ],
        out_specs=pl.BlockSpec((T, D), lambda i: (0, 0)),
        compiler_params=pltpu.CompilerParams(
            dimension_semantics=("arbitrary",)),
    )(patches, packed["mask"], packed["w_patch"], packed["emb"],
      packed["wqkv"], packed["bqkv"], packed["wproj"],
      packed["wf1"], packed["bf1"], packed["wf2"], packed["vec"])

    # tokens_to_output('dense', x[:, 1:], x[:, 0], (h, w)) -> (B, D, h, w)
    tokens = out[B:, :].reshape(B, NP, D)                             # patch tokens
    return tokens.reshape(B, H_P, W_P, D).transpose(0, 3, 1, 2)


# ------------------------------ glue ----------------------------------------
def extract_patches(images):
    # NCHW conv with kernel==stride==PATCH  <=>  unfold + matmul.
    # Flatten order (C, ph, pw) matches torch Conv2d weight (D, C, p, p).reshape(D, -1).
    x = images.reshape(B, C_IN, H_P, PATCH, W_P, PATCH)
    x = x.transpose(0, 2, 4, 1, 3, 5)                # (B, h, w, C, p, p)
    return x.reshape(B * NP, CPP)


def init_params(key):
    keys = jax.random.split(key, 4 + DEPTH)

    def nrm(k, shape, std=0.02):
        return jax.random.normal(k, shape, F32) * std

    params = {
        "w_patch": nrm(keys[0], (CPP, D)),
        "b_patch": nrm(keys[1], (1, D)),           # randomized so packing bugs show
        "pos_embed": nrm(keys[2], (NP, D)),
        "cls_token": nrm(keys[3], (1, 1, D)),
        "blocks": [],
    }
    for l in range(DEPTH):
        ks = jax.random.split(keys[4 + l], 14)
        params["blocks"].append({
            "ln1_g": 1.0 + nrm(ks[0], (1, D)),
            "ln1_b": nrm(ks[1], (1, D)),
            "w_qkv": nrm(ks[2], (D, 3 * D)),       # x @ W, columns packed [q|k|v]
            "b_qkv": nrm(ks[3], (1, 3 * D)),
            "w_proj": nrm(ks[4], (D, D)),
            "b_proj": nrm(ks[5], (1, D)),
            "gamma1": 0.1 + nrm(ks[6], (1, D)),    # LayerScale (randomized)
            "ln2_g": 1.0 + nrm(ks[7], (1, D)),
            "ln2_b": nrm(ks[8], (1, D)),
            "w_fc1": nrm(ks[9], (D, MLP)),
            "b_fc1": nrm(ks[10], (1, MLP)),
            "w_fc2": nrm(ks[11], (MLP, D)),
            "b_fc2": nrm(ks[12], (1, D)),
            "gamma2": 0.1 + nrm(ks[13], (1, D)),
        })
    return params


def pack_params(params):
    """Stack per-block weights over depth; fold constants at pack time."""
    # additive slab for token assembly: [cls]*B ++ tile(b_patch + pos_embed, B)
    pos_bias = params["b_patch"] + params["pos_embed"]                # (NP, D)
    cls = params["cls_token"].reshape(1, D)
    emb = jnp.concatenate([jnp.tile(cls, (B, 1)),
                           jnp.tile(pos_bias, (B, 1))], axis=0)       # (T, D)
    # block-diagonal attention mask over the batch-fused token axis
    bid = jnp.concatenate([jnp.arange(B), jnp.repeat(jnp.arange(B), NP)])
    mask = jnp.where(bid[:, None] == bid[None, :], 0.0, -1e30).astype(F32)
    # fold the attention scale into the q columns of the fused qkv weight/bias
    scale_cols = jnp.concatenate([jnp.full((D,), SCALE, F32),
                                  jnp.ones((2 * D,), F32)])

    wqkv, bqkv, wproj, wf1, bf1, wf2, vec = ([] for _ in range(7))
    for p in params["blocks"]:
        wqkv.append(p["w_qkv"] * scale_cols[None, :])
        bqkv.append(p["b_qkv"] * scale_cols[None, :])
        wproj.append(p["w_proj"] * p["gamma1"])            # gamma1 folded (columns)
        wf1.append(p["w_fc1"])
        bf1.append(p["b_fc1"])
        wf2.append(p["w_fc2"] * p["gamma2"])               # gamma2 folded (columns)
        vec.append(jnp.concatenate(
            [p["ln1_g"], p["ln1_b"], p["b_proj"] * p["gamma1"],
             p["ln2_g"], p["ln2_b"], p["b_fc2"] * p["gamma2"],
             jnp.zeros((2, D), F32)], axis=0))             # (8, D)

    stack = lambda xs: jnp.stack(xs, axis=0)
    return {"w_patch": params["w_patch"], "emb": emb, "mask": mask,
            "wqkv": stack(wqkv), "bqkv": stack(bqkv), "wproj": stack(wproj),
            "wf1": stack(wf1), "bf1": stack(bf1), "wf2": stack(wf2),
            "vec": stack(vec)}


def deit_reference(images, params):
    """Pure-JAX reference (same math, unfused params) for a sanity check."""
    patches = extract_patches(images).reshape(B, NP, CPP)
    x = patches @ params["w_patch"] + params["b_patch"] + params["pos_embed"]
    cls = jnp.broadcast_to(params["cls_token"], (B, 1, D))
    x = jnp.concatenate([cls, x], axis=1)
    for p in params["blocks"]:
        xn = _layernorm(x, p["ln1_g"], p["ln1_b"])
        qkv = xn @ p["w_qkv"] + p["b_qkv"]
        qkv = qkv.reshape(B, N, 3, NH, HD).transpose(2, 0, 3, 1, 4)
        q, k, v = qkv[0] * SCALE, qkv[1], qkv[2]
        a = jax.nn.softmax(jnp.einsum("bhqd,bhkd->bhqk", q, k), axis=-1)
        o = jnp.einsum("bhqk,bhkd->bhqd", a, v)
        o = o.transpose(0, 2, 1, 3).reshape(B, N, D)
        x = x + p["gamma1"] * (o @ p["w_proj"] + p["b_proj"])
        xn = _layernorm(x, p["ln2_g"], p["ln2_b"])
        h = jax.nn.gelu(xn @ p["w_fc1"] + p["b_fc1"], approximate=True)
        x = x + p["gamma2"] * (h @ p["w_fc2"] + p["b_fc2"])
    return x[:, 1:, :].reshape(B, H_P, W_P, D).transpose(0, 3, 1, 2)


if __name__ == "__main__":
    key = jax.random.PRNGKey(0)
    k_img, k_par = jax.random.split(key)
    images = jax.random.normal(k_img, (B, C_IN, IMG, IMG), F32)
    params = init_params(k_par)
    packed = pack_params(params)

    out = jax.jit(deit_forward)(images, packed)
    out = jax.block_until_ready(out)

    assert out.shape == (B, D, H_P, W_P), out.shape
    assert bool(jnp.all(jnp.isfinite(out)))

    with jax.default_matmul_precision("highest"):
        ref = deit_reference(images, params)
    err = float(jnp.max(jnp.abs(out - ref)))
    assert err < 2e-2, f"mismatch vs pure-JAX reference: max abs err = {err}"

    print("KERNEL_OK")
</pallas_src>

<mosaic_0001>
module attributes {stable_mosaic.version = 11 : i64} {
  func.func @_deit_kernel(%arg0: i32, %arg1: memref<10x768xf32, #tpu.memory_space<vmem>>, %arg2: memref<10x10xf32, #tpu.memory_space<vmem>>, %arg3: memref<768x32xf32, #tpu.memory_space<vmem>>, %arg4: memref<10x32xf32, #tpu.memory_space<vmem>>, %arg5: memref<4x32x96xf32, #tpu.memory_space<vmem>>, %arg6: memref<4x1x96xf32, #tpu.memory_space<vmem>>, %arg7: memref<4x32x32xf32, #tpu.memory_space<vmem>>, %arg8: memref<4x32x128xf32, #tpu.memory_space<vmem>>, %arg9: memref<4x1x128xf32, #tpu.memory_space<vmem>>, %arg10: memref<4x128x32xf32, #tpu.memory_space<vmem>>, %arg11: memref<4x8x32xf32, #tpu.memory_space<vmem>>, %arg12: memref<10x32xf32, #tpu.memory_space<vmem>>) attributes {dimension_semantics = [#tpu.dimension_semantics<arbitrary>], iteration_bounds = array<i64: 1>, scalar_prefetch = 0 : i64, scratch_operands = 0 : i64, tpu.core_type = #tpu.core_type<tc>, window_params = [{pipeline_mode = #tpu.pipeline_mode<synchronous>, transform_indices = @transform_0, window_bounds = array<i64: 10, 768>}, {pipeline_mode = #tpu.pipeline_mode<synchronous>, transform_indices = @transform_1, window_bounds = array<i64: 10, 10>}, {pipeline_mode = #tpu.pipeline_mode<synchronous>, transform_indices = @transform_2, window_bounds = array<i64: 768, 32>}, {pipeline_mode = #tpu.pipeline_mode<synchronous>, transform_indices = @transform_3, window_bounds = array<i64: 10, 32>}, {pipeline_mode = #tpu.pipeline_mode<synchronous>, transform_indices = @transform_4, window_bounds = array<i64: 4, 32, 96>}, {pipeline_mode = #tpu.pipeline_mode<synchronous>, transform_indices = @transform_5, window_bounds = array<i64: 4, 1, 96>}, {pipeline_mode = #tpu.pipeline_mode<synchronous>, transform_indices = @transform_6, window_bounds = array<i64: 4, 32, 32>}, {pipeline_mode = #tpu.pipeline_mode<synchronous>, transform_indices = @transform_7, window_bounds = array<i64: 4, 32, 128>}, {pipeline_mode = #tpu.pipeline_mode<synchronous>, transform_indices = @transform_8, window_bounds = array<i64: 4, 1, 128>}, {pipeline_mode = #tpu.pipeline_mode<synchronous>, transform_indices = @transform_9, window_bounds = array<i64: 4, 128, 32>}, {pipeline_mode = #tpu.pipeline_mode<synchronous>, transform_indices = @transform_10, window_bounds = array<i64: 4, 8, 32>}, {pipeline_mode = #tpu.pipeline_mode<synchronous>, transform_indices = @transform_11, window_bounds = array<i64: 10, 32>}]} {
    %c0 = arith.constant 0 : index
    %c0_0 = arith.constant 0 : index
    %0 = vector.load %arg1[%c0, %c0_0] : memref<10x768xf32, #tpu.memory_space<vmem>>, vector<10x768xf32>
    %c0_1 = arith.constant 0 : index
    %c0_2 = arith.constant 0 : index
    %1 = vector.load %arg3[%c0_1, %c0_2] : memref<768x32xf32, #tpu.memory_space<vmem>>, vector<768x32xf32>
    %cst = arith.constant dense<0.000000e+00> : vector<10x32xf32>
    %2 = tpu.matmul %0, %1, %cst {dimension_numbers = #tpu.dot_dimension_numbers<[1], [0], [0], [1], [0, 0, 1, 1], [], []>} : vector<10x768xf32>, vector<768x32xf32>, vector<10x32xf32> -> vector<10x32xf32>
    %c0_3 = arith.constant 0 : index
    %c0_4 = arith.constant 0 : index
    %3 = vector.load %arg4[%c0_3, %c0_4] : memref<10x32xf32, #tpu.memory_space<vmem>>, vector<10x32xf32>
    %4 = arith.addf %2, %3 : vector<10x32xf32>
    %c0_5 = arith.constant 0 : index
    %c0_6 = arith.constant 0 : index
    %5 = vector.load %arg2[%c0_5, %c0_6] : memref<10x10xf32, #tpu.memory_space<vmem>>, vector<10x10xf32>
    %c0_7 = arith.constant 0 : index
    %c0_8 = arith.constant 0 : index
    %c0_9 = arith.constant 0 : index
    %6 = vector.load %arg11[%c0_7, %c0_8, %c0_9] : memref<4x8x32xf32, #tpu.memory_space<vmem>>, vector<1x8x32xf32>
    %7 = vector.shape_cast %6 : vector<1x8x32xf32> to vector<8x32xf32>
    %8 = vector.extract_strided_slice %7 {offsets = [0, 0], sizes = [1, 32], strides = [1, 1]} : vector<8x32xf32> to vector<1x32xf32>
    %9 = vector.extract_strided_slice %7 {offsets = [1, 0], sizes = [1, 32], strides = [1, 1]} : vector<8x32xf32> to vector<1x32xf32>
    %10 = vector.extract_strided_slice %7 {offsets = [2, 0], sizes = [1, 32], strides = [1, 1]} : vector<8x32xf32> to vector<1x32xf32>
    %11 = vector.extract_strided_slice %7 {offsets = [3, 0], sizes = [1, 32], strides = [1, 1]} : vector<8x32xf32> to vector<1x32xf32>
    %12 = vector.extract_strided_slice %7 {offsets = [4, 0], sizes = [1, 32], strides = [1, 1]} : vector<8x32xf32> to vector<1x32xf32>
    %13 = vector.extract_strided_slice %7 {offsets = [5, 0], sizes = [1, 32], strides = [1, 1]} : vector<8x32xf32> to vector<1x32xf32>
    %cst_10 = arith.constant dense<0.000000e+00> : vector<10xf32>
    %14 = vector.multi_reduction <add>, %4, %cst_10 [1] : vector<10x32xf32> to vector<10xf32>
    %15 = vector.shape_cast %14 : vector<10xf32> to vector<10x1xf32>
    %cst_11 = arith.constant 3.200000e+01 : f32
    %16 = vector.broadcast %cst_11 : f32 to vector<10x1xf32>
    %17 = arith.divf %15, %16 : vector<10x1xf32>
    %18 = vector.broadcast %17 : vector<10x1xf32> to vector<10x32xf32>
    %19 = arith.subf %4, %18 : vector<10x32xf32>
    %20 = arith.mulf %19, %19 : vector<10x32xf32>
    %cst_12 = arith.constant dense<0.000000e+00> : vector<10xf32>
    %21 = vector.multi_reduction <add>, %20, %cst_12 [1] : vector<10x32xf32> to vector<10xf32>
    %22 = vector.shape_cast %21 : vector<10xf32> to vector<10x1xf32>
    %cst_13 = arith.constant 3.200000e+01 : f32
    %23 = vector.broadcast %cst_13 : f32 to vector<10x1xf32>
    %24 = arith.divf %22, %23 : vector<10x1xf32>
    %25 = vector.broadcast %17 : vector<10x1xf32> to vector<10x32xf32>
    %26 = arith.subf %4, %25 : vector<10x32xf32>
    %cst_14 = arith.constant 9.99999997E-7 : f32
    %27 = vector.broadcast %cst_14 : f32 to vector<10x1xf32>
    %28 = arith.addf %24, %27 : vector<10x1xf32>
    %29 = math.rsqrt %28 : vector<10x1xf32>
    %30 = vector.broadcast %29 : vector<10x1xf32> to vector<10x32xf32>
    %31 = arith.mulf %26, %30 : vector<10x32xf32>
    %32 = vector.broadcast %8 : vector<1x32xf32> to vector<10x32xf32>
    %33 = arith.mulf %31, %32 : vector<10x32xf32>
    %34 = vector.broadcast %9 : vector<1x32xf32> to vector<10x32xf32>
    %35 = arith.addf %33, %34 : vector<10x32xf32>
    %c0_15 = arith.constant 0 : index
    %c0_16 = arith.constant 0 : index
    %c0_17 = arith.constant 0 : index
    %36 = vector.load %arg5[%c0_15, %c0_16, %c0_17] : memref<4x32x96xf32, #tpu.memory_space<vmem>>, vector<1x32x96xf32>
    %37 = vector.shape_cast %36 : vector<1x32x96xf32> to vector<32x96xf32>
    %cst_18 = arith.constant dense<0.000000e+00> : vector<10x96xf32>
    %38 = tpu.matmul %35, %37, %cst_18 {dimension_numbers = #tpu.dot_dimension_numbers<[1], [0], [0], [1], [0, 0, 1, 1], [], []>} : vector<10x32xf32>, vector<32x96xf32>, vector<10x96xf32> -> vector<10x96xf32>
    %c0_19 = arith.constant 0 : index
    %c0_20 = arith.constant 0 : index
    %c0_21 = arith.constant 0 : index
    %39 = vector.load %arg6[%c0_19, %c0_20, %c0_21] : memref<4x1x96xf32, #tpu.memory_space<vmem>>, vector<1x1x96xf32>
    %40 = vector.shape_cast %39 : vector<1x1x96xf32> to vector<1x96xf32>
    %41 = vector.broadcast %40 : vector<1x96xf32> to vector<10x96xf32>
    %42 = arith.addf %38, %41 : vector<10x96xf32>
    %43 = vector.extract_strided_slice %42 {offsets = [0, 0], sizes = [10, 8], strides = [1, 1]} : vector<10x96xf32> to vector<10x8xf32>
    %44 = vector.extract_strided_slice %42 {offsets = [0, 32], sizes = [10, 8], strides = [1, 1]} : vector<10x96xf32> to vector<10x8xf32>
    %45 = vector.extract_strided_slice %42 {offsets = [0, 64], sizes = [10, 8], strides = [1, 1]} : vector<10x96xf32> to vector<10x8xf32>
    %cst_22 = arith.constant dense<0.000000e+00> : vector<10x10xf32>
    %46 = tpu.matmul %43, %44, %cst_22 {dimension_numbers = #tpu.dot_dimension_numbers<[1], [1], [0], [0], [0, 0, 1, 0], [], []>} : vector<10x8xf32>, vector<10x8xf32>, vector<10x10xf32> -> vector<10x10xf32>
    %47 = arith.addf %46, %5 : vector<10x10xf32>
    %cst_23 = arith.constant dense<0xFF800000> : vector<10xf32>
    %48 = vector.multi_reduction <maximumf>, %47, %cst_23 [1] : vector<10x10xf32> to vector<10xf32>
    %49 = vector.shape_cast %48 : vector<10xf32> to vector<10x1xf32>
    %50 = vector.broadcast %49 : vector<10x1xf32> to vector<10x10xf32>
    %51 = arith.subf %47, %50 : vector<10x10xf32>
    %52 = math.exp %51 : vector<10x10xf32>
    %cst_24 = arith.constant dense<0.000000e+00> : vector<10xf32>
    %53 = vector.multi_reduction <add>, %52, %cst_24 [1] : vector<10x10xf32> to vector<10xf32>
    %54 = vector.shape_cast %53 : vector<10xf32> to vector<10x1xf32>
    %55 = tpu.reciprocal %54 {approx = true} : vector<10x1xf32> -> vector<10x1xf32>
    %56 = vector.broadcast %55 : vector<10x1xf32> to vector<10x10xf32>
    %57 = arith.mulf %52, %56 : vector<10x10xf32>
    %cst_25 = arith.constant dense<0.000000e+00> : vector<10x8xf32>
    %58 = tpu.matmul %57, %45, %cst_25 {dimension_numbers = #tpu.dot_dimension_numbers<[1], [0], [0], [1], [0, 0, 1, 1], [], []>} : vector<10x10xf32>, vector<10x8xf32>, vector<10x8xf32> -> vector<10x8xf32>
    %59 = vector.extract_strided_slice %42 {offsets = [0, 8], sizes = [10, 8], strides = [1, 1]} : vector<10x96xf32> to vector<10x8xf32>
    %60 = vector.extract_strided_slice %42 {offsets = [0, 40], sizes = [10, 8], strides = [1, 1]} : vector<10x96xf32> to vector<10x8xf32>
    %61 = vector.extract_strided_slice %42 {offsets = [0, 72], sizes = [10, 8], strides = [1, 1]} : vector<10x96xf32> to vector<10x8xf32>
    %cst_26 = arith.constant dense<0.000000e+00> : vector<10x10xf32>
    %62 = tpu.matmul %59, %60, %cst_26 {dimension_numbers = #tpu.dot_dimension_numbers<[1], [1], [0], [0], [0, 0, 1, 0], [], []>} : vector<10x8xf32>, vector<10x8xf32>, vector<10x10xf32> -> vector<10x10xf32>
    %63 = arith.addf %62, %5 : vector<10x10xf32>
    %cst_27 = arith.constant dense<0xFF800000> : vector<10xf32>
    %64 = vector.multi_reduction <maximumf>, %63, %cst_27 [1] : vector<10x10xf32> to vector<10xf32>
    %65 = vector.shape_cast %64 : vector<10xf32> to vector<10x1xf32>
    %66 = vector.broadcast %65 : vector<10x1xf32> to vector<10x10xf32>
    %67 = arith.subf %63, %66 : vector<10x10xf32>
    %68 = math.exp %67 : vector<10x10xf32>
    %cst_28 = arith.constant dense<0.000000e+00> : vector<10xf32>
    %69 = vector.multi_reduction <add>, %68, %cst_28 [1] : vector<10x10xf32> to vector<10xf32>
    %70 = vector.shape_cast %69 : vector<10xf32> to vector<10x1xf32>
    %71 = tpu.reciprocal %70 {approx = true} : vector<10x1xf32> -> vector<10x1xf32>
    %72 = vector.broadcast %71 : vector<10x1xf32> to vector<10x10xf32>
    %73 = arith.mulf %68, %72 : vector<10x10xf32>
    %cst_29 = arith.constant dense<0.000000e+00> : vector<10x8xf32>
    %74 = tpu.matmul %73, %61, %cst_29 {dimension_numbers = #tpu.dot_dimension_numbers<[1], [0], [0], [1], [0, 0, 1, 1], [], []>} : vector<10x10xf32>, vector<10x8xf32>, vector<10x8xf32> -> vector<10x8xf32>
    %75 = vector.extract_strided_slice %42 {offsets = [0, 16], sizes = [10, 8], strides = [1, 1]} : vector<10x96xf32> to vector<10x8xf32>
    %76 = vector.extract_strided_slice %42 {offsets = [0, 48], sizes = [10, 8], strides = [1, 1]} : vector<10x96xf32> to vector<10x8xf32>
    %77 = vector.extract_strided_slice %42 {offsets = [0, 80], sizes = [10, 8], strides = [1, 1]} : vector<10x96xf32> to vector<10x8xf32>
    %cst_30 = arith.constant dense<0.000000e+00> : vector<10x10xf32>
    %78 = tpu.matmul %75, %76, %cst_30 {dimension_numbers = #tpu.dot_dimension_numbers<[1], [1], [0], [0], [0, 0, 1, 0], [], []>} : vector<10x8xf32>, vector<10x8xf32>, vector<10x10xf32> -> vector<10x10xf32>
    %79 = arith.addf %78, %5 : vector<10x10xf32>
    %cst_31 = arith.constant dense<0xFF800000> : vector<10xf32>
    %80 = vector.multi_reduction <maximumf>, %79, %cst_31 [1] : vector<10x10xf32> to vector<10xf32>
    %81 = vector.shape_cast %80 : vector<10xf32> to vector<10x1xf32>
    %82 = vector.broadcast %81 : vector<10x1xf32> to vector<10x10xf32>
    %83 = arith.subf %79, %82 : vector<10x10xf32>
    %84 = math.exp %83 : vector<10x10xf32>
    %cst_32 = arith.constant dense<0.000000e+00> : vector<10xf32>
    %85 = vector.multi_reduction <add>, %84, %cst_32 [1] : vector<10x10xf32> to vector<10xf32>
    %86 = vector.shape_cast %85 : vector<10xf32> to vector<10x1xf32>
    %87 = tpu.reciprocal %86 {approx = true} : vector<10x1xf32> -> vector<10x1xf32>
    %88 = vector.broadcast %87 : vector<10x1xf32> to vector<10x10xf32>
    %89 = arith.mulf %84, %88 : vector<10x10xf32>
    %cst_33 = arith.constant dense<0.000000e+00> : vector<10x8xf32>
    %90 = tpu.matmul %89, %77, %cst_33 {dimension_numbers = #tpu.dot_dimension_numbers<[1], [0], [0], [1], [0, 0, 1, 1], [], []>} : vector<10x10xf32>, vector<10x8xf32>, vector<10x8xf32> -> vector<10x8xf32>
    %91 = vector.extract_strided_slice %42 {offsets = [0, 24], sizes = [10, 8], strides = [1, 1]} : vector<10x96xf32> to vector<10x8xf32>
    %92 = vector.extract_strided_slice %42 {offsets = [0, 56], sizes = [10, 8], strides = [1, 1]} : vector<10x96xf32> to vector<10x8xf32>
    %93 = vector.extract_strided_slice %42 {offsets = [0, 88], sizes = [10, 8], strides = [1, 1]} : vector<10x96xf32> to vector<10x8xf32>
    %cst_34 = arith.constant dense<0.000000e+00> : vector<10x10xf32>
    %94 = tpu.matmul %91, %92, %cst_34 {dimension_numbers = #tpu.dot_dimension_numbers<[1], [1], [0], [0], [0, 0, 1, 0], [], []>} : vector<10x8xf32>, vector<10x8xf32>, vector<10x10xf32> -> vector<10x10xf32>
    %95 = arith.addf %94, %5 : vector<10x10xf32>
    %cst_35 = arith.constant dense<0xFF800000> : vector<10xf32>
    %96 = vector.multi_reduction <maximumf>, %95, %cst_35 [1] : vector<10x10xf32> to vector<10xf32>
    %97 = vector.shape_cast %96 : vector<10xf32> to vector<10x1xf32>
    %98 = vector.broadcast %97 : vector<10x1xf32> to vector<10x10xf32>
    %99 = arith.subf %95, %98 : vector<10x10xf32>
    %100 = math.exp %99 : vector<10x10xf32>
    %cst_36 = arith.constant dense<0.000000e+00> : vector<10xf32>
    %101 = vector.multi_reduction <add>, %100, %cst_36 [1] : vector<10x10xf32> to vector<10xf32>
    %102 = vector.shape_cast %101 : vector<10xf32> to vector<10x1xf32>
    %103 = tpu.reciprocal %102 {approx = true} : vector<10x1xf32> -> vector<10x1xf32>
    %104 = vector.broadcast %103 : vector<10x1xf32> to vector<10x10xf32>
    %105 = arith.mulf %100, %104 : vector<10x10xf32>
    %cst_37 = arith.constant dense<0.000000e+00> : vector<10x8xf32>
    %106 = tpu.matmul %105, %93, %cst_37 {dimension_numbers = #tpu.dot_dimension_numbers<[1], [0], [0], [1], [0, 0, 1, 1], [], []>} : vector<10x10xf32>, vector<10x8xf32>, vector<10x8xf32> -> vector<10x8xf32>
    %107 = tpu.concatenate %58, %74, %90, %106 in 1 : vector<10x8xf32>, vector<10x8xf32>, vector<10x8xf32>, vector<10x8xf32> -> vector<10x32xf32>
    %c0_38 = arith.constant 0 : index
    %c0_39 = arith.constant 0 : index
    %c0_40 = arith.constant 0 : index
    %108 = vector.load %arg7[%c0_38, %c0_39, %c0_40] : memref<4x32x32xf32, #tpu.memory_space<vmem>>, vector<1x32x32xf32>
    %109 = vector.shape_cast %108 : vector<1x32x32xf32> to vector<32x32xf32>
    %cst_41 = arith.constant dense<0.000000e+00> : vector<10x32xf32>
    %110 = tpu.matmul %107, %109, %cst_41 {dimension_numbers = #tpu.dot_dimension_numbers<[1], [0], [0], [1], [0, 0, 1, 1], [], []>} : vector<10x32xf32>, vector<32x32xf32>, vector<10x32xf32> -> vector<10x32xf32>
    %111 = arith.addf %4, %110 : vector<10x32xf32>
    %112 = vector.broadcast %10 : vector<1x32xf32> to vector<10x32xf32>
    %113 = arith.addf %111, %112 : vector<10x32xf32>
    %cst_42 = arith.constant dense<0.000000e+00> : vector<10xf32>
    %114 = vector.multi_reduction <add>, %113, %cst_42 [1] : vector<10x32xf32> to vector<10xf32>
    %115 = vector.shape_cast %114 : vector<10xf32> to vector<10x1xf32>
    %cst_43 = arith.constant 3.200000e+01 : f32
    %116 = vector.broadcast %cst_43 : f32 to vector<10x1xf32>
    %117 = arith.divf %115, %116 : vector<10x1xf32>
    %118 = vector.broadcast %117 : vector<10x1xf32> to vector<10x32xf32>
    %119 = arith.subf %113, %118 : vector<10x32xf32>
    %120 = arith.mulf %119, %119 : vector<10x32xf32>
    %cst_44 = arith.constant dense<0.000000e+00> : vector<10xf32>
    %121 = vector.multi_reduction <add>, %120, %cst_44 [1] : vector<10x32xf32> to vector<10xf32>
    %122 = vector.shape_cast %121 : vector<10xf32> to vector<10x1xf32>
    %cst_45 = arith.constant 3.200000e+01 : f32
    %123 = vector.broadcast %cst_45 : f32 to vector<10x1xf32>
    %124 = arith.divf %122, %123 : vector<10x1xf32>
    %125 = vector.broadcast %117 : vector<10x1xf32> to vector<10x32xf32>
    %126 = arith.subf %113, %125 : vector<10x32xf32>
    %cst_46 = arith.constant 9.99999997E-7 : f32
    %127 = vector.broadcast %cst_46 : f32 to vector<10x1xf32>
    %128 = arith.addf %124, %127 : vector<10x1xf32>
    %129 = math.rsqrt %128 : vector<10x1xf32>
    %130 = vector.broadcast %129 : vector<10x1xf32> to vector<10x32xf32>
    %131 = arith.mulf %126, %130 : vector<10x32xf32>
    %132 = vector.broadcast %11 : vector<1x32xf32> to vector<10x32xf32>
    %133 = arith.mulf %131, %132 : vector<10x32xf32>
    %134 = vector.broadcast %12 : vector<1x32xf32> to vector<10x32xf32>
    %135 = arith.addf %133, %134 : vector<10x32xf32>
    %c0_47 = arith.constant 0 : index
    %c0_48 = arith.constant 0 : index
    %c0_49 = arith.constant 0 : index
    %136 = vector.load %arg8[%c0_47, %c0_48, %c0_49] : memref<4x32x128xf32, #tpu.memory_space<vmem>>, vector<1x32x128xf32>
    %137 = vector.shape_cast %136 : vector<1x32x128xf32> to vector<32x128xf32>
    %cst_50 = arith.constant dense<0.000000e+00> : vector<10x128xf32>
    %138 = tpu.matmul %135, %137, %cst_50 {dimension_numbers = #tpu.dot_dimension_numbers<[1], [0], [0], [1], [0, 0, 1, 1], [], []>} : vector<10x32xf32>, vector<32x128xf32>, vector<10x128xf32> -> vector<10x128xf32>
    %c0_51 = arith.constant 0 : index
    %c0_52 = arith.constant 0 : index
    %c0_53 = arith.constant 0 : index
    %139 = vector.load %arg9[%c0_51, %c0_52, %c0_53] : memref<4x1x128xf32, #tpu.memory_space<vmem>>, vector<1x1x128xf32>
    %140 = vector.shape_cast %139 : vector<1x1x128xf32> to vector<1x128xf32>
    %141 = vector.broadcast %140 : vector<1x128xf32> to vector<10x128xf32>
    %142 = arith.addf %138, %141 : vector<10x128xf32>
    %143 = arith.mulf %142, %142 : vector<10x128xf32>
    %144 = arith.mulf %142, %143 : vector<10x128xf32>
    %cst_54 = arith.constant 4.471500e-02 : f32
    %145 = vector.broadcast %cst_54 : f32 to vector<10x128xf32>
    %146 = arith.mulf %145, %144 : vector<10x128xf32>
    %147 = arith.addf %142, %146 : vector<10x128xf32>
    %cst_55 = arith.constant 0.797884583 : f32
    %148 = vector.broadcast %cst_55 : f32 to vector<10x128xf32>
    %149 = arith.mulf %148, %147 : vector<10x128xf32>
    %150 = math.tanh %149 : vector<10x128xf32>
    %cst_56 = arith.constant 1.000000e+00 : f32
    %151 = vector.broadcast %cst_56 : f32 to vector<10x128xf32>
    %152 = arith.addf %151, %150 : vector<10x128xf32>
    %cst_57 = arith.constant 5.000000e-01 : f32
    %153 = vector.broadcast %cst_57 : f32 to vector<10x128xf32>
    %154 = arith.mulf %153, %152 : vector<10x128xf32>
    %155 = arith.mulf %142, %154 : vector<10x128xf32>
    %c0_58 = arith.constant 0 : index
    %c0_59 = arith.constant 0 : index
    %c0_60 = arith.constant 0 : index
    %156 = vector.load %arg10[%c0_58, %c0_59, %c0_60] : memref<4x128x32xf32, #tpu.memory_space<vmem>>, vector<1x128x32xf32>
    %157 = vector.shape_cast %156 : vector<1x128x32xf32> to vector<128x32xf32>
    %cst_61 = arith.constant dense<0.000000e+00> : vector<10x32xf32>
    %158 = tpu.matmul %155, %157, %cst_61 {dimension_numbers = #tpu.dot_dimension_numbers<[1], [0], [0], [1], [0, 0, 1, 1], [], []>} : vector<10x128xf32>, vector<128x32xf32>, vector<10x32xf32> -> vector<10x32xf32>
    %159 = arith.addf %113, %158 : vector<10x32xf32>
    %160 = vector.broadcast %13 : vector<1x32xf32> to vector<10x32xf32>
    %161 = arith.addf %159, %160 : vector<10x32xf32>
    %c1 = arith.constant 1 : index
    %c0_62 = arith.constant 0 : index
    %c0_63 = arith.constant 0 : index
    %162 = vector.load %arg11[%c1, %c0_62, %c0_63] : memref<4x8x32xf32, #tpu.memory_space<vmem>>, vector<1x8x32xf32>
    %163 = vector.shape_cast %162 : vector<1x8x32xf32> to vector<8x32xf32>
    %164 = vector.extract_strided_slice %163 {offsets = [0, 0], sizes = [1, 32], strides = [1, 1]} : vector<8x32xf32> to vector<1x32xf32>
    %165 = vector.extract_strided_slice %163 {offsets = [1, 0], sizes = [1, 32], strides = [1, 1]} : vector<8x32xf32> to vector<1x32xf32>
    %166 = vector.extract_strided_slice %163 {offsets = [2, 0], sizes = [1, 32], strides = [1, 1]} : vector<8x32xf32> to vector<1x32xf32>
    %167 = vector.extract_strided_slice %163 {offsets = [3, 0], sizes = [1, 32], strides = [1, 1]} : vector<8x32xf32> to vector<1x32xf32>
    %168 = vector.extract_strided_slice %163 {offsets = [4, 0], sizes = [1, 32], strides = [1, 1]} : vector<8x32xf32> to vector<1x32xf32>
    %169 = vector.extract_strided_slice %163 {offsets = [5, 0], sizes = [1, 32], strides = [1, 1]} : vector<8x32xf32> to vector<1x32xf32>
    %cst_64 = arith.constant dense<0.000000e+00> : vector<10xf32>
    %170 = vector.multi_reduction <add>, %161, %cst_64 [1] : vector<10x32xf32> to vector<10xf32>
    %171 = vector.shape_cast %170 : vector<10xf32> to vector<10x1xf32>
    %cst_65 = arith.constant 3.200000e+01 : f32
    %172 = vector.broadcast %cst_65 : f32 to vector<10x1xf32>
    %173 = arith.divf %171, %172 : vector<10x1xf32>
    %174 = vector.broadcast %173 : vector<10x1xf32> to vector<10x32xf32>
    %175 = arith.subf %161, %174 : vector<10x32xf32>
    %176 = arith.mulf %175, %175 : vector<10x32xf32>
    %cst_66 = arith.constant dense<0.000000e+00> : vector<10xf32>
    %177 = vector.multi_reduction <add>, %176, %cst_66 [1] : vector<10x32xf32> to vector<10xf32>
    %178 = vector.shape_cast %177 : vector<10xf32> to vector<10x1xf32>
    %cst_67 = arith.constant 3.200000e+01 : f32
    %179 = vector.broadcast %cst_67 : f32 to vector<10x1xf32>
    %180 = arith.divf %178, %179 : vector<10x1xf32>
    %181 = vector.broadcast %173 : vector<10x1xf32> to vector<10x32xf32>
    %182 = arith.subf %161, %181 : vector<10x32xf32>
    %cst_68 = arith.constant 9.99999997E-7 : f32
    %183 = vector.broadcast %cst_68 : f32 to vector<10x1xf32>
    %184 = arith.addf %180, %183 : vector<10x1xf32>
    %185 = math.rsqrt %184 : vector<10x1xf32>
    %186 = vector.broadcast %185 : vector<10x1xf32> to vector<10x32xf32>
    %187 = arith.mulf %182, %186 : vector<10x32xf32>
    %188 = vector.broadcast %164 : vector<1x32xf32> to vector<10x32xf32>
    %189 = arith.mulf %187, %188 : vector<10x32xf32>
    %190 = vector.broadcast %165 : vector<1x32xf32> to vector<10x32xf32>
    %191 = arith.addf %189, %190 : vector<10x32xf32>
    %c1_69 = arith.constant 1 : index
    %c0_70 = arith.constant 0 : index
    %c0_71 = arith.constant 0 : index
    %192 = vector.load %arg5[%c1_69, %c0_70, %c0_71] : memref<4x32x96xf32, #tpu.memory_space<vmem>>, vector<1x32x96xf32>
    %193 = vector.shape_cast %192 : vector<1x32x96xf32> to vector<32x96xf32>
    %cst_72 = arith.constant dense<0.000000e+00> : vector<10x96xf32>
    %194 = tpu.matmul %191, %193, %cst_72 {dimension_numbers = #tpu.dot_dimension_numbers<[1], [0], [0], [1], [0, 0, 1, 1], [], []>} : vector<10x32xf32>, vector<32x96xf32>, vector<10x96xf32> -> vector<10x96xf32>
    %c1_73 = arith.constant 1 : index
    %c0_74 = arith.constant 0 : index
    %c0_75 = arith.constant 0 : index
    %195 = vector.load %arg6[%c1_73, %c0_74, %c0_75] : memref<4x1x96xf32, #tpu.memory_space<vmem>>, vector<1x1x96xf32>
    %196 = vector.shape_cast %195 : vector<1x1x96xf32> to vector<1x96xf32>
    %197 = vector.broadcast %196 : vector<1x96xf32> to vector<10x96xf32>
    %198 = arith.addf %194, %197 : vector<10x96xf32>
    %199 = vector.extract_strided_slice %198 {offsets = [0, 0], sizes = [10, 8], strides = [1, 1]} : vector<10x96xf32> to vector<10x8xf32>
    %200 = vector.extract_strided_slice %198 {offsets = [0, 32], sizes = [10, 8], strides = [1, 1]} : vector<10x96xf32> to vector<10x8xf32>
    %201 = vector.extract_strided_slice %198 {offsets = [0, 64], sizes = [10, 8], strides = [1, 1]} : vector<10x96xf32> to vector<10x8xf32>
    %cst_76 = arith.constant dense<0.000000e+00> : vector<10x10xf32>
    %202 = tpu.matmul %199, %200, %cst_76 {dimension_numbers = #tpu.dot_dimension_numbers<[1], [1], [0], [0], [0, 0, 1, 0], [], []>} : vector<10x8xf32>, vector<10x8xf32>, vector<10x10xf32> -> vector<10x10xf32>
    %203 = arith.addf %202, %5 : vector<10x10xf32>
    %cst_77 = arith.constant dense<0xFF800000> : vector<10xf32>
    %204 = vector.multi_reduction <maximumf>, %203, %cst_77 [1] : vector<10x10xf32> to vector<10xf32>
    %205 = vector.shape_cast %204 : vector<10xf32> to vector<10x1xf32>
    %206 = vector.broadcast %205 : vector<10x1xf32> to vector<10x10xf32>
    %207 = arith.subf %203, %206 : vector<10x10xf32>
    %208 = math.exp %207 : vector<10x10xf32>
    %cst_78 = arith.constant dense<0.000000e+00> : vector<10xf32>
    %209 = vector.multi_reduction <add>, %208, %cst_78 [1] : vector<10x10xf32> to vector<10xf32>
    %210 = vector.shape_cast %209 : vector<10xf32> to vector<10x1xf32>
    %211 = tpu.reciprocal %210 {approx = true} : vector<10x1xf32> -> vector<10x1xf32>
    %212 = vector.broadcast %211 : vector<10x1xf32> to vector<10x10xf32>
    %213 = arith.mulf %208, %212 : vector<10x10xf32>
    %cst_79 = arith.constant dense<0.000000e+00> : vector<10x8xf32>
    %214 = tpu.matmul %213, %201, %cst_79 {dimension_numbers = #tpu.dot_dimension_numbers<[1], [0], [0], [1], [0, 0, 1, 1], [], []>} : vector<10x10xf32>, vector<10x8xf32>, vector<10x8xf32> -> vector<10x8xf32>
    %215 = vector.extract_strided_slice %198 {offsets = [0, 8], sizes = [10, 8], strides = [1, 1]} : vector<10x96xf32> to vector<10x8xf32>
    %216 = vector.extract_strided_slice %198 {offsets = [0, 40], sizes = [10, 8], strides = [1, 1]} : vector<10x96xf32> to vector<10x8xf32>
    %217 = vector.extract_strided_slice %198 {offsets = [0, 72], sizes = [10, 8], strides = [1, 1]} : vector<10x96xf32> to vector<10x8xf32>
    %cst_80 = arith.constant dense<0.000000e+00> : vector<10x10xf32>
    %218 = tpu.matmul %215, %216, %cst_80 {dimension_numbers = #tpu.dot_dimension_numbers<[1], [1], [0], [0], [0, 0, 1, 0], [], []>} : vector<10x8xf32>, vector<10x8xf32>, vector<10x10xf32> -> vector<10x10xf32>
    %219 = arith.addf %218, %5 : vector<10x10xf32>
    %cst_81 = arith.constant dense<0xFF800000> : vector<10xf32>
    %220 = vector.multi_reduction <maximumf>, %219, %cst_81 [1] : vector<10x10xf32> to vector<10xf32>
    %221 = vector.shape_cast %220 : vector<10xf32> to vector<10x1xf32>
    %222 = vector.broadcast %221 : vector<10x1xf32> to vector<10x10xf32>
    %223 = arith.subf %219, %222 : vector<10x10xf32>
    %224 = math.exp %223 : vector<10x10xf32>
    %cst_82 = arith.constant dense<0.000000e+00> : vector<10xf32>
    %225 = vector.multi_reduction <add>, %224, %cst_82 [1] : vector<10x10xf32> to vector<10xf32>
    %226 = vector.shape_cast %225 : vector<10xf32> to vector<10x1xf32>
    %227 = tpu.reciprocal %226 {approx = true} : vector<10x1xf32> -> vector<10x1xf32>
    %228 = vector.broadcast %227 : vector<10x1xf32> to vector<10x10xf32>
    %229 = arith.mulf %224, %228 : vector<10x10xf32>
    %cst_83 = arith.constant dense<0.000000e+00> : vector<10x8xf32>
    %230 = tpu.matmul %229, %217, %cst_83 {dimension_numbers = #tpu.dot_dimension_numbers<[1], [0], [0], [1], [0, 0, 1, 1], [], []>} : vector<10x10xf32>, vector<10x8xf32>, vector<10x8xf32> -> vector<10x8xf32>
    %231 = vector.extract_strided_slice %198 {offsets = [0, 16], sizes = [10, 8], strides = [1, 1]} : vector<10x96xf32> to vector<10x8xf32>
    %232 = vector.extract_strided_slice %198 {offsets = [0, 48], sizes = [10, 8], strides = [1, 1]} : vector<10x96xf32> to vector<10x8xf32>
    %233 = vector.extract_strided_slice %198 {offsets = [0, 80], sizes = [10, 8], strides = [1, 1]} : vector<10x96xf32> to vector<10x8xf32>
    %cst_84 = arith.constant dense<0.000000e+00> : vector<10x10xf32>
    %234 = tpu.matmul %231, %232, %cst_84 {dimension_numbers = #tpu.dot_dimension_numbers<[1], [1], [0], [0], [0, 0, 1, 0], [], []>} : vector<10x8xf32>, vector<10x8xf32>, vector<10x10xf32> -> vector<10x10xf32>
    %235 = arith.addf %234, %5 : vector<10x10xf32>
    %cst_85 = arith.constant dense<0xFF800000> : vector<10xf32>
    %236 = vector.multi_reduction <maximumf>, %235, %cst_85 [1] : vector<10x10xf32> to vector<10xf32>
    %237 = vector.shape_cast %236 : vector<10xf32> to vector<10x1xf32>
    %238 = vector.broadcast %237 : vector<10x1xf32> to vector<10x10xf32>
    %239 = arith.subf %235, %238 : vector<10x10xf32>
    %240 = math.exp %239 : vector<10x10xf32>
    %cst_86 = arith.constant dense<0.000000e+00> : vector<10xf32>
    %241 = vector.multi_reduction <add>, %240, %cst_86 [1] : vector<10x10xf32> to vector<10xf32>
    %242 = vector.shape_cast %241 : vector<10xf32> to vector<10x1xf32>
    %243 = tpu.reciprocal %242 {approx = true} : vector<10x1xf32> -> vector<10x1xf32>
    %244 = vector.broadcast %243 : vector<10x1xf32> to vector<10x10xf32>
    %245 = arith.mulf %240, %244 : vector<10x10xf32>
    %cst_87 = arith.constant dense<0.000000e+00> : vector<10x8xf32>
    %246 = tpu.matmul %245, %233, %cst_87 {dimension_numbers = #tpu.dot_dimension_numbers<[1], [0], [0], [1], [0, 0, 1, 1], [], []>} : vector<10x10xf32>, vector<10x8xf32>, vector<10x8xf32> -> vector<10x8xf32>
    %247 = vector.extract_strided_slice %198 {offsets = [0, 24], sizes = [10, 8], strides = [1, 1]} : vector<10x96xf32> to vector<10x8xf32>
    %248 = vector.extract_strided_slice %198 {offsets = [0, 56], sizes = [10, 8], strides = [1, 1]} : vector<10x96xf32> to vector<10x8xf32>
    %249 = vector.extract_strided_slice %198 {offsets = [0, 88], sizes = [10, 8], strides = [1, 1]} : vector<10x96xf32> to vector<10x8xf32>
    %cst_88 = arith.constant dense<0.000000e+00> : vector<10x10xf32>
    %250 = tpu.matmul %247, %248, %cst_88 {dimension_numbers = #tpu.dot_dimension_numbers<[1], [1], [0], [0], [0, 0, 1, 0], [], []>} : vector<10x8xf32>, vector<10x8xf32>, vector<10x10xf32> -> vector<10x10xf32>
    %251 = arith.addf %250, %5 : vector<10x10xf32>
    %cst_89 = arith.constant dense<0xFF800000> : vector<10xf32>
    %252 = vector.multi_reduction <maximumf>, %251, %cst_89 [1] : vector<10x10xf32> to vector<10xf32>
    %253 = vector.shape_cast %252 : vector<10xf32> to vector<10x1xf32>
    %254 = vector.broadcast %253 : vector<10x1xf32> to vector<10x10xf32>
    %255 = arith.subf %251, %254 : vector<10x10xf32>
    %256 = math.exp %255 : vector<10x10xf32>
    %cst_90 = arith.constant dense<0.000000e+00> : vector<10xf32>
    %257 = vector.multi_reduction <add>, %256, %cst_90 [1] : vector<10x10xf32> to vector<10xf32>
    %258 = vector.shape_cast %257 : vector<10xf32> to vector<10x1xf32>
    %259 = tpu.reciprocal %258 {approx = true} : vector<10x1xf32> -> vector<10x1xf32>
    %260 = vector.broadcast %259 : vector<10x1xf32> to vector<10x10xf32>
    %261 = arith.mulf %256, %260 : vector<10x10xf32>
    %cst_91 = arith.constant dense<0.000000e+00> : vector<10x8xf32>
    %262 = tpu.matmul %261, %249, %cst_91 {dimension_numbers = #tpu.dot_dimension_numbers<[1], [0], [0], [1], [0, 0, 1, 1], [], []>} : vector<10x10xf32>, vector<10x8xf32>, vector<10x8xf32> -> vector<10x8xf32>
    %263 = tpu.concatenate %214, %230, %246, %262 in 1 : vector<10x8xf32>, vector<10x8xf32>, vector<10x8xf32>, vector<10x8xf32> -> vector<10x32xf32>
    %c1_92 = arith.constant 1 : index
    %c0_93 = arith.constant 0 : index
    %c0_94 = arith.constant 0 : index
    %264 = vector.load %arg7[%c1_92, %c0_93, %c0_94] : memref<4x32x32xf32, #tpu.memory_space<vmem>>, vector<1x32x32xf32>
    %265 = vector.shape_cast %264 : vector<1x32x32xf32> to vector<32x32xf32>
    %cst_95 = arith.constant dense<0.000000e+00> : vector<10x32xf32>
    %266 = tpu.matmul %263, %265, %cst_95 {dimension_numbers = #tpu.dot_dimension_numbers<[1], [0], [0], [1], [0, 0, 1, 1], [], []>} : vector<10x32xf32>, vector<32x32xf32>, vector<10x32xf32> -> vector<10x32xf32>
    %267 = arith.addf %161, %266 : vector<10x32xf32>
    %268 = vector.broadcast %166 : vector<1x32xf32> to vector<10x32xf32>
    %269 = arith.addf %267, %268 : vector<10x32xf32>
    %cst_96 = arith.constant dense<0.000000e+00> : vector<10xf32>
    %270 = vector.multi_reduction <add>, %269, %cst_96 [1] : vector<10x32xf32> to vector<10xf32>
    %271 = vector.shape_cast %270 : vector<10xf32> to vector<10x1xf32>
    %cst_97 = arith.constant 3.200000e+01 : f32
    %272 = vector.broadcast %cst_97 : f32 to vector<10x1xf32>
    %273 = arith.divf %271, %272 : vector<10x1xf32>
    %274 = vector.broadcast %273 : vector<10x1xf32> to vector<10x32xf32>
    %275 = arith.subf %269, %274 : vector<10x32xf32>
    %276 = arith.mulf %275, %275 : vector<10x32xf32>
    %cst_98 = arith.constant dense<0.000000e+00> : vector<10xf32>
    %277 = vector.multi_reduction <add>, %276, %cst_98 [1] : vector<10x32xf32> to vector<10xf32>
    %278 = vector.shape_cast %277 : vector<10xf32> to vector<10x1xf32>
    %cst_99 = arith.constant 3.200000e+01 : f32
    %279 = vector.broadcast %cst_99 : f32 to vector<10x1xf32>
    %280 = arith.divf %278, %279 : vector<10x1xf32>
    %281 = vector.broadcast %273 : vector<10x1xf32> to vector<10x32xf32>
    %282 = arith.subf %269, %281 : vector<10x32xf32>
    %cst_100 = arith.constant 9.99999997E-7 : f32
    %283 = vector.broadcast %cst_100 : f32 to vector<10x1xf32>
    %284 = arith.addf %280, %283 : vector<10x1xf32>
    %285 = math.rsqrt %284 : vector<10x1xf32>
    %286 = vector.broadcast %285 : vector<10x1xf32> to vector<10x32xf32>
    %287 = arith.mulf %282, %286 : vector<10x32xf32>
    %288 = vector.broadcast %167 : vector<1x32xf32> to vector<10x32xf32>
    %289 = arith.mulf %287, %288 : vector<10x32xf32>
    %290 = vector.broadcast %168 : vector<1x32xf32> to vector<10x32xf32>
    %291 = arith.addf %289, %290 : vector<10x32xf32>
    %c1_101 = arith.constant 1 : index
    %c0_102 = arith.constant 0 : index
    %c0_103 = arith.constant 0 : index
    %292 = vector.load %arg8[%c1_101, %c0_102, %c0_103] : memref<4x32x128xf32, #tpu.memory_space<vmem>>, vector<1x32x128xf32>
    %293 = vector.shape_cast %292 : vector<1x32x128xf32> to vector<32x128xf32>
    %cst_104 = arith.constant dense<0.000000e+00> : vector<10x128xf32>
    %294 = tpu.matmul %291, %293, %cst_104 {dimension_numbers = #tpu.dot_dimension_numbers<[1], [0], [0], [1], [0, 0, 1, 1], [], []>} : vector<10x32xf32>, vector<32x128xf32>, vector<10x128xf32> -> vector<10x128xf32>
    %c1_105 = arith.constant 1 : index
    %c0_106 = arith.constant 0 : index
    %c0_107 = arith.constant 0 : index
    %295 = vector.load %arg9[%c1_105, %c0_106, %c0_107] : memref<4x1x128xf32, #tpu.memory_space<vmem>>, vector<1x1x128xf32>
    %296 = vector.shape_cast %295 : vector<1x1x128xf32> to vector<1x128xf32>
    %297 = vector.broadcast %296 : vector<1x128xf32> to vector<10x128xf32>
    %298 = arith.addf %294, %297 : vector<10x128xf32>
    %299 = arith.mulf %298, %298 : vector<10x128xf32>
    %300 = arith.mulf %298, %299 : vector<10x128xf32>
    %cst_108 = arith.constant 4.471500e-02 : f32
    %301 = vector.broadcast %cst_108 : f32 to vector<10x128xf32>
    %302 = arith.mulf %301, %300 : vector<10x128xf32>
    %303 = arith.addf %298, %302 : vector<10x128xf32>
    %cst_109 = arith.constant 0.797884583 : f32
    %304 = vector.broadcast %cst_109 : f32 to vector<10x128xf32>
    %305 = arith.mulf %304, %303 : vector<10x128xf32>
    %306 = math.tanh %305 : vector<10x128xf32>
    %cst_110 = arith.constant 1.000000e+00 : f32
    %307 = vector.broadcast %cst_110 : f32 to vector<10x128xf32>
    %308 = arith.addf %307, %306 : vector<10x128xf32>
    %cst_111 = arith.constant 5.000000e-01 : f32
    %309 = vector.broadcast %cst_111 : f32 to vector<10x128xf32>
    %310 = arith.mulf %309, %308 : vector<10x128xf32>
    %311 = arith.mulf %298, %310 : vector<10x128xf32>
    %c1_112 = arith.constant 1 : index
    %c0_113 = arith.constant 0 : index
    %c0_114 = arith.constant 0 : index
    %312 = vector.load %arg10[%c1_112, %c0_113, %c0_114] : memref<4x128x32xf32, #tpu.memory_space<vmem>>, vector<1x128x32xf32>
    %313 = vector.shape_cast %312 : vector<1x128x32xf32> to vector<128x32xf32>
    %cst_115 = arith.constant dense<0.000000e+00> : vector<10x32xf32>
    %314 = tpu.matmul %311, %313, %cst_115 {dimension_numbers = #tpu.dot_dimension_numbers<[1], [0], [0], [1], [0, 0, 1, 1], [], []>} : vector<10x128xf32>, vector<128x32xf32>, vector<10x32xf32> -> vector<10x32xf32>
    %315 = arith.addf %269, %314 : vector<10x32xf32>
    %316 = vector.broadcast %169 : vector<1x32xf32> to vector<10x32xf32>
    %317 = arith.addf %315, %316 : vector<10x32xf32>
    %c2 = arith.constant 2 : index
    %c0_116 = arith.constant 0 : index
    %c0_117 = arith.constant 0 : index
    %318 = vector.load %arg11[%c2, %c0_116, %c0_117] : memref<4x8x32xf32, #tpu.memory_space<vmem>>, vector<1x8x32xf32>
    %319 = vector.shape_cast %318 : vector<1x8x32xf32> to vector<8x32xf32>
    %320 = vector.extract_strided_slice %319 {offsets = [0, 0], sizes = [1, 32], strides = [1, 1]} : vector<8x32xf32> to vector<1x32xf32>
    %321 = vector.extract_strided_slice %319 {offsets = [1, 0], sizes = [1, 32], strides = [1, 1]} : vector<8x32xf32> to vector<1x32xf32>
    %322 = vector.extract_strided_slice %319 {offsets = [2, 0], sizes = [1, 32], strides = [1, 1]} : vector<8x32xf32> to vector<1x32xf32>
    %323 = vector.extract_strided_slice %319 {offsets = [3, 0], sizes = [1, 32], strides = [1, 1]} : vector<8x32xf32> to vector<1x32xf32>
    %324 = vector.extract_strided_slice %319 {offsets = [4, 0], sizes = [1, 32], strides = [1, 1]} : vector<8x32xf32> to vector<1x32xf32>
    %325 = vector.extract_strided_slice %319 {offsets = [5, 0], sizes = [1, 32], strides = [1, 1]} : vector<8x32xf32> to vector<1x32xf32>
    %cst_118 = arith.constant dense<0.000000e+00> : vector<10xf32>
    %326 = vector.multi_reduction <add>, %317, %cst_118 [1] : vector<10x32xf32> to vector<10xf32>
    %327 = vector.shape_cast %326 : vector<10xf32> to vector<10x1xf32>
    %cst_119 = arith.constant 3.200000e+01 : f32
    %328 = vector.broadcast %cst_119 : f32 to vector<10x1xf32>
    %329 = arith.divf %327, %328 : vector<10x1xf32>
    %330 = vector.broadcast %329 : vector<10x1xf32> to vector<10x32xf32>
    %331 = arith.subf %317, %330 : vector<10x32xf32>
    %332 = arith.mulf %331, %331 : vector<10x32xf32>
    %cst_120 = arith.constant dense<0.000000e+00> : vector<10xf32>
    %333 = vector.multi_reduction <add>, %332, %cst_120 [1] : vector<10x32xf32> to vector<10xf32>
    %334 = vector.shape_cast %333 : vector<10xf32> to vector<10x1xf32>
    %cst_121 = arith.constant 3.200000e+01 : f32
    %335 = vector.broadcast %cst_121 : f32 to vector<10x1xf32>
    %336 = arith.divf %334, %335 : vector<10x1xf32>
    %337 = vector.broadcast %329 : vector<10x1xf32> to vector<10x32xf32>
    %338 = arith.subf %317, %337 : vector<10x32xf32>
    %cst_122 = arith.constant 9.99999997E-7 : f32
    %339 = vector.broadcast %cst_122 : f32 to vector<10x1xf32>
    %340 = arith.addf %336, %339 : vector<10x1xf32>
    %341 = math.rsqrt %340 : vector<10x1xf32>
    %342 = vector.broadcast %341 : vector<10x1xf32> to vector<10x32xf32>
    %343 = arith.mulf %338, %342 : vector<10x32xf32>
    %344 = vector.broadcast %320 : vector<1x32xf32> to vector<10x32xf32>
    %345 = arith.mulf %343, %344 : vector<10x32xf32>
    %346 = vector.broadcast %321 : vector<1x32xf32> to vector<10x32xf32>
    %347 = arith.addf %345, %346 : vector<10x32xf32>
    %c2_123 = arith.constant 2 : index
    %c0_124 = arith.constant 0 : index
    %c0_125 = arith.constant 0 : index
    %348 = vector.load %arg5[%c2_123, %c0_124, %c0_125] : memref<4x32x96xf32, #tpu.memory_space<vmem>>, vector<1x32x96xf32>
    %349 = vector.shape_cast %348 : vector<1x32x96xf32> to vector<32x96xf32>
    %cst_126 = arith.constant dense<0.000000e+00> : vector<10x96xf32>
    %350 = tpu.matmul %347, %349, %cst_126 {dimension_numbers = #tpu.dot_dimension_numbers<[1], [0], [0], [1], [0, 0, 1, 1], [], []>} : vector<10x32xf32>, vector<32x96xf32>, vector<10x96xf32> -> vector<10x96xf32>
    %c2_127 = arith.constant 2 : index
    %c0_128 = arith.constant 0 : index
    %c0_129 = arith.constant 0 : index
    %351 = vector.load %arg6[%c2_127, %c0_128, %c0_129] : memref<4x1x96xf32, #tpu.memory_space<vmem>>, vector<1x1x96xf32>
    %352 = vector.shape_cast %351 : vector<1x1x96xf32> to vector<1x96xf32>
    %353 = vector.broadcast %352 : vector<1x96xf32> to vector<10x96xf32>
    %354 = arith.addf %350, %353 : vector<10x96xf32>
    %355 = vector.extract_strided_slice %354 {offsets = [0, 0], sizes = [10, 8], strides = [1, 1]} : vector<10x96xf32> to vector<10x8xf32>
    %356 = vector.extract_strided_slice %354 {offsets = [0, 32], sizes = [10, 8], strides = [1, 1]} : vector<10x96xf32> to vector<10x8xf32>
    %357 = vector.extract_strided_slice %354 {offsets = [0, 64], sizes = [10, 8], strides = [1, 1]} : vector<10x96xf32> to vector<10x8xf32>
    %cst_130 = arith.constant dense<0.000000e+00> : vector<10x10xf32>
    %358 = tpu.matmul %355, %356, %cst_130 {dimension_numbers = #tpu.dot_dimension_numbers<[1], [1], [0], [0], [0, 0, 1, 0], [], []>} : vector<10x8xf32>, vector<10x8xf32>, vector<10x10xf32> -> vector<10x10xf32>
    %359 = arith.addf %358, %5 : vector<10x10xf32>
    %cst_131 = arith.constant dense<0xFF800000> : vector<10xf32>
    %360 = vector.multi_reduction <maximumf>, %359, %cst_131 [1] : vector<10x10xf32> to vector<10xf32>
    %361 = vector.shape_cast %360 : vector<10xf32> to vector<10x1xf32>
    %362 = vector.broadcast %361 : vector<10x1xf32> to vector<10x10xf32>
    %363 = arith.subf %359, %362 : vector<10x10xf32>
    %364 = math.exp %363 : vector<10x10xf32>
    %cst_132 = arith.constant dense<0.000000e+00> : vector<10xf32>
    %365 = vector.multi_reduction <add>, %364, %cst_132 [1] : vector<10x10xf32> to vector<10xf32>
    %366 = vector.shape_cast %365 : vector<10xf32> to vector<10x1xf32>
    %367 = tpu.reciprocal %366 {approx = true} : vector<10x1xf32> -> vector<10x1xf32>
    %368 = vector.broadcast %367 : vector<10x1xf32> to vector<10x10xf32>
    %369 = arith.mulf %364, %368 : vector<10x10xf32>
    %cst_133 = arith.constant dense<0.000000e+00> : vector<10x8xf32>
    %370 = tpu.matmul %369, %357, %cst_133 {dimension_numbers = #tpu.dot_dimension_numbers<[1], [0], [0], [1], [0, 0, 1, 1], [], []>} : vector<10x10xf32>, vector<10x8xf32>, vector<10x8xf32> -> vector<10x8xf32>
    %371 = vector.extract_strided_slice %354 {offsets = [0, 8], sizes = [10, 8], strides = [1, 1]} : vector<10x96xf32> to vector<10x8xf32>
    %372 = vector.extract_strided_slice %354 {offsets = [0, 40], sizes = [10, 8], strides = [1, 1]} : vector<10x96xf32> to vector<10x8xf32>
    %373 = vector.extract_strided_slice %354 {offsets = [0, 72], sizes = [10, 8], strides = [1, 1]} : vector<10x96xf32> to vector<10x8xf32>
    %cst_134 = arith.constant dense<0.000000e+00> : vector<10x10xf32>
    %374 = tpu.matmul %371, %372, %cst_134 {dimension_numbers = #tpu.dot_dimension_numbers<[1], [1], [0], [0], [0, 0, 1, 0], [], []>} : vector<10x8xf32>, vector<10x8xf32>, vector<10x10xf32> -> vector<10x10xf32>
    %375 = arith.addf %374, %5 : vector<10x10xf32>
    %cst_135 = arith.constant dense<0xFF800000> : vector<10xf32>
    %376 = vector.multi_reduction <maximumf>, %375, %cst_135 [1] : vector<10x10xf32> to vector<10xf32>
    %377 = vector.shape_cast %376 : vector<10xf32> to vector<10x1xf32>
    %378 = vector.broadcast %377 : vector<10x1xf32> to vector<10x10xf32>
    %379 = arith.subf %375, %378 : vector<10x10xf32>
    %380 = math.exp %379 : vector<10x10xf32>
    %cst_136 = arith.constant dense<0.000000e+00> : vector<10xf32>
    %381 = vector.multi_reduction <add>, %380, %cst_136 [1] : vector<10x10xf32> to vector<10xf32>
    %382 = vector.shape_cast %381 : vector<10xf32> to vector<10x1xf32>
    %383 = tpu.reciprocal %382 {approx = true} : vector<10x1xf32> -> vector<10x1xf32>
    %384 = vector.broadcast %383 : vector<10x1xf32> to vector<10x10xf32>
    %385 = arith.mulf %380, %384 : vector<10x10xf32>
    %cst_137 = arith.constant dense<0.000000e+00> : vector<10x8xf32>
    %386 = tpu.matmul %385, %373, %cst_137 {dimension_numbers = #tpu.dot_dimension_numbers<[1], [0], [0], [1], [0, 0, 1, 1], [], []>} : vector<10x10xf32>, vector<10x8xf32>, vector<10x8xf32> -> vector<10x8xf32>
    %387 = vector.extract_strided_slice %354 {offsets = [0, 16], sizes = [10, 8], strides = [1, 1]} : vector<10x96xf32> to vector<10x8xf32>
    %388 = vector.extract_strided_slice %354 {offsets = [0, 48], sizes = [10, 8], strides = [1, 1]} : vector<10x96xf32> to vector<10x8xf32>
    %389 = vector.extract_strided_slice %354 {offsets = [0, 80], sizes = [10, 8], strides = [1, 1]} : vector<10x96xf32> to vector<10x8xf32>
    %cst_138 = arith.constant dense<0.000000e+00> : vector<10x10xf32>
    %390 = tpu.matmul %387, %388, %cst_138 {dimension_numbers = #tpu.dot_dimension_numbers<[1], [1], [0], [0], [0, 0, 1, 0], [], []>} : vector<10x8xf32>, vector<10x8xf32>, vector<10x10xf32> -> vector<10x10xf32>
    %391 = arith.addf %390, %5 : vector<10x10xf32>
    %cst_139 = arith.constant dense<0xFF800000> : vector<10xf32>
    %392 = vector.multi_reduction <maximumf>, %391, %cst_139 [1] : vector<10x10xf32> to vector<10xf32>
    %393 = vector.shape_cast %392 : vector<10xf32> to vector<10x1xf32>
    %394 = vector.broadcast %393 : vector<10x1xf32> to vector<10x10xf32>
    %395 = arith.subf %391, %394 : vector<10x10xf32>
    %396 = math.exp %395 : vector<10x10xf32>
    %cst_140 = arith.constant dense<0.000000e+00> : vector<10xf32>
    %397 = vector.multi_reduction <add>, %396, %cst_140 [1] : vector<10x10xf32> to vector<10xf32>
    %398 = vector.shape_cast %397 : vector<10xf32> to vector<10x1xf32>
    %399 = tpu.reciprocal %398 {approx = true} : vector<10x1xf32> -> vector<10x1xf32>
    %400 = vector.broadcast %399 : vector<10x1xf32> to vector<10x10xf32>
    %401 = arith.mulf %396, %400 : vector<10x10xf32>
    %cst_141 = arith.constant dense<0.000000e+00> : vector<10x8xf32>
    %402 = tpu.matmul %401, %389, %cst_141 {dimension_numbers = #tpu.dot_dimension_numbers<[1], [0], [0], [1], [0, 0, 1, 1], [], []>} : vector<10x10xf32>, vector<10x8xf32>, vector<10x8xf32> -> vector<10x8xf32>
    %403 = vector.extract_strided_slice %354 {offsets = [0, 24], sizes = [10, 8], strides = [1, 1]} : vector<10x96xf32> to vector<10x8xf32>
    %404 = vector.extract_strided_slice %354 {offsets = [0, 56], sizes = [10, 8], strides = [1, 1]} : vector<10x96xf32> to vector<10x8xf32>
    %405 = vector.extract_strided_slice %354 {offsets = [0, 88], sizes = [10, 8], strides = [1, 1]} : vector<10x96xf32> to vector<10x8xf32>
    %cst_142 = arith.constant dense<0.000000e+00> : vector<10x10xf32>
    %406 = tpu.matmul %403, %404, %cst_142 {dimension_numbers = #tpu.dot_dimension_numbers<[1], [1], [0], [0], [0, 0, 1, 0], [], []>} : vector<10x8xf32>, vector<10x8xf32>, vector<10x10xf32> -> vector<10x10xf32>
    %407 = arith.addf %406, %5 : vector<10x10xf32>
    %cst_143 = arith.constant dense<0xFF800000> : vector<10xf32>
    %408 = vector.multi_reduction <maximumf>, %407, %cst_143 [1] : vector<10x10xf32> to vector<10xf32>
    %409 = vector.shape_cast %408 : vector<10xf32> to vector<10x1xf32>
    %410 = vector.broadcast %409 : vector<10x1xf32> to vector<10x10xf32>
    %411 = arith.subf %407, %410 : vector<10x10xf32>
    %412 = math.exp %411 : vector<10x10xf32>
    %cst_144 = arith.constant dense<0.000000e+00> : vector<10xf32>
    %413 = vector.multi_reduction <add>, %412, %cst_144 [1] : vector<10x10xf32> to vector<10xf32>
    %414 = vector.shape_cast %413 : vector<10xf32> to vector<10x1xf32>
    %415 = tpu.reciprocal %414 {approx = true} : vector<10x1xf32> -> vector<10x1xf32>
    %416 = vector.broadcast %415 : vector<10x1xf32> to vector<10x10xf32>
    %417 = arith.mulf %412, %416 : vector<10x10xf32>
    %cst_145 = arith.constant dense<0.000000e+00> : vector<10x8xf32>
    %418 = tpu.matmul %417, %405, %cst_145 {dimension_numbers = #tpu.dot_dimension_numbers<[1], [0], [0], [1], [0, 0, 1, 1], [], []>} : vector<10x10xf32>, vector<10x8xf32>, vector<10x8xf32> -> vector<10x8xf32>
    %419 = tpu.concatenate %370, %386, %402, %418 in 1 : vector<10x8xf32>, vector<10x8xf32>, vector<10x8xf32>, vector<10x8xf32> -> vector<10x32xf32>
    %c2_146 = arith.constant 2 : index
    %c0_147 = arith.constant 0 : index
    %c0_148 = arith.constant 0 : index
    %420 = vector.load %arg7[%c2_146, %c0_147, %c0_148] : memref<4x32x32xf32, #tpu.memory_space<vmem>>, vector<1x32x32xf32>
    %421 = vector.shape_cast %420 : vector<1x32x32xf32> to vector<32x32xf32>
    %cst_149 = arith.constant dense<0.000000e+00> : vector<10x32xf32>
    %422 = tpu.matmul %419, %421, %cst_149 {dimension_numbers = #tpu.dot_dimension_numbers<[1], [0], [0], [1], [0, 0, 1, 1], [], []>} : vector<10x32xf32>, vector<32x32xf32>, vector<10x32xf32> -> vector<10x32xf32>
    %423 = arith.addf %317, %422 : vector<10x32xf32>
    %424 = vector.broadcast %322 : vector<1x32xf32> to vector<10x32xf32>
    %425 = arith.addf %423, %424 : vector<10x32xf32>
    %cst_150 = arith.constant dense<0.000000e+00> : vector<10xf32>
    %426 = vector.multi_reduction <add>, %425, %cst_150 [1] : vector<10x32xf32> to vector<10xf32>
    %427 = vector.shape_cast %426 : vector<10xf32> to vector<10x1xf32>
    %cst_151 = arith.constant 3.200000e+01 : f32
    %428 = vector.broadcast %cst_151 : f32 to vector<10x1xf32>
    %429 = arith.divf %427, %428 : vector<10x1xf32>
    %430 = vector.broadcast %429 : vector<10x1xf32> to vector<10x32xf32>
    %431 = arith.subf %425, %430 : vector<10x32xf32>
    %432 = arith.mulf %431, %431 : vector<10x32xf32>
    %cst_152 = arith.constant dense<0.000000e+00> : vector<10xf32>
    %433 = vector.multi_reduction <add>, %432, %cst_152 [1] : vector<10x32xf32> to vector<10xf32>
    %434 = vector.shape_cast %433 : vector<10xf32> to vector<10x1xf32>
    %cst_153 = arith.constant 3.200000e+01 : f32
    %435 = vector.broadcast %cst_153 : f32 to vector<10x1xf32>
    %436 = arith.divf %434, %435 : vector<10x1xf32>
    %437 = vector.broadcast %429 : vector<10x1xf32> to vector<10x32xf32>
    %438 = arith.subf %425, %437 : vector<10x32xf32>
    %cst_154 = arith.constant 9.99999997E-7 : f32
    %439 = vector.broadcast %cst_154 : f32 to vector<10x1xf32>
    %440 = arith.addf %436, %439 : vector<10x1xf32>
    %441 = math.rsqrt %440 : vector<10x1xf32>
    %442 = vector.broadcast %441 : vector<10x1xf32> to vector<10x32xf32>
    %443 = arith.mulf %438, %442 : vector<10x32xf32>
    %444 = vector.broadcast %323 : vector<1x32xf32> to vector<10x32xf32>
    %445 = arith.mulf %443, %444 : vector<10x32xf32>
    %446 = vector.broadcast %324 : vector<1x32xf32> to vector<10x32xf32>
    %447 = arith.addf %445, %446 : vector<10x32xf32>
    %c2_155 = arith.constant 2 : index
    %c0_156 = arith.constant 0 : index
    %c0_157 = arith.constant 0 : index
    %448 = vector.load %arg8[%c2_155, %c0_156, %c0_157] : memref<4x32x128xf32, #tpu.memory_space<vmem>>, vector<1x32x128xf32>
    %449 = vector.shape_cast %448 : vector<1x32x128xf32> to vector<32x128xf32>
    %cst_158 = arith.constant dense<0.000000e+00> : vector<10x128xf32>
    %450 = tpu.matmul %447, %449, %cst_158 {dimension_numbers = #tpu.dot_dimension_numbers<[1], [0], [0], [1], [0, 0, 1, 1], [], []>} : vector<10x32xf32>, vector<32x128xf32>, vector<10x128xf32> -> vector<10x128xf32>
    %c2_159 = arith.constant 2 : index
    %c0_160 = arith.constant 0 : index
    %c0_161 = arith.constant 0 : index
    %451 = vector.load %arg9[%c2_159, %c0_160, %c0_161] : memref<4x1x128xf32, #tpu.memory_space<vmem>>, vector<1x1x128xf32>
    %452 = vector.shape_cast %451 : vector<1x1x128xf32> to vector<1x128xf32>
    %453 = vector.broadcast %452 : vector<1x128xf32> to vector<10x128xf32>
    %454 = arith.addf %450, %453 : vector<10x128xf32>
    %455 = arith.mulf %454, %454 : vector<10x128xf32>
    %456 = arith.mulf %454, %455 : vector<10x128xf32>
    %cst_162 = arith.constant 4.471500e-02 : f32
    %457 = vector.broadcast %cst_162 : f32 to vector<10x128xf32>
    %458 = arith.mulf %457, %456 : vector<10x128xf32>
    %459 = arith.addf %454, %458 : vector<10x128xf32>
    %cst_163 = arith.constant 0.797884583 : f32
    %460 = vector.broadcast %cst_163 : f32 to vector<10x128xf32>
    %461 = arith.mulf %460, %459 : vector<10x128xf32>
    %462 = math.tanh %461 : vector<10x128xf32>
    %cst_164 = arith.constant 1.000000e+00 : f32
    %463 = vector.broadcast %cst_164 : f32 to vector<10x128xf32>
    %464 = arith.addf %463, %462 : vector<10x128xf32>
    %cst_165 = arith.constant 5.000000e-01 : f32
    %465 = vector.broadcast %cst_165 : f32 to vector<10x128xf32>
    %466 = arith.mulf %465, %464 : vector<10x128xf32>
    %467 = arith.mulf %454, %466 : vector<10x128xf32>
    %c2_166 = arith.constant 2 : index
    %c0_167 = arith.constant 0 : index
    %c0_168 = arith.constant 0 : index
    %468 = vector.load %arg10[%c2_166, %c0_167, %c0_168] : memref<4x128x32xf32, #tpu.memory_space<vmem>>, vector<1x128x32xf32>
    %469 = vector.shape_cast %468 : vector<1x128x32xf32> to vector<128x32xf32>
    %cst_169 = arith.constant dense<0.000000e+00> : vector<10x32xf32>
    %470 = tpu.matmul %467, %469, %cst_169 {dimension_numbers = #tpu.dot_dimension_numbers<[1], [0], [0], [1], [0, 0, 1, 1], [], []>} : vector<10x128xf32>, vector<128x32xf32>, vector<10x32xf32> -> vector<10x32xf32>
    %471 = arith.addf %425, %470 : vector<10x32xf32>
    %472 = vector.broadcast %325 : vector<1x32xf32> to vector<10x32xf32>
    %473 = arith.addf %471, %472 : vector<10x32xf32>
    %c3 = arith.constant 3 : index
    %c0_170 = arith.constant 0 : index
    %c0_171 = arith.constant 0 : index
    %474 = vector.load %arg11[%c3, %c0_170, %c0_171] : memref<4x8x32xf32, #tpu.memory_space<vmem>>, vector<1x8x32xf32>
    %475 = vector.shape_cast %474 : vector<1x8x32xf32> to vector<8x32xf32>
    %476 = vector.extract_strided_slice %475 {offsets = [0, 0], sizes = [1, 32], strides = [1, 1]} : vector<8x32xf32> to vector<1x32xf32>
    %477 = vector.extract_strided_slice %475 {offsets = [1, 0], sizes = [1, 32], strides = [1, 1]} : vector<8x32xf32> to vector<1x32xf32>
    %478 = vector.extract_strided_slice %475 {offsets = [2, 0], sizes = [1, 32], strides = [1, 1]} : vector<8x32xf32> to vector<1x32xf32>
    %479 = vector.extract_strided_slice %475 {offsets = [3, 0], sizes = [1, 32], strides = [1, 1]} : vector<8x32xf32> to vector<1x32xf32>
    %480 = vector.extract_strided_slice %475 {offsets = [4, 0], sizes = [1, 32], strides = [1, 1]} : vector<8x32xf32> to vector<1x32xf32>
    %481 = vector.extract_strided_slice %475 {offsets = [5, 0], sizes = [1, 32], strides = [1, 1]} : vector<8x32xf32> to vector<1x32xf32>
    %cst_172 = arith.constant dense<0.000000e+00> : vector<10xf32>
    %482 = vector.multi_reduction <add>, %473, %cst_172 [1] : vector<10x32xf32> to vector<10xf32>
    %483 = vector.shape_cast %482 : vector<10xf32> to vector<10x1xf32>
    %cst_173 = arith.constant 3.200000e+01 : f32
    %484 = vector.broadcast %cst_173 : f32 to vector<10x1xf32>
    %485 = arith.divf %483, %484 : vector<10x1xf32>
    %486 = vector.broadcast %485 : vector<10x1xf32> to vector<10x32xf32>
    %487 = arith.subf %473, %486 : vector<10x32xf32>
    %488 = arith.mulf %487, %487 : vector<10x32xf32>
    %cst_174 = arith.constant dense<0.000000e+00> : vector<10xf32>
    %489 = vector.multi_reduction <add>, %488, %cst_174 [1] : vector<10x32xf32> to vector<10xf32>
    %490 = vector.shape_cast %489 : vector<10xf32> to vector<10x1xf32>
    %cst_175 = arith.constant 3.200000e+01 : f32
    %491 = vector.broadcast %cst_175 : f32 to vector<10x1xf32>
    %492 = arith.divf %490, %491 : vector<10x1xf32>
    %493 = vector.broadcast %485 : vector<10x1xf32> to vector<10x32xf32>
    %494 = arith.subf %473, %493 : vector<10x32xf32>
    %cst_176 = arith.constant 9.99999997E-7 : f32
    %495 = vector.broadcast %cst_176 : f32 to vector<10x1xf32>
    %496 = arith.addf %492, %495 : vector<10x1xf32>
    %497 = math.rsqrt %496 : vector<10x1xf32>
    %498 = vector.broadcast %497 : vector<10x1xf32> to vector<10x32xf32>
    %499 = arith.mulf %494, %498 : vector<10x32xf32>
    %500 = vector.broadcast %476 : vector<1x32xf32> to vector<10x32xf32>
    %501 = arith.mulf %499, %500 : vector<10x32xf32>
    %502 = vector.broadcast %477 : vector<1x32xf32> to vector<10x32xf32>
    %503 = arith.addf %501, %502 : vector<10x32xf32>
    %c3_177 = arith.constant 3 : index
    %c0_178 = arith.constant 0 : index
    %c0_179 = arith.constant 0 : index
    %504 = vector.load %arg5[%c3_177, %c0_178, %c0_179] : memref<4x32x96xf32, #tpu.memory_space<vmem>>, vector<1x32x96xf32>
    %505 = vector.shape_cast %504 : vector<1x32x96xf32> to vector<32x96xf32>
    %cst_180 = arith.constant dense<0.000000e+00> : vector<10x96xf32>
    %506 = tpu.matmul %503, %505, %cst_180 {dimension_numbers = #tpu.dot_dimension_numbers<[1], [0], [0], [1], [0, 0, 1, 1], [], []>} : vector<10x32xf32>, vector<32x96xf32>, vector<10x96xf32> -> vector<10x96xf32>
    %c3_181 = arith.constant 3 : index
    %c0_182 = arith.constant 0 : index
    %c0_183 = arith.constant 0 : index
    %507 = vector.load %arg6[%c3_181, %c0_182, %c0_183] : memref<4x1x96xf32, #tpu.memory_space<vmem>>, vector<1x1x96xf32>
    %508 = vector.shape_cast %507 : vector<1x1x96xf32> to vector<1x96xf32>
    %509 = vector.broadcast %508 : vector<1x96xf32> to vector<10x96xf32>
    %510 = arith.addf %506, %509 : vector<10x96xf32>
    %511 = vector.extract_strided_slice %510 {offsets = [0, 0], sizes = [10, 8], strides = [1, 1]} : vector<10x96xf32> to vector<10x8xf32>
    %512 = vector.extract_strided_slice %510 {offsets = [0, 32], sizes = [10, 8], strides = [1, 1]} : vector<10x96xf32> to vector<10x8xf32>
    %513 = vector.extract_strided_slice %510 {offsets = [0, 64], sizes = [10, 8], strides = [1, 1]} : vector<10x96xf32> to vector<10x8xf32>
    %cst_184 = arith.constant dense<0.000000e+00> : vector<10x10xf32>
    %514 = tpu.matmul %511, %512, %cst_184 {dimension_numbers = #tpu.dot_dimension_numbers<[1], [1], [0], [0], [0, 0, 1, 0], [], []>} : vector<10x8xf32>, vector<10x8xf32>, vector<10x10xf32> -> vector<10x10xf32>
    %515 = arith.addf %514, %5 : vector<10x10xf32>
    %cst_185 = arith.constant dense<0xFF800000> : vector<10xf32>
    %516 = vector.multi_reduction <maximumf>, %515, %cst_185 [1] : vector<10x10xf32> to vector<10xf32>
    %517 = vector.shape_cast %516 : vector<10xf32> to vector<10x1xf32>
    %518 = vector.broadcast %517 : vector<10x1xf32> to vector<10x10xf32>
    %519 = arith.subf %515, %518 : vector<10x10xf32>
    %520 = math.exp %519 : vector<10x10xf32>
    %cst_186 = arith.constant dense<0.000000e+00> : vector<10xf32>
    %521 = vector.multi_reduction <add>, %520, %cst_186 [1] : vector<10x10xf32> to vector<10xf32>
    %522 = vector.shape_cast %521 : vector<10xf32> to vector<10x1xf32>
    %523 = tpu.reciprocal %522 {approx = true} : vector<10x1xf32> -> vector<10x1xf32>
    %524 = vector.broadcast %523 : vector<10x1xf32> to vector<10x10xf32>
    %525 = arith.mulf %520, %524 : vector<10x10xf32>
    %cst_187 = arith.constant dense<0.000000e+00> : vector<10x8xf32>
    %526 = tpu.matmul %525, %513, %cst_187 {dimension_numbers = #tpu.dot_dimension_numbers<[1], [0], [0], [1], [0, 0, 1, 1], [], []>} : vector<10x10xf32>, vector<10x8xf32>, vector<10x8xf32> -> vector<10x8xf32>
    %527 = vector.extract_strided_slice %510 {offsets = [0, 8], sizes = [10, 8], strides = [1, 1]} : vector<10x96xf32> to vector<10x8xf32>
    %528 = vector.extract_strided_slice %510 {offsets = [0, 40], sizes = [10, 8], strides = [1, 1]} : vector<10x96xf32> to vector<10x8xf32>
    %529 = vector.extract_strided_slice %510 {offsets = [0, 72], sizes = [10, 8], strides = [1, 1]} : vector<10x96xf32> to vector<10x8xf32>
    %cst_188 = arith.constant dense<0.000000e+00> : vector<10x10xf32>
    %530 = tpu.matmul %527, %528, %cst_188 {dimension_numbers = #tpu.dot_dimension_numbers<[1], [1], [0], [0], [0, 0, 1, 0], [], []>} : vector<10x8xf32>, vector<10x8xf32>, vector<10x10xf32> -> vector<10x10xf32>
    %531 = arith.addf %530, %5 : vector<10x10xf32>
    %cst_189 = arith.constant dense<0xFF800000> : vector<10xf32>
    %532 = vector.multi_reduction <maximumf>, %531, %cst_189 [1] : vector<10x10xf32> to vector<10xf32>
    %533 = vector.shape_cast %532 : vector<10xf32> to vector<10x1xf32>
    %534 = vector.broadcast %533 : vector<10x1xf32> to vector<10x10xf32>
    %535 = arith.subf %531, %534 : vector<10x10xf32>
    %536 = math.exp %535 : vector<10x10xf32>
    %cst_190 = arith.constant dense<0.000000e+00> : vector<10xf32>
    %537 = vector.multi_reduction <add>, %536, %cst_190 [1] : vector<10x10xf32> to vector<10xf32>
    %538 = vector.shape_cast %537 : vector<10xf32> to vector<10x1xf32>
    %539 = tpu.reciprocal %538 {approx = true} : vector<10x1xf32> -> vector<10x1xf32>
    %540 = vector.broadcast %539 : vector<10x1xf32> to vector<10x10xf32>
    %541 = arith.mulf %536, %540 : vector<10x10xf32>
    %cst_191 = arith.constant dense<0.000000e+00> : vector<10x8xf32>
    %542 = tpu.matmul %541, %529, %cst_191 {dimension_numbers = #tpu.dot_dimension_numbers<[1], [0], [0], [1], [0, 0, 1, 1], [], []>} : vector<10x10xf32>, vector<10x8xf32>, vector<10x8xf32> -> vector<10x8xf32>
    %543 = vector.extract_strided_slice %510 {offsets = [0, 16], sizes = [10, 8], strides = [1, 1]} : vector<10x96xf32> to vector<10x8xf32>
    %544 = vector.extract_strided_slice %510 {offsets = [0, 48], sizes = [10, 8], strides = [1, 1]} : vector<10x96xf32> to vector<10x8xf32>
    %545 = vector.extract_strided_slice %510 {offsets = [0, 80], sizes = [10, 8], strides = [1, 1]} : vector<10x96xf32> to vector<10x8xf32>
    %cst_192 = arith.constant dense<0.000000e+00> : vector<10x10xf32>
    %546 = tpu.matmul %543, %544, %cst_192 {dimension_numbers = #tpu.dot_dimension_numbers<[1], [1], [0], [0], [0, 0, 1, 0], [], []>} : vector<10x8xf32>, vector<10x8xf32>, vector<10x10xf32> -> vector<10x10xf32>
    %547 = arith.addf %546, %5 : vector<10x10xf32>
    %cst_193 = arith.constant dense<0xFF800000> : vector<10xf32>
    %548 = vector.multi_reduction <maximumf>, %547, %cst_193 [1] : vector<10x10xf32> to vector<10xf32>
    %549 = vector.shape_cast %548 : vector<10xf32> to vector<10x1xf32>
    %550 = vector.broadcast %549 : vector<10x1xf32> to vector<10x10xf32>
    %551 = arith.subf %547, %550 : vector<10x10xf32>
    %552 = math.exp %551 : vector<10x10xf32>
    %cst_194 = arith.constant dense<0.000000e+00> : vector<10xf32>
    %553 = vector.multi_reduction <add>, %552, %cst_194 [1] : vector<10x10xf32> to vector<10xf32>
    %554 = vector.shape_cast %553 : vector<10xf32> to vector<10x1xf32>
    %555 = tpu.reciprocal %554 {approx = true} : vector<10x1xf32> -> vector<10x1xf32>
    %556 = vector.broadcast %555 : vector<10x1xf32> to vector<10x10xf32>
    %557 = arith.mulf %552, %556 : vector<10x10xf32>
    %cst_195 = arith.constant dense<0.000000e+00> : vector<10x8xf32>
    %558 = tpu.matmul %557, %545, %cst_195 {dimension_numbers = #tpu.dot_dimension_numbers<[1], [0], [0], [1], [0, 0, 1, 1], [], []>} : vector<10x10xf32>, vector<10x8xf32>, vector<10x8xf32> -> vector<10x8xf32>
    %559 = vector.extract_strided_slice %510 {offsets = [0, 24], sizes = [10, 8], strides = [1, 1]} : vector<10x96xf32> to vector<10x8xf32>
    %560 = vector.extract_strided_slice %510 {offsets = [0, 56], sizes = [10, 8], strides = [1, 1]} : vector<10x96xf32> to vector<10x8xf32>
    %561 = vector.extract_strided_slice %510 {offsets = [0, 88], sizes = [10, 8], strides = [1, 1]} : vector<10x96xf32> to vector<10x8xf32>
    %cst_196 = arith.constant dense<0.000000e+00> : vector<10x10xf32>
    %562 = tpu.matmul %559, %560, %cst_196 {dimension_numbers = #tpu.dot_dimension_numbers<[1], [1], [0], [0], [0, 0, 1, 0], [], []>} : vector<10x8xf32>, vector<10x8xf32>, vector<10x10xf32> -> vector<10x10xf32>
    %563 = arith.addf %562, %5 : vector<10x10xf32>
    %cst_197 = arith.constant dense<0xFF800000> : vector<10xf32>
    %564 = vector.multi_reduction <maximumf>, %563, %cst_197 [1] : vector<10x10xf32> to vector<10xf32>
    %565 = vector.shape_cast %564 : vector<10xf32> to vector<10x1xf32>
    %566 = vector.broadcast %565 : vector<10x1xf32> to vector<10x10xf32>
    %567 = arith.subf %563, %566 : vector<10x10xf32>
    %568 = math.exp %567 : vector<10x10xf32>
    %cst_198 = arith.constant dense<0.000000e+00> : vector<10xf32>
    %569 = vector.multi_reduction <add>, %568, %cst_198 [1] : vector<10x10xf32> to vector<10xf32>
    %570 = vector.shape_cast %569 : vector<10xf32> to vector<10x1xf32>
    %571 = tpu.reciprocal %570 {approx = true} : vector<10x1xf32> -> vector<10x1xf32>
    %572 = vector.broadcast %571 : vector<10x1xf32> to vector<10x10xf32>
    %573 = arith.mulf %568, %572 : vector<10x10xf32>
    %cst_199 = arith.constant dense<0.000000e+00> : vector<10x8xf32>
    %574 = tpu.matmul %573, %561, %cst_199 {dimension_numbers = #tpu.dot_dimension_numbers<[1], [0], [0], [1], [0, 0, 1, 1], [], []>} : vector<10x10xf32>, vector<10x8xf32>, vector<10x8xf32> -> vector<10x8xf32>
    %575 = tpu.concatenate %526, %542, %558, %574 in 1 : vector<10x8xf32>, vector<10x8xf32>, vector<10x8xf32>, vector<10x8xf32> -> vector<10x32xf32>
    %c3_200 = arith.constant 3 : index
    %c0_201 = arith.constant 0 : index
    %c0_202 = arith.constant 0 : index
    %576 = vector.load %arg7[%c3_200, %c0_201, %c0_202] : memref<4x32x32xf32, #tpu.memory_space<vmem>>, vector<1x32x32xf32>
    %577 = vector.shape_cast %576 : vector<1x32x32xf32> to vector<32x32xf32>
    %cst_203 = arith.constant dense<0.000000e+00> : vector<10x32xf32>
    %578 = tpu.matmul %575, %577, %cst_203 {dimension_numbers = #tpu.dot_dimension_numbers<[1], [0], [0], [1], [0, 0, 1, 1], [], []>} : vector<10x32xf32>, vector<32x32xf32>, vector<10x32xf32> -> vector<10x32xf32>
    %579 = arith.addf %473, %578 : vector<10x32xf32>
    %580 = vector.broadcast %478 : vector<1x32xf32> to vector<10x32xf32>
    %581 = arith.addf %579, %580 : vector<10x32xf32>
    %cst_204 = arith.constant dense<0.000000e+00> : vector<10xf32>
    %582 = vector.multi_reduction <add>, %581, %cst_204 [1] : vector<10x32xf32> to vector<10xf32>
    %583 = vector.shape_cast %582 : vector<10xf32> to vector<10x1xf32>
    %cst_205 = arith.constant 3.200000e+01 : f32
    %584 = vector.broadcast %cst_205 : f32 to vector<10x1xf32>
    %585 = arith.divf %583, %584 : vector<10x1xf32>
    %586 = vector.broadcast %585 : vector<10x1xf32> to vector<10x32xf32>
    %587 = arith.subf %581, %586 : vector<10x32xf32>
    %588 = arith.mulf %587, %587 : vector<10x32xf32>
    %cst_206 = arith.constant dense<0.000000e+00> : vector<10xf32>
    %589 = vector.multi_reduction <add>, %588, %cst_206 [1] : vector<10x32xf32> to vector<10xf32>
    %590 = vector.shape_cast %589 : vector<10xf32> to vector<10x1xf32>
    %cst_207 = arith.constant 3.200000e+01 : f32
    %591 = vector.broadcast %cst_207 : f32 to vector<10x1xf32>
    %592 = arith.divf %590, %591 : vector<10x1xf32>
    %593 = vector.broadcast %585 : vector<10x1xf32> to vector<10x32xf32>
    %594 = arith.subf %581, %593 : vector<10x32xf32>
    %cst_208 = arith.constant 9.99999997E-7 : f32
    %595 = vector.broadcast %cst_208 : f32 to vector<10x1xf32>
    %596 = arith.addf %592, %595 : vector<10x1xf32>
    %597 = math.rsqrt %596 : vector<10x1xf32>
    %598 = vector.broadcast %597 : vector<10x1xf32> to vector<10x32xf32>
    %599 = arith.mulf %594, %598 : vector<10x32xf32>
    %600 = vector.broadcast %479 : vector<1x32xf32> to vector<10x32xf32>
    %601 = arith.mulf %599, %600 : vector<10x32xf32>
    %602 = vector.broadcast %480 : vector<1x32xf32> to vector<10x32xf32>
    %603 = arith.addf %601, %602 : vector<10x32xf32>
    %c3_209 = arith.constant 3 : index
    %c0_210 = arith.constant 0 : index
    %c0_211 = arith.constant 0 : index
    %604 = vector.load %arg8[%c3_209, %c0_210, %c0_211] : memref<4x32x128xf32, #tpu.memory_space<vmem>>, vector<1x32x128xf32>
    %605 = vector.shape_cast %604 : vector<1x32x128xf32> to vector<32x128xf32>
    %cst_212 = arith.constant dense<0.000000e+00> : vector<10x128xf32>
    %606 = tpu.matmul %603, %605, %cst_212 {dimension_numbers = #tpu.dot_dimension_numbers<[1], [0], [0], [1], [0, 0, 1, 1], [], []>} : vector<10x32xf32>, vector<32x128xf32>, vector<10x128xf32> -> vector<10x128xf32>
    %c3_213 = arith.constant 3 : index
    %c0_214 = arith.constant 0 : index
    %c0_215 = arith.constant 0 : index
    %607 = vector.load %arg9[%c3_213, %c0_214, %c0_215] : memref<4x1x128xf32, #tpu.memory_space<vmem>>, vector<1x1x128xf32>
    %608 = vector.shape_cast %607 : vector<1x1x128xf32> to vector<1x128xf32>
    %609 = vector.broadcast %608 : vector<1x128xf32> to vector<10x128xf32>
    %610 = arith.addf %606, %609 : vector<10x128xf32>
    %611 = arith.mulf %610, %610 : vector<10x128xf32>
    %612 = arith.mulf %610, %611 : vector<10x128xf32>
    %cst_216 = arith.constant 4.471500e-02 : f32
    %613 = vector.broadcast %cst_216 : f32 to vector<10x128xf32>
    %614 = arith.mulf %613, %612 : vector<10x128xf32>
    %615 = arith.addf %610, %614 : vector<10x128xf32>
    %cst_217 = arith.constant 0.797884583 : f32
    %616 = vector.broadcast %cst_217 : f32 to vector<10x128xf32>
    %617 = arith.mulf %616, %615 : vector<10x128xf32>
    %618 = math.tanh %617 : vector<10x128xf32>
    %cst_218 = arith.constant 1.000000e+00 : f32
    %619 = vector.broadcast %cst_218 : f32 to vector<10x128xf32>
    %620 = arith.addf %619, %618 : vector<10x128xf32>
    %cst_219 = arith.constant 5.000000e-01 : f32
    %621 = vector.broadcast %cst_219 : f32 to vector<10x128xf32>
    %622 = arith.mulf %621, %620 : vector<10x128xf32>
    %623 = arith.mulf %610, %622 : vector<10x128xf32>
    %c3_220 = arith.constant 3 : index
    %c0_221 = arith.constant 0 : index
    %c0_222 = arith.constant 0 : index
    %624 = vector.load %arg10[%c3_220, %c0_221, %c0_222] : memref<4x128x32xf32, #tpu.memory_space<vmem>>, vector<1x128x32xf32>
    %625 = vector.shape_cast %624 : vector<1x128x32xf32> to vector<128x32xf32>
    %cst_223 = arith.constant dense<0.000000e+00> : vector<10x32xf32>
    %626 = tpu.matmul %623, %625, %cst_223 {dimension_numbers = #tpu.dot_dimension_numbers<[1], [0], [0], [1], [0, 0, 1, 1], [], []>} : vector<10x128xf32>, vector<128x32xf32>, vector<10x32xf32> -> vector<10x32xf32>
    %627 = arith.addf %581, %626 : vector<10x32xf32>
    %628 = vector.broadcast %481 : vector<1x32xf32> to vector<10x32xf32>
    %629 = arith.addf %627, %628 : vector<10x32xf32>
    %c0_224 = arith.constant 0 : index
    %c0_225 = arith.constant 0 : index
    %630 = vector.load %arg12[%c0_224, %c0_225] : memref<10x32xf32, #tpu.memory_space<vmem>>, vector<10x32xf32>
    tpu.vector_store %arg12[%c0_224, %c0_225], %629 {strides = array<i32>} : memref<10x32xf32, #tpu.memory_space<vmem>>, vector<10x32xf32>,
    return
  }
  func.func @transform_0(%arg0: i32) -> (i32, i32) {
    %c0_i32 = arith.constant 0 : i32
    %c0_i32_0 = arith.constant 0 : i32
    %c0_i32_1 = arith.constant 0 : i32
    return %c0_i32, %c0_i32_0 : i32, i32
  }
  func.func @transform_1(%arg0: i32) -> (i32, i32) {
    %c0_i32 = arith.constant 0 : i32
    %c0_i32_0 = arith.constant 0 : i32
    %c0_i32_1 = arith.constant 0 : i32
    return %c0_i32, %c0_i32_0 : i32, i32
  }
  func.func @transform_2(%arg0: i32) -> (i32, i32) {
    %c0_i32 = arith.constant 0 : i32
    %c0_i32_0 = arith.constant 0 : i32
    %c0_i32_1 = arith.constant 0 : i32
    return %c0_i32, %c0_i32_0 : i32, i32
  }
  func.func @transform_3(%arg0: i32) -> (i32, i32) {
    %c0_i32 = arith.constant 0 : i32
    %c0_i32_0 = arith.constant 0 : i32
    %c0_i32_1 = arith.constant 0 : i32
    return %c0_i32, %c0_i32_0 : i32, i32
  }
  func.func @transform_4(%arg0: i32) -> (i32, i32, i32) {
    %c0_i32 = arith.constant 0 : i32
    %c0_i32_0 = arith.constant 0 : i32
    %c0_i32_1 = arith.constant 0 : i32
    %c0_i32_2 = arith.constant 0 : i32
    return %c0_i32, %c0_i32_0, %c0_i32_1 : i32, i32, i32
  }
  func.func @transform_5(%arg0: i32) -> (i32, i32, i32) {
    %c0_i32 = arith.constant 0 : i32
    %c0_i32_0 = arith.constant 0 : i32
    %c0_i32_1 = arith.constant 0 : i32
    %c0_i32_2 = arith.constant 0 : i32
    return %c0_i32, %c0_i32_0, %c0_i32_1 : i32, i32, i32
  }
  func.func @transform_6(%arg0: i32) -> (i32, i32, i32) {
    %c0_i32 = arith.constant 0 : i32
    %c0_i32_0 = arith.constant 0 : i32
    %c0_i32_1 = arith.constant 0 : i32
    %c0_i32_2 = arith.constant 0 : i32
    return %c0_i32, %c0_i32_0, %c0_i32_1 : i32, i32, i32
  }
  func.func @transform_7(%arg0: i32) -> (i32, i32, i32) {
    %c0_i32 = arith.constant 0 : i32
    %c0_i32_0 = arith.constant 0 : i32
    %c0_i32_1 = arith.constant 0 : i32
    %c0_i32_2 = arith.constant 0 : i32
    return %c0_i32, %c0_i32_0, %c0_i32_1 : i32, i32, i32
  }
  func.func @transform_8(%arg0: i32) -> (i32, i32, i32) {
    %c0_i32 = arith.constant 0 : i32
    %c0_i32_0 = arith.constant 0 : i32
    %c0_i32_1 = arith.constant 0 : i32
    %c0_i32_2 = arith.constant 0 : i32
    return %c0_i32, %c0_i32_0, %c0_i32_1 : i32, i32, i32
  }
  func.func @transform_9(%arg0: i32) -> (i32, i32, i32) {
    %c0_i32 = arith.constant 0 : i32
    %c0_i32_0 = arith.constant 0 : i32
    %c0_i32_1 = arith.constant 0 : i32
    %c0_i32_2 = arith.constant 0 : i32
    return %c0_i32, %c0_i32_0, %c0_i32_1 : i32, i32, i32
  }
  func.func @transform_10(%arg0: i32) -> (i32, i32, i32) {
    %c0_i32 = arith.constant 0 : i32
    %c0_i32_0 = arith.constant 0 : i32
    %c0_i32_1 = arith.constant 0 : i32
    %c0_i32_2 = arith.constant 0 : i32
    return %c0_i32, %c0_i32_0, %c0_i32_1 : i32, i32, i32
  }
  func.func @transform_11(%arg0: i32) -> (i32, i32) {
    %c0_i32 = arith.constant 0 : i32
    %c0_i32_0 = arith.constant 0 : i32
    %c0_i32_1 = arith.constant 0 : i32
    return %c0_i32, %c0_i32_0 : i32, i32
  }
}

</mosaic_0001>

<bundles_post_ra>
// kernel: deit_forward.1
= control target key start
LH: loop header
LB: loop body
LE: loop exit
PB: predicated region body
PF: predicated region fallthrough
CT: control target
= control target key end

     0   :  { %vm376_vm0 = vcmask 261120   ;;  %vm380_vm1 = vcmask 254976   ;;  %vm515_vm2 = vcmask 64512   ;;  %s7609_s18 = smov 96   ;;  %s7610_s19 = smov 88   ;;  %vm599_vm4 = vcmask 80896   ;;  %s9167_s2 = inlined_call_operand.vmem [shape: f32[768,32], index: 2, kind: input, shape index: {}]   ;;  %s9168_s0 = inlined_call_operand.vmem [shape: f32[10,768], index: 0, kind: input, shape index: {}]   ;;  %s9169_s3 = inlined_call_operand.vmem [shape: f32[10,32], index: 3, kind: input, shape index: {}]   ;;  %s9170_s4 = inlined_call_operand.vmem [shape: f32[4,32,96], index: 4, kind: input, shape index: {}]   ;;  %s9171_s10 = inlined_call_operand.vmem [shape: f32[4,8,32], index: 10, kind: input, shape index: {}]   ;;  %s9172_s5 = inlined_call_operand.vmem [shape: f32[4,1,96], index: 5, kind: input, shape index: {}]   ;;  %s9173_s1 = inlined_call_operand.vmem [shape: f32[10,10], index: 1, kind: input, shape index: {}]   ;;  %s9174_s6 = inlined_call_operand.vmem [shape: f32[4,32,32], index: 6, kind: input, shape index: {}]   ;;  %s9175_s7 = inlined_call_operand.vmem [shape: f32[4,32,128], index: 7, kind: input, shape index: {}]   ;;  %s9176_s9 = inlined_call_operand.vmem [shape: f32[4,128,32], index: 9, kind: input, shape index: {}]   ;;  %s9177_s8 = inlined_call_operand.vmem [shape: f32[4,1,128], index: 8, kind: input, shape index: {}]   ;;  %s9178_s11 = inlined_call_operand.vmem [shape: f32[10,32], index: 11, kind: output, shape index: {}]  }
   0x1   :  { %v66_v0 = vld [vmem:[%s9167_s2 + $0x80] sm:$0xff]  ;;  %v67_v1 = vld [vmem:[%s9167_s2 + $0x88] sm:$0xff]  ;;  %v68_v11 = vld [vmem:[%s9167_s2 + $0x90] sm:$0xff]  ;;  %s7611_s20 = smov 120   ;;  %s7612_s21 = smov 80   ;;  %vm603_vm5 = vcmask 74752  }
   0x2   :  { %v50_v2 = vld [vmem:[%s9167_s2] sm:$0xff]  ;;  %v6742_v3 = vpack.c.bf16 %v67_v1, %v66_v0  ;;  %v51_v4 = vld [vmem:[%s9167_s2 + $0x8] sm:$0xff]  ;;  %v69_v13 = vld [vmem:[%s9167_s2 + $0x98] sm:$0xff]  ;;  %s7613_s22 = smov 112   ;;  %s7614_s26 = smov 64   ;;  %vm634_vm6 = vcmask 1041408  }
   0x3   :  { %v98_v5 = vld [vmem:[%s9167_s2 + $0x180] sm:$0xff]  ;;  %v99_v6 = vld [vmem:[%s9167_s2 + $0x188] sm:$0xff]  ;;  %v6744_v7 = vpack.c.bf16 %v51_v4, %v50_v2  ;;  %v52_v14 = vld [vmem:[%s9167_s2 + $0x10] sm:$0xff]  ;;  %v6746_v16 = vpack.c.bf16 %v69_v13, %v68_v11  ;;  %vm7615_vm7 = vmmov 1   ;;  %s9189_s27 = smov 72   ;;  %s9187_s28 = smov 104  }
   0x4   :  { %v6774_v8 = vpack.c.bf16 %v99_v6, %v98_v5  ;;  %v82_v9 = vld [vmem:[%s9167_s2 + $0x100] sm:$0xff]  ;;  %v83_v10 = vld [vmem:[%s9167_s2 + $0x108] sm:$0xff]  ;;  %6743 = vmatprep.subr.bf16.mxu0 %v6742_v3  ;;  %v53_v15 = vld [vmem:[%s9167_s2 + $0x18] sm:$0xff]  ;;  %s9185_s29 = smov 40   ;;  %s9183_s30 = smov 8   ;;  %vm1341_vm9 = vcmask 130048  }
   0x5   :  { %v6776_v12 = vpack.c.bf16 %v83_v10, %v82_v9  ;;  %6745 = vmatpush3.bf16.msra.mxu0 %v6744_v7  ;;  %v6748_v17 = vpack.c.bf16 %v53_v15, %v52_v14  ;;  %v100_v18 = vld [vmem:[%s9167_s2 + $0x190] sm:$0xff]  ;;  %v101_v19 = vld [vmem:[%s9167_s2 + $0x198] sm:$0xff]  ;;  %v70_v23 = vld [vmem:[%s9167_s2 + $0xa0] sm:$0xff]  ;;  %s9181_s12 = smov 16   ;;  %s9179_s25 = smov 24   ;;  %vm1344_vm10 = vcmask 195584  }
   0x6   :  { %6775 = vmatprep.subr.bf16.mxu1 %v6774_v8  ;;  %v84_v20 = vld [vmem:[%s9167_s2 + $0x110] sm:$0xff]  ;;  %v6778_v21 = vpack.c.bf16 %v101_v19, %v100_v18  ;;  %v85_v22 = vld [vmem:[%s9167_s2 + $0x118] sm:$0xff]  ;;  %v71_v24 = vld [vmem:[%s9167_s2 + $0xa8] sm:$0xff]  ;;  %6747 = vmatprep.subr.bf16.mxu0 %v6746_v16  ;;  %s9194_s15 = smov 16   ;;  %s9196_s16 = smov 40  }
   0x7   :  { %6777 = vmatpush3.bf16.msra.mxu1 %v6776_v12  ;;  %v6780_v25 = vpack.c.bf16 %v85_v22, %v84_v20  ;;  %v6750_v26 = vpack.c.bf16 %v71_v24, %v70_v23  ;;  %v54_v27 = vld [vmem:[%s9167_s2 + $0x20] sm:$0xff]  ;;  %v55_v28 = vld [vmem:[%s9167_s2 + $0x28] sm:$0xff]  ;;  %v72_v35 = vld [vmem:[%s9167_s2 + $0xb0] sm:$0xff]  ;;  %s9197_s17 = smov 8  }
   0x8   :  { %v102_v29 = vld [vmem:[%s9167_s2 + $0x1a0] sm:$0xff]  ;;  %6779 = vmatprep.subr.bf16.mxu1 %v6778_v21  ;;  %v103_v30 = vld [vmem:[%s9167_s2 + $0x1a8] sm:$0xff]  ;;  %v6752_v33 = vpack.c.bf16 %v55_v28, %v54_v27  ;;  %v73_v36 = vld [vmem:[%s9167_s2 + $0xb8] sm:$0xff] }
   0x9   :  { %v86_v31 = vld [vmem:[%s9167_s2 + $0x120] sm:$0xff]  ;;  %v87_v32 = vld [vmem:[%s9167_s2 + $0x128] sm:$0xff]  ;;  %6749 = vmatpush3.bf16.msra.mxu0 %v6748_v17  ;;  %v6782_v34 = vpack.c.bf16 %v103_v30, %v102_v29  ;;  %v56_v37 = vld [vmem:[%s9167_s2 + $0x30] sm:$0xff]  ;;  %v6754_v39 = vpack.c.bf16 %v73_v36, %v72_v35 }
   0xa   :  { %6751 = vmatprep.subr.bf16.mxu0 %v6750_v26  ;;  %v6784_v38 = vpack.c.bf16 %v87_v32, %v86_v31  ;;  %v57_v40 = vld [vmem:[%s9167_s2 + $0x38] sm:$0xff]  ;;  %v104_v41 = vld [vmem:[%s9167_s2 + $0x1b0] sm:$0xff]  ;;  %v74_v46 = vld [vmem:[%s9167_s2 + $0xc0] sm:$0xff] }
   0xb   :  { %6781 = vmatpush3.bf16.msra.mxu1 %v6780_v25  ;;  %v105_v42 = vld [vmem:[%s9167_s2 + $0x1b8] sm:$0xff]  ;;  %v88_v44 = vld [vmem:[%s9167_s2 + $0x130] sm:$0xff]  ;;  %v75_v47 = vld [vmem:[%s9167_s2 + $0xc8] sm:$0xff]  ;;  %v6756_v48 = vpack.c.bf16 %v57_v40, %v56_v37 }
   0xc   :  { %6783 = vmatprep.subr.bf16.mxu1 %v6782_v34  ;;  %v6786_v43 = vpack.c.bf16 %v105_v42, %v104_v41  ;;  %v89_v45 = vld [vmem:[%s9167_s2 + $0x138] sm:$0xff]  ;;  %v106_v49 = vld [vmem:[%s9167_s2 + $0x1c0] sm:$0xff]  ;;  %v107_v50 = vld [vmem:[%s9167_s2 + $0x1c8] sm:$0xff]  ;;  %v6758_v52 = vpack.c.bf16 %v75_v47, %v74_v46 }
   0xd   :  { %6753 = vmatpush3.bf16.msra.mxu0 %v6752_v33  ;;  %v6788_v51 = vpack.c.bf16 %v89_v45, %v88_v44  ;;  %v58_v53 = vld [vmem:[%s9167_s2 + $0x40] sm:$0xff]  ;;  %v59_v54 = vld [vmem:[%s9167_s2 + $0x48] sm:$0xff]  ;;  %v6790_v56 = vpack.c.bf16 %v107_v50, %v106_v49  ;;  %v76_v58 = vld [vmem:[%s9167_s2 + $0xd0] sm:$0xff] }
   0xe   :  { %6755 = vmatprep.subr.bf16.mxu0 %v6754_v39  ;;  %v90_v55 = vld [vmem:[%s9167_s2 + $0x140] sm:$0xff]  ;;  %v91_v57 = vld [vmem:[%s9167_s2 + $0x148] sm:$0xff]  ;;  %v77_v59 = vld [vmem:[%s9167_s2 + $0xd8] sm:$0xff]  ;;  %v6760_v62 = vpack.c.bf16 %v59_v54, %v58_v53 }
   0xf   :  { %6785 = vmatpush3.bf16.msra.mxu1 %v6784_v38  ;;  %v108_v60 = vld [vmem:[%s9167_s2 + $0x1d0] sm:$0xff]  ;;  %v109_v61 = vld [vmem:[%s9167_s2 + $0x1d8] sm:$0xff]  ;;  %v6792_v63 = vpack.c.bf16 %v91_v57, %v90_v55  ;;  %v6762_v0 = vpack.c.bf16 %v77_v59, %v76_v58  ;;  %v78_v6 = vld [vmem:[%s9167_s2 + $0xe0] sm:$0xff] }
  0x10   :  { %6787 = vmatprep.subr.bf16.mxu1 %v6786_v43  ;;  %v60_v1 = vld [vmem:[%s9167_s2 + $0x50] sm:$0xff]  ;;  %v61_v2 = vld [vmem:[%s9167_s2 + $0x58] sm:$0xff]  ;;  %v6794_v4 = vpack.c.bf16 %v109_v61, %v108_v60  ;;  %v79_v7 = vld [vmem:[%s9167_s2 + $0xe8] sm:$0xff] }
  0x11   :  { %6757 = vmatpush3.bf16.msra.mxu0 %v6756_v48  ;;  %v92_v3 = vld [vmem:[%s9167_s2 + $0x150] sm:$0xff]  ;;  %v93_v5 = vld [vmem:[%s9167_s2 + $0x158] sm:$0xff]  ;;  %v110_v8 = vld [vmem:[%s9167_s2 + $0x1e0] sm:$0xff]  ;;  %v6764_v10 = vpack.c.bf16 %v61_v2, %v60_v1  ;;  %v6766_v14 = vpack.c.bf16 %v79_v7, %v78_v6 }
  0x12   :  { %6759 = vmatprep.subr.bf16.mxu0 %v6758_v52  ;;  %v111_v9 = vld [vmem:[%s9167_s2 + $0x1e8] sm:$0xff]  ;;  %v62_v11 = vld [vmem:[%s9167_s2 + $0x60] sm:$0xff]  ;;  %v6796_v13 = vpack.c.bf16 %v93_v5, %v92_v3  ;;  %v80_v19 = vld [vmem:[%s9167_s2 + $0xf0] sm:$0xff] }
  0x13   :  { %6789 = vmatpush3.bf16.msra.mxu1 %v6788_v51  ;;  %v39_v12 = vld [vmem:[%s9168_s0 + $0x8] sm:$0xff]  ;;  %v94_v16 = vld [vmem:[%s9167_s2 + $0x160] sm:$0xff]  ;;  %v6798_v18 = vpack.c.bf16 %v111_v9, %v110_v8  ;;  %v81_v20 = vld [vmem:[%s9167_s2 + $0xf8] sm:$0xff] }
  0x14   :  { %6791 = vmatprep.subr.bf16.mxu1 %v6790_v56  ;;  %v63_v15 = vld [vmem:[%s9167_s2 + $0x68] sm:$0xff]  ;;  %212 = vmatprep.mubr.f32.mxu0 %v39_v12  ;;  %v41_v21 = vld [vmem:[%s9168_s0 + $0x18] sm:$0xff]  ;;  %v112_v22 = vld [vmem:[%s9167_s2 + $0x1f0] sm:$0xff]  ;;  %v6770_v26 = vpack.c.bf16 %v81_v20, %v80_v19 }
  0x15   :  { %6761 = vmatpush3.bf16.msra.mxu0 %v6760_v62  ;;  %v95_v17 = vld [vmem:[%s9167_s2 + $0x168] sm:$0xff]  ;;  %v113_v23 = vld [vmem:[%s9167_s2 + $0x1f8] sm:$0xff]  ;;  %287 = vmatprep.mubr.f32.mxu1 %v41_v21  ;;  %v6768_v24 = vpack.c.bf16 %v63_v15, %v62_v11  ;;  %v64_v27 = vld [vmem:[%s9167_s2 + $0x70] sm:$0xff] }
  0x16   :  { %6763 = vmatprep.subr.bf16.mxu0 %v6762_v0  ;;  %v6800_v25 = vpack.c.bf16 %v95_v17, %v94_v16  ;;  %v65_v28 = vld [vmem:[%s9167_s2 + $0x78] sm:$0xff]  ;;  %v96_v29 = vld [vmem:[%s9167_s2 + $0x170] sm:$0xff]  ;;  %v6802_v30 = vpack.c.bf16 %v113_v23, %v112_v22  ;;  %v130_v32 = vld [vmem:[%s9167_s2 + $0x280] sm:$0xff] }
  0x17   :  { %6793 = vmatpush3.bf16.msra.mxu1 %v6792_v63  ;;  %v97_v31 = vld [vmem:[%s9167_s2 + $0x178] sm:$0xff]  ;;  %v131_v33 = vld [vmem:[%s9167_s2 + $0x288] sm:$0xff]  ;;  %v6772_v34 = vpack.c.bf16 %v65_v28, %v64_v27  ;;  %v114_v37 = vld [vmem:[%s9167_s2 + $0x200] sm:$0xff] }
  0x18   :  { %6795 = vmatprep.subr.bf16.mxu1 %v6794_v4  ;;  %v6804_v35 = vpack.c.bf16 %v97_v31, %v96_v29  ;;  %v6806_v36 = vpack.c.bf16 %v131_v33, %v130_v32  ;;  %v115_v38 = vld [vmem:[%s9167_s2 + $0x208] sm:$0xff]  ;;  %v132_v39 = vld [vmem:[%s9167_s2 + $0x290] sm:$0xff]  ;;  %v133_v40 = vld [vmem:[%s9167_s2 + $0x298] sm:$0xff] }
  0x19   :  { %6765 = vmatpush3.bf16.msra.mxu0 %v6764_v10  ;;  %v38_v41 = vld [vmem:[%s9168_s0] sm:$0xff]  ;;  %v6808_v42 = vpack.c.bf16 %v115_v38, %v114_v37  ;;  %v40_v43 = vld [vmem:[%s9168_s0 + $0x10] sm:$0xff]  ;;  %v6810_v44 = vpack.c.bf16 %v133_v40, %v132_v39  ;;  %v117_v46 = vld [vmem:[%s9167_s2 + $0x218] sm:$0xff] }
  0x1a   :  { %6767 = vmatprep.subr.bf16.mxu0 %v6766_v14  ;;  %v116_v45 = vld [vmem:[%s9167_s2 + $0x210] sm:$0xff]  ;;  %v134_v47 = vld [vmem:[%s9167_s2 + $0x2a0] sm:$0xff]  ;;  %v135_v48 = vld [vmem:[%s9167_s2 + $0x2a8] sm:$0xff] }
  0x1b   :  { %6797 = vmatpush3.bf16.msra.mxu1 %v6796_v13  ;;  %v45_v49 = vld [vmem:[%s9168_s0 + $0x38] sm:$0x3]  ;;  %v47_v50 = vld [vmem:[%s9168_s0 + $0x48] sm:$0x3]  ;;  %v6812_v51 = vpack.c.bf16 %v117_v46, %v116_v45  ;;  %v44_v52 = vld [vmem:[%s9168_s0 + $0x30] sm:$0x3]  ;;  %v6814_v53 = vpack.c.bf16 %v135_v48, %v134_v47 }
  0x1c   :  { %6799 = vmatprep.subr.bf16.mxu1 %v6798_v18  ;;  %v118_v54 = vld [vmem:[%s9167_s2 + $0x220] sm:$0xff]  ;;  %v119_v55 = vld [vmem:[%s9167_s2 + $0x228] sm:$0xff]  ;;  %v136_v57 = vld [vmem:[%s9167_s2 + $0x2b0] sm:$0xff] }
  0x1d   :  { %6769 = vmatpush3.bf16.msra.mxu0 %v6768_v24  ;;  %v46_v56 = vld [vmem:[%s9168_s0 + $0x40] sm:$0x3]  ;;  %v137_v58 = vld [vmem:[%s9167_s2 + $0x2b8] sm:$0xff]  ;;  %v43_v59 = vld [vmem:[%s9168_s0 + $0x28] sm:$0xff]  ;;  %v6816_v60 = vpack.c.bf16 %v119_v55, %v118_v54 }
  0x1e   :  { %6771 = vmatprep.subr.bf16.mxu0 %v6770_v26  ;;  %v6818_v61 = vpack.c.bf16 %v137_v58, %v136_v57  ;;  %v120_v62 = vld [vmem:[%s9167_s2 + $0x230] sm:$0xff]  ;;  %v121_v63 = vld [vmem:[%s9167_s2 + $0x238] sm:$0xff]  ;;  %v138_v0 = vld [vmem:[%s9167_s2 + $0x2c0] sm:$0xff] }
  0x1f   :  { %6801 = vmatpush3.bf16.msra.mxu1 %v6800_v25  ;;  %v139_v1 = vld [vmem:[%s9167_s2 + $0x2c8] sm:$0xff]  ;;  %v6820_v2 = vpack.c.bf16 %v121_v63, %v120_v62  ;;  %v122_v4 = vld [vmem:[%s9167_s2 + $0x240] sm:$0xff]  ;;  %v140_v6 = vld [vmem:[%s9167_s2 + $0x2d0] sm:$0xff] }
  0x20   :  { %6803 = vmatprep.subr.bf16.mxu1 %v6802_v30  ;;  %v6822_v3 = vpack.c.bf16 %v139_v1, %v138_v0  ;;  %v123_v5 = vld [vmem:[%s9167_s2 + $0x248] sm:$0xff]  ;;  %v141_v7 = vld [vmem:[%s9167_s2 + $0x2d8] sm:$0xff]  ;;  %v124_v10 = vld [vmem:[%s9167_s2 + $0x250] sm:$0xff] }
  0x21   :  { %6773 = vmatpush3.bf16.msra.mxu0 %v6772_v34  ;;  %v6824_v8 = vpack.c.bf16 %v123_v5, %v122_v4  ;;  %v6826_v9 = vpack.c.bf16 %v141_v7, %v140_v6  ;;  %v125_v11 = vld [vmem:[%s9167_s2 + $0x258] sm:$0xff]  ;;  %v142_v12 = vld [vmem:[%s9167_s2 + $0x2e0] sm:$0xff]  ;;  %v143_v13 = vld [vmem:[%s9167_s2 + $0x2e8] sm:$0xff] }
  0x22   :  { %6807 = vmatprep.subr.bf16.mxu0 %v6806_v36  ;;  %v6828_v14 = vpack.c.bf16 %v125_v11, %v124_v10  ;;  %v6830_v15 = vpack.c.bf16 %v143_v13, %v142_v12  ;;  %v126_v16 = vld [vmem:[%s9167_s2 + $0x260] sm:$0xff]  ;;  %v127_v17 = vld [vmem:[%s9167_s2 + $0x268] sm:$0xff]  ;;  %v144_v18 = vld [vmem:[%s9167_s2 + $0x2f0] sm:$0xff]  ;;  %v405_v10 = vlaneseq }
  0x23   :  { %6805 = vmatpush3.bf16.msra.mxu1 %v6804_v35  ;;  %v145_v19 = vld [vmem:[%s9167_s2 + $0x2f8] sm:$0xff]  ;;  %v6832_v20 = vpack.c.bf16 %v127_v17, %v126_v16  ;;  %v128_v22 = vld [vmem:[%s9167_s2 + $0x270] sm:$0xff]  ;;  %v42_v25 = vld [vmem:[%s9168_s0 + $0x20] sm:$0xff] }
  0x24   :  { %213 = vmatmul.mubr.f32.vlgmr.msra.gmra.mrb[0].mxu0 %v38_v41  ;;  %v6834_v21 = vpack.c.bf16 %v145_v19, %v144_v18  ;;  %v129_v23 = vld [vmem:[%s9167_s2 + $0x278] sm:$0xff]  ;;  %v48_v27 = vld [vmem:[%s9168_s0 + $0x50] sm:$0x3]  ;;  %v146_v29 = vld [vmem:[%s9169_s3] sm:$0xff] }
  0x25   :  { %6809 = vmatpush3.bf16.msra.mxu0 %v6808_v42  ;;  %217 = vmatprep.mubr.f32.mxu0 %v45_v49  ;;  %v6836_v24 = vpack.c.bf16 %v129_v23, %v128_v22  ;;  %v49_v26 = vld [vmem:[%s9168_s0 + $0x58] sm:$0x3]  ;;  %v147_v37 = vld [vmem:[%s9169_s3 + $0x8] sm:$0x3]  ;;  %v419_v5 = vld [vmem:[%s9170_s4 + $0x10] sm:$0xff]  ;;  %s7616_s0 = smov 48  }
  0x26   :  { %288 = vmatmul.mubr.f32.vlgmr.msra.gmra.mrb[0].mxu1 %v40_v43  ;;  %6811 = vmatprep.subr.bf16.mxu0 %v6810_v44  ;;  %v420_v6 = vld [vmem:[%s9170_s4 + $0x18] sm:$0xff]  ;;  %v8046_v17 = vld [vmem:[%s9171_s10] sm:$0xff]  ;;  %vm8082_vm3 = vmpackc.low %vm515_vm2, %vm515_vm2  ;;  %s7617_s3 = smov 56  }
  0x27   :  { %292 = vmatprep.mubr.f32.mxu1 %v47_v50  ;;  %v6842_v7 = vpack.c.bf16 %v420_v6, %v419_v5  ;;  %vm8115_vm8 = vmpackc.low %vm634_vm6, %vm7615_vm7 }
  0x28   :  { %218 = vmatmul.mubr.f32.gmra.mrb[2].mxu0 %v44_v52 }
  0x29   :  { %6813 = vmatpush3.bf16.msra.mxu0 %v6812_v51  ;;  %362 = vmatprep.mubr.f32.mxu0 %v43_v59 }
  0x2a   :  { %293 = vmatmul.mubr.f32.gmra.mrb[2].mxu1 %v46_v56  ;;  %6815 = vmatprep.subr.bf16.mxu0 %v6814_v53 }
  0x2d   :  { %6817 = vmatpush3.bf16.msra.mxu0 %v6816_v60 }
  0x2e   :  { %6819 = vmatprep.subr.bf16.mxu0 %v6818_v61 }
  0x31   :  { %6821 = vmatpush3.bf16.msra.mxu0 %v6820_v2  ;;  %v417_v2 = vld [vmem:[%s9170_s4] sm:$0xff] }
  0x32   :  { %6823 = vmatprep.subr.bf16.mxu0 %v6822_v3  ;;  %v418_v3 = vld [vmem:[%s9170_s4 + $0x8] sm:$0xff] }
  0x33   :  { %v6838_v4 = vpack.c.bf16 %v418_v3, %v417_v2 }
  0x35   :  { %6825 = vmatpush3.bf16.msra.mxu0 %v6824_v8  ;;  %6839 = vmatprep.subr.bf16.mxu1 %v6838_v4 }
  0x36   :  { %6827 = vmatprep.subr.bf16.mxu0 %v6826_v9  ;;  %6841 = vmatpush3.bf16.msra.mxu1 %v6838_v4 }
  0x37   :  { %6843 = vmatprep.subr.bf16.mxu1 %v6842_v7 }
  0x39   :  { %6829 = vmatpush3.bf16.msra.mxu0 %v6828_v14  ;;  %v8038_v14 = vshrl.u32 %v405_v10, 7 }
  0x3a   :  { %6831 = vmatprep.subr.bf16.mxu0 %v6830_v15  ;;  %6845 = vmatpush3.bf16.msra.mxu1 %v6842_v7 }
  0x3b   :  { %v8041_v16 = vsub.s32 0, %v8038_v14  ;;  %v8049_v18 = vsub.s32 1, %v8038_v14 }
  0x3d   :  { %6833 = vmatpush3.bf16.msra.mxu0 %v6832_v20  ;;  %v408_v19 = vrot.slane %v8046_v17, %v8041_v16  ;;  %v414_v22 = vrot.slane %v8046_v17, %v8049_v18 }
  0x3e   :  { %6835 = vmatprep.subr.bf16.mxu0 %v6834_v21 }
  0x41   :  { %6837 = vmatpush3.bf16.msra.mxu0 %v6836_v24 }
  0x44   :  { %363 = vmatmul.mubr.f32.vlgmr.msra.gmra.mrb[4].mxu0 %v42_v25 }
  0x45   :  { %367 = vmatprep.mubr.f32.mxu0 %v49_v26 }
  0x48   :  { %368 = vmatmul.mubr.f32.gmra.mrb[6].mxu0 %v48_v27 }
  0xf7   :  { %v5892_v28 = vpop.f32.mrb[0].mxu0 }
  0xf8   :  { %v5893_v30 = vpop.f32.mrb[1].mxu0 }
  0xf9   :  { %v5930_v31 = vpop.f32.mrb[0].mxu1  ;;  %v5894_v32 = vadd.f32 %v5893_v30, %v5892_v28 }
  0xfa   :  { %v5931_v33 = vpop.f32.mrb[1].mxu1 }
  0xfb   :  { %v5932_v34 = vadd.f32 %v5931_v33, %v5930_v31  ;;  %v215_v35 = vadd.f32 %v5894_v32, %v146_v29  ;;  %v5895_v36 = vpop.f32.mrb[2].mxu0  ;;  %v5623_v29 = vld [vmem:[%s9172_s5] ss:$0 sm:$0xff] }
  0xfc   :  { %v5896_v38 = vpop.f32.mrb[3].mxu0 }
  0xfd   :  { %v5933_v39 = vpop.f32.mrb[2].mxu1  ;;  %v290_v40 = vadd.f32 %v5932_v34, %v215_v35  ;;  %v5897_v41 = vadd.f32 %v5896_v38, %v5895_v36 }
  0xfe   :  { %v5934_v42 = vpop.f32.mrb[3].mxu1 }
  0xff   :  { %v5935_v43 = vadd.f32 %v5934_v42, %v5933_v39  ;;  %v220_v44 = vadd.f32 %v5897_v41, %v147_v37 }
 0x101   :  { %v295_v45 = vadd.f32 %v5935_v43, %v220_v44 }
 0x117   :  { %v5968_v46 = vpop.f32.mrb[4].mxu0 }
 0x118   :  { %v5969_v47 = vpop.f32.mrb[5].mxu0 }
 0x119   :  { %v5970_v48 = vadd.f32 %v5969_v47, %v5968_v46  ;;  %v8102_v47 = vld [vmem:[%s9173_s1] sm:$0xff] }
 0x11b   :  { %v8014_v49 = vadd.f32 %v5970_v48, %v290_v40  ;;  %v5971_v50 = vpop.f32.mrb[6].mxu0 }
 0x11c   :  { %v5972_v51 = vpop.f32.mrb[7].mxu0 }
 0x11d   :  { %v5973_v52 = vadd.f32 %v5972_v51, %v5971_v50  ;;  %v377_v53 = vsel %vm376_vm0, %v8014_v49, 0.0  ;;  %v8107_v50 = vld [vmem:[%s9173_s1 + $0x8] sm:$0x3] }
 0x11e   :  { %378 = vadd.xlane.f32.xlu0 %v377_v53 }
 0x11f   :  { %v8018_v54 = vadd.f32 %v5973_v52, %v295_v45 }
 0x121   :  { %v381_v55 = vsel %vm380_vm1, %v8018_v54, 0.0 }
 0x122   :  { %382 = vadd.xlane.f32.xlu0 %v381_v55 }
 0x1ab   :  { %v379_v56 = vpop.xlane.xlu0 %378 }
 0x1ac   :  { %v385_v57 = vmul.f32 0.03125, %v379_v56 }
 0x1ae   :  { %v387_v58 = vsub.f32 %v8014_v49, %v385_v57 }
 0x1af   :  { %v383_v59 = vpop.xlane.xlu0 %382 }
 0x1b0   :  { %v386_v60 = vmul.f32 0.03125, %v383_v59  ;;  %v389_v61 = vmul.f32 %v387_v58, %v387_v58 }
 0x1b2   :  { %v388_v62 = vsub.f32 %v8018_v54, %v386_v60  ;;  %v391_v63 = vsel %vm376_vm0, %v389_v61, 0.0 }
 0x1b3   :  { %392 = vadd.xlane.f32.xlu1 %v391_v63 }
 0x1b4   :  { %v390_v0 = vmul.f32 %v388_v62, %v388_v62 }
 0x1b6   :  { %v394_v1 = vsel %vm380_vm1, %v390_v0, 0.0 }
 0x1b7   :  { %395 = vadd.xlane.f32.xlu1 %v394_v1 }
 0x240   :  { %v393_v8 = vpop.xlane.xlu1 %392 }
 0x241   :  { %v397_v9 = vmul.f32 0.03125, %v393_v8 }
 0x243   :  { %v399_v11 = vadd.f32 1e-06, %v397_v9 }
 0x244   :  { %v396_v12 = vpop.xlane.xlu1 %395 }
 0x245   :  { %7429 = vrsqrt.f32 %v399_v11  ;;  %v398_v13 = vmul.f32 0.03125, %v396_v12 }
 0x247   :  { %v400_v15 = vadd.f32 1e-06, %v398_v13 }
 0x249   :  { %7431 = vrsqrt.f32 %v400_v15 }
 0x24f   :  { %v7430_v20 = vpop.eup %7429 }
 0x250   :  { %v403_v21 = vmul.f32 %v7430_v20, %v387_v58 }
 0x252   :  { %v409_v23 = vmul.f32 %v408_v19, %v403_v21 }
 0x253   :  { %v7432_v24 = vpop.eup %7431 }
 0x254   :  { %v404_v25 = vmul.f32 %v7432_v24, %v388_v62  ;;  %v415_v26 = vadd.f32 %v414_v22, %v409_v23 }
 0x256   :  { %v410_v27 = vmul.f32 %v408_v19, %v404_v25  ;;  %6254 = vmatprep.mubr.msk.f32.mxu1 %vm376_vm0, %v415_v26 }
 0x258   :  { %v416_v28 = vadd.f32 %v414_v22, %v410_v27 }
 0x25a   :  { %6255 = vmatmul.mubr.msk.f32.vlgmr.msra.gmra.mrb[4].mxu1 %vm376_vm0, %v416_v28 }
 0x32d   :  { %v6256_v30 = vpop.f32.mrb[4].mxu1 }
 0x32e   :  { %v8060_v31 = vadd.f32 %v6256_v30, %v5623_v29  ;;  %v500_v32 = vpop.f32.mrb[5].mxu1 }
 0x32f   :  { %v8062_v33 = vadd.f32 %v5623_v29, %v500_v32 }
 0x331   :  { %6261 = vmatprep.mubr.msk.f32.mxu1 %vm515_vm2, %v8062_v33  ;;  %v8068_v34 = vpack.i.bf16 %v8060_v31, %v8062_v33 }
 0x333   :  { %7270 = vrot.lane.b32.xlu0 %v8068_v34, %s7609_s18 }
 0x337   :  { %7280 = vrot.lane.b32.xlu0 %v8068_v34, %s7610_s19 }
 0x33b   :  { %712 = vrot.lane.b32.xlu0 %v8062_v33, %s7611_s20 }
 0x33f   :  { %7285 = vrot.lane.b32.xlu0 %v8068_v34, %s7612_s21 }
 0x343   :  { %913 = vrot.lane.b32.xlu0 %v8062_v33, %s7613_s22 }
 0x3a5   :  { %v7271_v35 = vpop.permute.xlu0 %7270 }
 0x3a6   :  { %v7273_v36 = vunpack.i.h.bf16 %v7271_v35  ;;  %v7272_v37 = vunpack.i.l.bf16 %v7271_v35 }
 0x3a8   :  { %v6846_v39 = vpack.c.bf16 %v7273_v36, %v7272_v37 }
 0x3a9   :  { %v7281_v40 = vpop.permute.xlu0 %7280 }
 0x3aa   :  { %6848 = vmatprep.subr.msk.bf16.mxu1 %vm8082_vm3, %v6846_v39  ;;  %v7283_v63 = vunpack.i.h.bf16 %v7281_v40  ;;  %v7282_v1 = vunpack.i.l.bf16 %v7281_v40 }
 0x3ab   :  { %6851 = vmatpush3.bf16.xpose.msk.msra.mxu1 %vm8082_vm3, %v6846_v39 }
 0x3ac   :  { %v6858_v6 = vpack.c.bf16 %v7283_v63, %v7282_v1 }
 0x3ad   :  { %v8090_v41 = vpop.permute.xlu0 %712 }
 0x3b1   :  { %v7286_v42 = vpop.permute.xlu0 %7285 }
 0x3b2   :  { %v7288_v43 = vunpack.i.h.bf16 %v7286_v42  ;;  %v7287_v44 = vunpack.i.l.bf16 %v7286_v42  ;;  %6262 = vmatmul.mubr.msk.f32.vlgmr.msra.gmra.mrb[6].mxu1 %vm515_vm2, %v8060_v31 }
 0x3b4   :  { %v6870_v45 = vpack.c.bf16 %v7288_v43, %v7287_v44 }
 0x3b5   :  { %v914_v46 = vpop.permute.xlu0 %913 }
 0x3b6   :  { %6872 = vmatprep.subr.msk.bf16.mxu0 %vm8082_vm3, %v6870_v45  ;;  %6289 = vmatprep.mubr.msk.f32.mxu0 %vm515_vm2, %v914_v46 }
 0x3b7   :  { %6875 = vmatpush3.bf16.xpose.msk.msra.mxu0 %vm8082_vm3, %v6870_v45 }
 0x485   :  { %v6263_v48 = vpop.f32.mrb[6].mxu1 }
 0x486   :  { %v590_v51 = vpop.f32.mrb[7].mxu1  ;;  %v596_v53 = vadd.f32 %v6263_v48, %v8107_v50 }
 0x487   :  { %v591_v52 = vadd.f32 %v590_v51, %v8102_v47 }
 0x488   :  { %v604_v56 = vsel %vm603_vm5, %v596_v53, -inf }
 0x489   :  { %v600_v55 = vsel %vm599_vm4, %v591_v52, -inf }
 0x48a   :  { %601 = vmax.xlane.f32.xlu1 %v600_v55 }
 0x48e   :  { %605 = vmax.xlane.f32.xlu1 %v604_v56 }
 0x49f   :  { %7275 = vrot.lane.b32.xlu1 %v8068_v34, %s7614_s26 }
 0x517   :  { %v602_v57 = vpop.xlane.xlu1 %601 }
 0x518   :  { %v607_v58 = vsub.f32 %v591_v52, %v602_v57 }
 0x51a   :  { %v609_v61 = vmul.f32 1.442695, %v607_v58 }
 0x51b   :  { %v606_v59 = vpop.xlane.xlu1 %605 }
 0x51c   :  { %v608_v60 = vsub.f32 %v596_v53, %v606_v59 }
 0x51e   :  { %v611_v62 = vmul.f32 1.442695, %v608_v60 }
 0x51f   :  { %v7276_v0 = vpop.permute.xlu1 %7275 }
 0x520   :  { %7433 = vpow2.f32 %v611_v62  ;;  %v7278_v2 = vunpack.i.h.bf16 %v7276_v0  ;;  %v7277_v3 = vunpack.i.l.bf16 %v7276_v0 }
 0x521   :  { %7435 = vpow2.f32 %v609_v61 }
 0x522   :  { %v6852_v5 = vpack.c.bf16 %v7278_v2, %v7277_v3 }
 0x524   :  { %6854 = vmatprep.subr.msk.bf16.mxu1 %vm8115_vm8, %v6852_v5 }
 0x525   :  { %6857 = vmatpush3.bf16.msk.msra.mxu1 %vm8115_vm8, %v6852_v5 }
 0x526   :  { %6860 = vmatprep.subr.msk.bf16.mxu1 %vm8082_vm3, %v6858_v6 }
 0x52a   :  { %v7434_v7 = vpop.eup %7433 }
 0x52b   :  { %v616_v8 = vsel %vm603_vm5, %v7434_v7, 0.0  ;;  %v7436_v9 = vpop.eup %7435 }
 0x52c   :  { %617 = vadd.xlane.f32.xlu1 %v616_v8  ;;  %v613_v10 = vsel %vm599_vm4, %v7436_v9, 0.0 }
 0x530   :  { %614 = vadd.xlane.f32.xlu1 %v613_v10 }
 0x541   :  { %714 = vrot.lane.b32.xlu1 %v8060_v31, %s7611_s20 }
 0x545   :  { %915 = vrot.lane.b32.xlu1 %v8060_v31, %s7613_s22 }
 0x5b9   :  { %v618_v11 = vpop.xlane.xlu1 %617 }
 0x5ba   :  { %7437 = vrcp.f32 %v618_v11 }
 0x5bd   :  { %v615_v12 = vpop.xlane.xlu1 %614 }
 0x5be   :  { %7439 = vrcp.f32 %v615_v12 }
 0x5c1   :  { %v715_v13 = vpop.permute.xlu1 %714 }
 0x5c4   :  { %v7438_v19 = vpop.eup %7437 }
 0x5c5   :  { %v916_v15 = vpop.permute.xlu1 %915  ;;  %v622_v22 = vmul.f32 %v7438_v19, %v7434_v7 }
 0x5c6   :  { %6290 = vmatmul.mubr.msk.f32.vlgmr.msra.gmra.mrb[8].mxu0 %vm515_vm2, %v916_v15 }
 0x5c8   :  { %v7440_v20 = vpop.eup %7439 }
 0x5c9   :  { %v621_v21 = vmul.f32 %v7440_v20, %v7436_v9 }
 0x5cb   :  { %6268 = vmatprep.mubr.msk.f32.mxu1 %vm599_vm4, %v621_v21 }
 0x5cc   :  { %6269 = vmatmul.mubr.msk.f32.vlgmr.msra.gmra.mrb[8].mxu1 %vm599_vm4, %v622_v22 }
 0x5cd   :  { %6863 = vmatpush3.bf16.xpose.msk.msra.mxu1 %vm8082_vm3, %v6858_v6  ;;  %6275 = vmatprep.mubr.msk.f32.mxu1 %vm515_vm2, %v8090_v41 }
 0x5d4   :  { %6276 = vmatmul.mubr.msk.f32.vlgmr.msra.gmra.mrb[10].mxu1 %vm515_vm2, %v715_v13 }
 0x699   :  { %v6291_v23 = vpop.f32.mrb[8].mxu0 }
 0x69a   :  { %v995_v24 = vpop.f32.mrb[9].mxu0  ;;  %v1001_v37 = vadd.f32 %v6291_v23, %v8107_v50 }
 0x69b   :  { %v996_v35 = vadd.f32 %v995_v24, %v8102_v47 }
 0x69c   :  { %v1007_v40 = vsel %vm603_vm5, %v1001_v37, -inf }
 0x69d   :  { %v1004_v39 = vsel %vm599_vm4, %v996_v35, -inf }
 0x69f   :  { %v8139_v25 = vpop.f32.mrb[8].mxu1 }
 0x6a0   :  { %v8141_v26 = vpop.f32.mrb[9].mxu1 }
 0x6a7   :  { %v6277_v27 = vpop.f32.mrb[10].mxu1 }
 0x6a8   :  { %v800_v28 = vadd.f32 %v6277_v27, %v8107_v50  ;;  %v794_v29 = vpop.f32.mrb[11].mxu1 }
 0x6a9   :  { %v795_v30 = vadd.f32 %v794_v29, %v8102_v47 }
 0x6aa   :  { %v806_v32 = vsel %vm603_vm5, %v800_v28, -inf }
 0x6ab   :  { %807 = vmax.xlane.f32.xlu1 %v806_v32  ;;  %v803_v36 = vsel %vm599_vm4, %v795_v30, -inf }
 0x6ac   :  { %804 = vmax.xlane.f32.xlu0 %v803_v36 }
 0x6b0   :  { %1005 = vmax.xlane.f32.xlu0 %v1004_v39 }
 0x6b4   :  { %1008 = vmax.xlane.f32.xlu0 %v1007_v40 }
 0x738   :  { %v808_v43 = vpop.xlane.xlu1 %807 }
 0x739   :  { %v805_v41 = vpop.xlane.xlu0 %804  ;;  %v810_v46 = vsub.f32 %v800_v28, %v808_v43 }
 0x73a   :  { %v809_v42 = vsub.f32 %v795_v30, %v805_v41 }
 0x73b   :  { %v813_v55 = vmul.f32 1.442695, %v810_v46 }
 0x73c   :  { %v811_v48 = vmul.f32 1.442695, %v809_v42 }
 0x73d   :  { %v1006_v44 = vpop.xlane.xlu0 %1005 }
 0x73e   :  { %v1010_v45 = vsub.f32 %v996_v35, %v1006_v44 }
 0x740   :  { %v1012_v51 = vmul.f32 1.442695, %v1010_v45 }
 0x741   :  { %v1009_v52 = vpop.xlane.xlu0 %1008 }
 0x742   :  { %7441 = vpow2.f32 %v1012_v51  ;;  %v1011_v53 = vsub.f32 %v1001_v37, %v1009_v52 }
 0x743   :  { %7443 = vpow2.f32 %v811_v48 }
 0x744   :  { %v1014_v56 = vmul.f32 1.442695, %v1011_v53 }
 0x746   :  { %7445 = vpow2.f32 %v1014_v56 }
 0x747   :  { %7447 = vpow2.f32 %v813_v55 }
 0x74c   :  { %v7442_v57 = vpop.eup %7441 }
 0x74d   :  { %v1016_v58 = vsel %vm599_vm4, %v7442_v57, 0.0  ;;  %v7444_v59 = vpop.eup %7443 }
 0x74e   :  { %1017 = vadd.xlane.f32.xlu0 %v1016_v58  ;;  %v815_v61 = vsel %vm599_vm4, %v7444_v59, 0.0 }
 0x750   :  { %v7446_v60 = vpop.eup %7445 }
 0x751   :  { %v1019_v62 = vsel %vm603_vm5, %v7446_v60, 0.0  ;;  %v7448_v63 = vpop.eup %7447 }
 0x752   :  { %816 = vadd.xlane.f32.xlu0 %v815_v61  ;;  %1020 = vadd.xlane.f32.xlu1 %v1019_v62  ;;  %v818_v0 = vsel %vm603_vm5, %v7448_v63, 0.0 }
 0x756   :  { %819 = vadd.xlane.f32.xlu1 %v818_v0 }
 0x767   :  { %7295 = vrot.lane.b32.xlu1 %v8068_v34, %s7616_s0 }
 0x768   :  { %7290 = vrot.lane.b32.xlu0 %v8068_v34, %s7617_s3 }
 0x76b   :  { %7300 = vrot.lane.b32.xlu1 %v8068_v34, %s9189_s27 }
 0x76c   :  { %1116 = vrot.lane.b32.xlu0 %v8060_v31, %s9187_s28 }
 0x76f   :  { %1114 = vrot.lane.b32.xlu1 %v8062_v33, %s9187_s28 }
 0x7db   :  { %v1018_v1 = vpop.xlane.xlu0 %1017 }
 0x7df   :  { %v1021_v2 = vpop.xlane.xlu1 %1020  ;;  %v817_v3 = vpop.xlane.xlu0 %816 }
 0x7e0   :  { %7449 = vrcp.f32 %v817_v3 }
 0x7e1   :  { %7451 = vrcp.f32 %v1018_v1 }
 0x7e3   :  { %v820_v5 = vpop.xlane.xlu1 %819  ;;  %v7291_v6 = vpop.permute.xlu0 %7290 }
 0x7e4   :  { %7453 = vrcp.f32 %v820_v5  ;;  %v7293_v7 = vunpack.i.h.bf16 %v7291_v6  ;;  %v7292_v8 = vunpack.i.l.bf16 %v7291_v6  ;;  %v1347_v6 = vld [vmem:[%s9174_s6] sm:$0xff] }
 0x7e5   :  { %7455 = vrcp.f32 %v1021_v2 }
 0x7e6   :  { %v6864_v9 = vpack.c.bf16 %v7293_v7, %v7292_v8  ;;  %v1348_v7 = vld [vmem:[%s9174_s6 + $0x8] sm:$0xff]  ;;  %v1349_v8 = vld [vmem:[%s9174_s6 + $0x10] sm:$0xff] }
 0x7e7   :  { %v7296_v10 = vpop.permute.xlu1 %7295  ;;  %v1117_v32 = vpop.permute.xlu0 %1116 }
 0x7e8   :  { %v7298_v11 = vunpack.i.h.bf16 %v7296_v10  ;;  %v7297_v12 = vunpack.i.l.bf16 %v7296_v10  ;;  %6866 = vmatprep.subr.msk.bf16.mxu1 %vm8115_vm8, %v6864_v9  ;;  %v1350_v10 = vld [vmem:[%s9174_s6 + $0x18] sm:$0xff] }
 0x7e9   :  { %6869 = vmatpush3.bf16.msk.msra.mxu1 %vm8115_vm8, %v6864_v9  ;;  %v6894_v9 = vpack.c.bf16 %v1348_v7, %v1347_v6 }
 0x7ea   :  { %v6876_v31 = vpack.c.bf16 %v7298_v11, %v7297_v12  ;;  %v7450_v33 = vpop.eup %7449  ;;  %v6898_v11 = vpack.c.bf16 %v1350_v10, %v1349_v8 }
 0x7eb   :  { %v7301_v13 = vpop.permute.xlu1 %7300  ;;  %v823_v15 = vmul.f32 %v7450_v33, %v7444_v59  ;;  %v7452_v19 = vpop.eup %7451 }
 0x7ec   :  { %6878 = vmatprep.subr.msk.bf16.mxu1 %vm8115_vm8, %v6876_v31  ;;  %v7303_v20 = vunpack.i.h.bf16 %v7301_v13  ;;  %v7302_v21 = vunpack.i.l.bf16 %v7301_v13  ;;  %v1024_v27 = vmul.f32 %v7452_v19, %v7442_v57 }
 0x7ed   :  { %6282 = vmatprep.mubr.msk.f32.mxu1 %vm599_vm4, %v823_v15 }
 0x7ee   :  { %v7454_v22 = vpop.eup %7453  ;;  %v6882_v28 = vpack.c.bf16 %v7303_v20, %v7302_v21 }
 0x7ef   :  { %v824_v23 = vmul.f32 %v7454_v22, %v7448_v63  ;;  %v7456_v24 = vpop.eup %7455  ;;  %v1115_v30 = vpop.permute.xlu1 %1114 }
 0x7f0   :  { %v1025_v29 = vmul.f32 %v7456_v24, %v7446_v60 }
 0x7f1   :  { %6283 = vmatmul.mubr.msk.f32.vlgmr.msra.gmra.mrb[12].mxu1 %vm599_vm4, %v824_v23 }
 0x7f2   :  { %6881 = vmatpush3.bf16.msk.msra.mxu1 %vm8115_vm8, %v6876_v31  ;;  %6296 = vmatprep.mubr.msk.f32.mxu1 %vm599_vm4, %v1024_v27 }
 0x7f3   :  { %6884 = vmatprep.subr.msk.bf16.mxu1 %vm8082_vm3, %v6882_v28 }
 0x7f5   :  { %6297 = vmatmul.mubr.msk.f32.vlgmr.msra.gmra.mrb[14].mxu1 %vm599_vm4, %v1025_v29 }
 0x7f6   :  { %6303 = vmatprep.mubr.msk.f32.mxu1 %vm515_vm2, %v1115_v30 }
 0x7fb   :  { %6887 = vmatpush3.bf16.xpose.msk.msra.mxu1 %vm8082_vm3, %v6882_v28 }
 0x7fc   :  { %6895 = vmatprep.subr.bf16.mxu1 %v6894_v9 }
 0x802   :  { %6304 = vmatmul.mubr.msk.f32.vlgmr.msra.gmra.mrb[16].mxu1 %vm515_vm2, %v1117_v32 }
 0x803   :  { %6897 = vmatpush3.bf16.msra.mxu1 %v6894_v9 }
 0x804   :  { %6899 = vmatprep.subr.bf16.mxu1 %v6898_v11 }
 0x807   :  { %6901 = vmatpush3.bf16.msra.mxu1 %v6898_v11 }
 0x8c4   :  { %v6284_v35 = vpop.f32.mrb[12].mxu1 }
 0x8c5   :  { %v904_v36 = vpop.f32.mrb[13].mxu1 }
 0x8c8   :  { %v6298_v37 = vpop.f32.mrb[14].mxu1 }
 0x8c9   :  { %v1105_v39 = vpop.f32.mrb[15].mxu1 }
 0x8d5   :  { %v6305_v40 = vpop.f32.mrb[16].mxu1 }
 0x8d6   :  { %v1202_v41 = vadd.f32 %v6305_v40, %v8107_v50  ;;  %v1196_v42 = vpop.f32.mrb[17].mxu1 }
 0x8d7   :  { %v1197_v43 = vadd.f32 %v1196_v42, %v8102_v47 }
 0x8d8   :  { %v1208_v44 = vsel %vm603_vm5, %v1202_v41, -inf }
 0x8d9   :  { %1209 = vmax.xlane.f32.xlu0 %v1208_v44  ;;  %v1205_v45 = vsel %vm599_vm4, %v1197_v43, -inf }
 0x8da   :  { %1206 = vmax.xlane.f32.xlu1 %v1205_v45 }
 0x8eb   :  { %7305 = vrot.lane.b32.xlu1 %v8068_v34, %s9185_s29 }
 0x8ef   :  { %1319 = vrot.lane.b32.xlu1 %v6284_v35, %s9183_s30 }
 0x8f3   :  { %1325 = vrot.lane.b32.xlu1 %v1105_v39, %s9181_s12 }
 0x8f7   :  { %1327 = vrot.lane.b32.xlu1 %v6298_v37, %s9181_s12 }
 0x966   :  { %v1210_v46 = vpop.xlane.xlu0 %1209 }
 0x967   :  { %v1212_v48 = vsub.f32 %v1202_v41, %v1210_v46  ;;  %v1207_v51 = vpop.xlane.xlu1 %1206 }
 0x968   :  { %v1211_v52 = vsub.f32 %v1197_v43, %v1207_v51 }
 0x969   :  { %v1215_v53 = vmul.f32 1.442695, %v1212_v48 }
 0x96a   :  { %v1213_v55 = vmul.f32 1.442695, %v1211_v52 }
 0x96b   :  { %v7306_v56 = vpop.permute.xlu1 %7305 }
 0x96c   :  { %7457 = vpow2.f32 %v1213_v55  ;;  %v7308_v57 = vunpack.i.h.bf16 %v7306_v56  ;;  %v7307_v58 = vunpack.i.l.bf16 %v7306_v56  ;;  %v1479_v55 = vld [vmem:[%s9175_s7 + $0x8] sm:$0xff] }
 0x96d   :  { %7459 = vpow2.f32 %v1215_v53  ;;  %v1478_v53 = vld [vmem:[%s9175_s7] sm:$0xff] }
 0x96e   :  { %v6888_v34 = vpack.c.bf16 %v7308_v57, %v7307_v58  ;;  %v6902_v56 = vpack.c.bf16 %v1479_v55, %v1478_v53  ;;  %v1480_v57 = vld [vmem:[%s9175_s7 + $0x10] sm:$0xff]  ;;  %v1481_v58 = vld [vmem:[%s9175_s7 + $0x18] sm:$0xff] }
 0x96f   :  { %v1320_v33 = vpop.permute.xlu1 %1319 }
 0x970   :  { %6890 = vmatprep.subr.msk.bf16.mxu0 %vm8115_vm8, %v6888_v34  ;;  %v1340_v22 = vsel %vm515_vm2, %v8139_v25, %v1320_v33  ;;  %6903 = vmatprep.subr.bf16.mxu1 %v6902_v56  ;;  %v1588_v33 = vld [vmem:[%s9176_s9] sm:$0xff] }
 0x971   :  { %6893 = vmatpush3.bf16.msk.msra.mxu0 %vm8115_vm8, %v6888_v34  ;;  %v6906_v34 = vpack.c.bf16 %v1481_v58, %v1480_v57 }
 0x973   :  { %v1326_v13 = vpop.permute.xlu1 %1325 }
 0x976   :  { %v7458_v59 = vpop.eup %7457 }
 0x977   :  { %v1217_v60 = vsel %vm599_vm4, %v7458_v59, 0.0  ;;  %v7460_v61 = vpop.eup %7459  ;;  %v1328_v19 = vpop.permute.xlu1 %1327 }
 0x978   :  { %1218 = vadd.xlane.f32.xlu0 %v1217_v60  ;;  %v1220_v62 = vsel %vm603_vm5, %v7460_v61, 0.0  ;;  %v1343_v27 = vsel %vm1341_vm9, %v1340_v22, %v1328_v19  ;;  %v1590_v19 = vld [vmem:[%s9176_s9 + $0x10] sm:$0xff]  ;;  %v1592_v22 = vld [vmem:[%s9176_s9 + $0x20] sm:$0xff] }
 0x97c   :  { %1221 = vadd.xlane.f32.xlu0 %v1220_v62 }
 0x992   :  { %1317 = vrot.lane.b32.xlu0 %v904_v36, %s9183_s30 }
 0xa05   :  { %v1219_v63 = vpop.xlane.xlu0 %1218 }
 0xa06   :  { %7461 = vrcp.f32 %v1219_v63 }
 0xa09   :  { %v1222_v0 = vpop.xlane.xlu0 %1221 }
 0xa0a   :  { %7463 = vrcp.f32 %v1222_v0 }
 0xa0d   :  { %v1318_v15 = vpop.permute.xlu0 %1317 }
 0xa0e   :  { %v1339_v20 = vsel %vm515_vm2, %v8141_v26, %v1318_v15  ;;  %v8226_v26 = vsub.s32 2, %v8038_v14 }
 0xa0f   :  { %v1342_v23 = vsel %vm1341_vm9, %v1339_v20, %v1326_v13  ;;  %v1589_v13 = vld [vmem:[%s9176_s9 + $0x8] sm:$0xff]  ;;  %v1591_v20 = vld [vmem:[%s9176_s9 + $0x18] sm:$0xff] }
 0xa10   :  { %v7462_v1 = vpop.eup %7461  ;;  %v1437_v30 = vrot.slane %v8046_v17, %v8226_v26  ;;  %v6910_v15 = vpack.c.bf16 %v1589_v13, %v1588_v33 }
 0xa11   :  { %v1225_v2 = vmul.f32 %v7462_v1, %v7458_v59  ;;  %v8257_v1 = vsub.s32 3, %v8038_v14 }
 0xa12   :  { %6911 = vmatprep.subr.bf16.mxu0 %v6910_v15 }
 0xa13   :  { %6310 = vmatprep.mubr.msk.f32.mxu0 %vm599_vm4, %v1225_v2  ;;  %v8260_v2 = vsub.s32 4, %v8038_v14 }
 0xa14   :  { %v7464_v3 = vpop.eup %7463 }
 0xa15   :  { %v1226_v5 = vmul.f32 %v7464_v3, %v7460_v61  ;;  %v1469_v3 = vrot.slane %v8046_v17, %v8257_v1  ;;  %v1475_v7 = vrot.slane %v8046_v17, %v8260_v2 }
 0xa17   :  { %6311 = vmatmul.mubr.msk.f32.vlgmr.msra.gmra.mrb[10].mxu0 %vm599_vm4, %v1226_v5 }
 0xa18   :  { %6913 = vmatpush3.bf16.msra.mxu0 %v6910_v15 }
 0xaea   :  { %v6312_v12 = vpop.f32.mrb[10].mxu0 }
 0xaeb   :  { %1335 = vrot.lane.b32.xlu1 %v6312_v12, %s9179_s25  ;;  %v1306_v31 = vpop.f32.mrb[11].mxu0 }
 0xaec   :  { %1333 = vrot.lane.b32.xlu0 %v1306_v31, %s9179_s25  ;;  %s9195_s25 = smov 24  }
 0xb5d   :  { %v1336_v21 = vpop.permute.xlu1 %1335 }
 0xb5e   :  { %v1334_v24 = vpop.permute.xlu0 %1333  ;;  %v1346_v29 = vsel %vm1344_vm10, %v1343_v27, %v1336_v21  ;;  %v6914_v21 = vpack.c.bf16 %v1591_v20, %v1590_v19  ;;  %v1594_v27 = vld [vmem:[%s9176_s9 + $0x30] sm:$0xff] }
 0xb5f   :  { %v1345_v28 = vsel %vm1344_vm10, %v1342_v23, %v1334_v24  ;;  %v1593_v23 = vld [vmem:[%s9176_s9 + $0x28] sm:$0xff] }
 0xb60   :  { %6321 = vmatprep.mubr.msk.f32.mxu1 %vm376_vm0, %v1345_v28  ;;  %6915 = vmatprep.subr.bf16.mxu0 %v6914_v21  ;;  %v6918_v24 = vpack.c.bf16 %v1593_v23, %v1592_v22  ;;  %v1595_v28 = vld [vmem:[%s9176_s9 + $0x38] sm:$0xff] }
 0xb61   :  { %6322 = vmatmul.mubr.msk.f32.vlgmr.msra.gmra.mrb[18].mxu1 %vm376_vm0, %v1346_v29  ;;  %6917 = vmatpush3.bf16.msra.mxu0 %v6914_v21  ;;  %v6922_v29 = vpack.c.bf16 %v1595_v28, %v1594_v27 }
 0xb62   :  { %6905 = vmatpush3.bf16.msra.mxu1 %v6902_v56  ;;  %6919 = vmatprep.subr.bf16.mxu0 %v6918_v24 }
 0xb63   :  { %6907 = vmatprep.subr.bf16.mxu1 %v6906_v34 }
 0xb65   :  { %6921 = vmatpush3.bf16.msra.mxu0 %v6918_v24 }
 0xb66   :  { %6909 = vmatpush3.bf16.msra.mxu1 %v6906_v34  ;;  %6923 = vmatprep.subr.bf16.mxu0 %v6922_v29 }
 0xb69   :  { %6925 = vmatpush3.bf16.msra.mxu0 %v6922_v29 }
 0xc34   :  { %v6323_v25 = vpop.f32.mrb[18].mxu1 }
 0xc35   :  { %v1433_v32 = vadd.f32 %v6323_v25, %v8018_v54  ;;  %v1423_v35 = vpop.f32.mrb[19].mxu1  ;;  %v1597_v25 = vld [vmem:[%s9176_s9 + $0x48] sm:$0xff] }
 0xc36   :  { %v1432_v36 = vadd.f32 %v1423_v35, %v8014_v49 }
 0xc37   :  { %v8232_v37 = vadd.f32 %v1437_v30, %v1433_v32  ;;  %v1598_v32 = vld [vmem:[%s9176_s9 + $0x50] sm:$0xff] }
 0xc38   :  { %v8234_v39 = vadd.f32 %v1437_v30, %v1432_v36  ;;  %v1596_v30 = vld [vmem:[%s9176_s9 + $0x40] sm:$0xff]  ;;  %v1599_v36 = vld [vmem:[%s9176_s9 + $0x58] sm:$0xff] }
 0xc39   :  { %v1443_v40 = vsel %vm380_vm1, %v8232_v37, 0.0  ;;  %v6926_v35 = vpack.c.bf16 %v1597_v25, %v1596_v30  ;;  %v5660_v30 = vld [vmem:[%s9170_s4 + $0x20] sm:$0xff]  ;;  %v5661_v25 = vld [vmem:[%s9170_s4 + $0x28] sm:$0xff] }
 0xc3a   :  { %1444 = vadd.xlane.f32.xlu1 %v1443_v40  ;;  %v1440_v41 = vsel %vm376_vm0, %v8234_v39, 0.0  ;;  %v6930_v40 = vpack.c.bf16 %v1599_v36, %v1598_v32  ;;  %v6942_v32 = vpack.c.bf16 %v5661_v25, %v5660_v30  ;;  %v5663_v36 = vld [vmem:[%s9170_s4 + $0x38] sm:$0xff] }
 0xc3b   :  { %1441 = vadd.xlane.f32.xlu0 %v1440_v41  ;;  %v1600_v41 = vld [vmem:[%s9176_s9 + $0x60] sm:$0xff]  ;;  %6927 = vmatprep.subr.bf16.mxu0 %v6926_v35 }
 0xc3c   :  { %6929 = vmatpush3.bf16.msra.mxu0 %v6926_v35  ;;  %6943 = vmatprep.subr.bf16.mxu1 %v6942_v32  ;;  %v5662_v35 = vld [vmem:[%s9170_s4 + $0x30] sm:$0xff] }
 0xc3d   :  { %6931 = vmatprep.subr.bf16.mxu0 %v6930_v40 }
 0xc40   :  { %6933 = vmatpush3.bf16.msra.mxu0 %v6930_v40  ;;  %v6946_v40 = vpack.c.bf16 %v5663_v36, %v5662_v35 }
 0xcc7   :  { %v1445_v42 = vpop.xlane.xlu1 %1444 }
 0xcc8   :  { %v1447_v43 = vmul.f32 0.03125, %v1445_v42  ;;  %v1442_v44 = vpop.xlane.xlu0 %1441  ;;  %v1601_v42 = vld [vmem:[%s9176_s9 + $0x68] sm:$0xff] }
 0xcc9   :  { %v1446_v45 = vmul.f32 0.03125, %v1442_v44  ;;  %v1602_v44 = vld [vmem:[%s9176_s9 + $0x70] sm:$0xff] }
 0xcca   :  { %v1449_v54 = vsub.f32 %v8232_v37, %v1447_v43  ;;  %v6934_v43 = vpack.c.bf16 %v1601_v42, %v1600_v41 }
 0xccb   :  { %v1448_v49 = vsub.f32 %v8234_v39, %v1446_v45  ;;  %v1603_v45 = vld [vmem:[%s9176_s9 + $0x78] sm:$0xff] }
 0xccc   :  { %v1451_v51 = vmul.f32 %v1449_v54, %v1449_v54  ;;  %6935 = vmatprep.subr.bf16.mxu0 %v6934_v43 }
 0xccd   :  { %v1450_v46 = vmul.f32 %v1448_v49, %v1448_v49  ;;  %6937 = vmatpush3.bf16.msra.mxu0 %v6934_v43 }
 0xcce   :  { %v1455_v52 = vsel %vm380_vm1, %v1451_v51, 0.0 }
 0xccf   :  { %v1452_v48 = vsel %vm376_vm0, %v1450_v46, 0.0 }
 0xcd0   :  { %1453 = vadd.xlane.f32.xlu0 %v1452_v48 }
 0xcd4   :  { %1456 = vadd.xlane.f32.xlu0 %v1455_v52 }
 0xd5d   :  { %v1454_v59 = vpop.xlane.xlu0 %1453 }
 0xd5e   :  { %v1458_v60 = vmul.f32 0.03125, %v1454_v59 }
 0xd60   :  { %v1460_v61 = vadd.f32 1e-06, %v1458_v60 }
 0xd61   :  { %v1457_v62 = vpop.xlane.xlu0 %1456 }
 0xd62   :  { %7465 = vrsqrt.f32 %v1460_v61  ;;  %v1459_v63 = vmul.f32 0.03125, %v1457_v62 }
 0xd64   :  { %v1461_v0 = vadd.f32 1e-06, %v1459_v63 }
 0xd66   :  { %7467 = vrsqrt.f32 %v1461_v0 }
 0xd6c   :  { %v7466_v5 = vpop.eup %7465 }
 0xd6d   :  { %v1464_v6 = vmul.f32 %v7466_v5, %v1448_v49  ;;  %v5656_v49 = vld [vmem:[%s9177_s8] ss:$0 sm:$0xff] }
 0xd6f   :  { %v1470_v8 = vmul.f32 %v1469_v3, %v1464_v6 }
 0xd70   :  { %v7468_v9 = vpop.eup %7467 }
 0xd71   :  { %v1465_v10 = vmul.f32 %v7468_v9, %v1449_v54  ;;  %v1476_v11 = vadd.f32 %v1475_v7, %v1470_v8  ;;  %v6938_v54 = vpack.c.bf16 %v1603_v45, %v1602_v44 }
 0xd73   :  { %v1471_v12 = vmul.f32 %v1469_v3, %v1465_v10  ;;  %6332 = vmatprep.mubr.msk.f32.mxu1 %vm376_vm0, %v1476_v11  ;;  %6939 = vmatprep.subr.bf16.mxu0 %v6938_v54  ;;  %v8320_v10 = vsub.s32 5, %v8038_v14 }
 0xd74   :  { %6941 = vmatpush3.bf16.msra.mxu0 %v6938_v54 }
 0xd75   :  { %v1477_v31 = vadd.f32 %v1475_v7, %v1471_v12  ;;  %v1684_v11 = vrot.slane %v8046_v17, %v8320_v10 }
 0xd77   :  { %6333 = vmatmul.mubr.msk.f32.vlgmr.msra.gmra.mrb[20].mxu1 %vm376_vm0, %v1477_v31 }
 0xd78   :  { %6945 = vmatpush3.bf16.msra.mxu1 %v6942_v32 }
 0xd79   :  { %6947 = vmatprep.subr.bf16.mxu1 %v6946_v40 }
 0xd7c   :  { %6949 = vmatpush3.bf16.msra.mxu1 %v6946_v40 }
 0xe4a   :  { %v6334_v46 = vpop.f32.mrb[20].mxu1 }
 0xe4b   :  { %v1567_v48 = vadd.f32 %v6334_v46, %v5656_v49  ;;  %v1561_v51 = vpop.f32.mrb[21].mxu1 }
 0xe4c   :  { %v1562_v52 = vadd.f32 %v5656_v49, %v1561_v51  ;;  %v8353_v49 = vld [vmem:[%s9171_s10 + $0x8] sm:$0xff] }
 0xe4d   :  { %v1571_v53 = vmul.f32 %v1567_v48, %v1567_v48  ;;  %v1718_v46 = vrot.slane %v8353_v49, %v8041_v16 }
 0xe4e   :  { %v1570_v55 = vmul.f32 %v1562_v52, %v1562_v52 }
 0xe4f   :  { %v1573_v56 = vmul.f32 %v1571_v53, %v1567_v48 }
 0xe50   :  { %v1572_v57 = vmul.f32 %v1570_v55, %v1562_v52  ;;  %v1724_v55 = vrot.slane %v8353_v49, %v8049_v18 }
 0xe51   :  { %v1575_v58 = vmul.f32 0.044715, %v1573_v56 }
 0xe52   :  { %v1574_v34 = vmul.f32 0.044715, %v1572_v57 }
 0xe53   :  { %v1577_v59 = vadd.f32 %v1575_v58, %v1567_v48 }
 0xe54   :  { %v1576_v60 = vadd.f32 %v1574_v34, %v1562_v52 }
 0xe55   :  { %v1579_v61 = vmul.f32 0.7978846, %v1577_v59  ;;  %v5665_v59 = vld [vmem:[%s9172_s5 + $0x1] ss:$0 sm:$0xff] }
 0xe56   :  { %v1578_v62 = vmul.f32 0.7978846, %v1576_v60 }
 0xe57   :  { %7469 = vtanh.f32 %v1579_v61 }
 0xe58   :  { %7471 = vtanh.f32 %v1578_v62 }
 0xe61   :  { %v7470_v63 = vpop.eup %7469 }
 0xe62   :  { %v7472_v0 = vpop.eup %7471  ;;  %v1583_v3 = vadd.f32 1.0, %v7470_v63 }
 0xe63   :  { %v1582_v5 = vadd.f32 1.0, %v7472_v0 }
 0xe64   :  { %v1585_v6 = vmul.f32 0.5, %v1583_v3 }
 0xe65   :  { %v1584_v7 = vmul.f32 0.5, %v1582_v5 }
 0xe66   :  { %v1587_v9 = vmul.f32 %v1585_v6, %v1567_v48 }
 0xe67   :  { %v1586_v8 = vmul.f32 %v1584_v7, %v1562_v52 }
 0xe69   :  { %6367 = vmatprep.mubr.f32.mxu0 %v1586_v8 }
 0xe6a   :  { %6368 = vmatmul.mubr.f32.vlgmr.msra.gmra.mrb[12].mxu0 %v1587_v9 }
 0xf3d   :  { %v6369_v12 = vpop.f32.mrb[12].mxu0 }
 0xf3e   :  { %v1680_v31 = vadd.f32 %v6369_v12, %v8232_v37  ;;  %v1670_v33 = vpop.f32.mrb[13].mxu0 }
 0xf3f   :  { %v1679_v13 = vadd.f32 %v1670_v33, %v8234_v39 }
 0xf40   :  { %v8326_v15 = vadd.f32 %v1684_v11, %v1680_v31 }
 0xf41   :  { %v8328_v19 = vadd.f32 %v1684_v11, %v1679_v13 }
 0xf42   :  { %v1692_v20 = vsel %vm380_vm1, %v8326_v15, 0.0 }
 0xf43   :  { %1693 = vadd.xlane.f32.xlu1 %v1692_v20  ;;  %v1689_v14 = vsel %vm376_vm0, %v8328_v19, 0.0 }
 0xf44   :  { %1690 = vadd.xlane.f32.xlu0 %v1689_v14 }
 0xfd0   :  { %v1694_v21 = vpop.xlane.xlu1 %1693 }
 0xfd1   :  { %v1696_v17 = vmul.f32 0.03125, %v1694_v21  ;;  %v1691_v22 = vpop.xlane.xlu0 %1690 }
 0xfd2   :  { %v1695_v23 = vmul.f32 0.03125, %v1691_v22 }
 0xfd3   :  { %v1698_v37 = vsub.f32 %v8326_v15, %v1696_v17 }
 0xfd4   :  { %v1697_v39 = vsub.f32 %v8328_v19, %v1695_v23 }
 0xfd5   :  { %v1700_v24 = vmul.f32 %v1698_v37, %v1698_v37 }
 0xfd6   :  { %v1699_v27 = vmul.f32 %v1697_v39, %v1697_v39 }
 0xfd7   :  { %v1704_v28 = vsel %vm380_vm1, %v1700_v24, 0.0 }
 0xfd8   :  { %1705 = vadd.xlane.f32.xlu1 %v1704_v28  ;;  %v1701_v29 = vsel %vm376_vm0, %v1699_v27, 0.0 }
 0xfd9   :  { %1702 = vadd.xlane.f32.xlu0 %v1701_v29 }
0x1065   :  { %v1706_v41 = vpop.xlane.xlu1 %1705 }
0x1066   :  { %v1708_v42 = vmul.f32 0.03125, %v1706_v41  ;;  %v1703_v43 = vpop.xlane.xlu0 %1702 }
0x1067   :  { %v1707_v44 = vmul.f32 0.03125, %v1703_v43 }
0x1068   :  { %v1710_v45 = vadd.f32 1e-06, %v1708_v42 }
0x1069   :  { %v1709_v54 = vadd.f32 1e-06, %v1707_v44 }
0x106a   :  { %7473 = vrsqrt.f32 %v1710_v45 }
0x106b   :  { %7475 = vrsqrt.f32 %v1709_v54 }
0x1074   :  { %v7474_v48 = vpop.eup %7473 }
0x1075   :  { %v7476_v51 = vpop.eup %7475  ;;  %v1714_v52 = vmul.f32 %v7474_v48, %v1698_v37 }
0x1076   :  { %v1713_v53 = vmul.f32 %v7476_v51, %v1697_v39 }
0x1077   :  { %v1720_v56 = vmul.f32 %v1718_v46, %v1714_v52 }
0x1078   :  { %v1719_v57 = vmul.f32 %v1718_v46, %v1713_v53 }
0x1079   :  { %v1726_v34 = vadd.f32 %v1724_v55, %v1720_v56 }
0x107a   :  { %v1725_v58 = vadd.f32 %v1724_v55, %v1719_v57 }
0x107c   :  { %6378 = vmatprep.mubr.msk.f32.mxu1 %vm376_vm0, %v1725_v58 }
0x107d   :  { %6379 = vmatmul.mubr.msk.f32.vlgmr.msra.gmra.mrb[22].mxu1 %vm376_vm0, %v1726_v34 }
0x1150   :  { %v6380_v60 = vpop.f32.mrb[22].mxu1 }
0x1151   :  { %v8364_v61 = vadd.f32 %v6380_v60, %v5665_v59  ;;  %v1812_v62 = vpop.f32.mrb[23].mxu1 }
0x1152   :  { %v8366_v63 = vadd.f32 %v5665_v59, %v1812_v62 }
0x1154   :  { %6385 = vmatprep.mubr.msk.f32.mxu1 %vm515_vm2, %v8366_v63  ;;  %v8372_v0 = vpack.i.bf16 %v8364_v61, %v8366_v63 }
0x1156   :  { %7310 = vrot.lane.b32.xlu0 %v8372_v0, %s7609_s18 }
0x115a   :  { %7320 = vrot.lane.b32.xlu0 %v8372_v0, %s7610_s19 }
0x115e   :  { %2020 = vrot.lane.b32.xlu0 %v8366_v63, %s7611_s20 }
0x1162   :  { %2022 = vrot.lane.b32.xlu0 %v8364_v61, %s7611_s20 }
0x11c8   :  { %v7311_v3 = vpop.permute.xlu0 %7310 }
0x11c9   :  { %v7313_v5 = vunpack.i.h.bf16 %v7311_v3  ;;  %v7312_v6 = vunpack.i.l.bf16 %v7311_v3 }
0x11cb   :  { %v6950_v7 = vpack.c.bf16 %v7313_v5, %v7312_v6 }
0x11cc   :  { %v7321_v29 = vpop.permute.xlu0 %7320 }
0x11cd   :  { %6952 = vmatprep.subr.msk.bf16.mxu1 %vm8082_vm3, %v6950_v7  ;;  %v7323_v25 = vunpack.i.h.bf16 %v7321_v29  ;;  %v7322_v32 = vunpack.i.l.bf16 %v7321_v29 }
0x11ce   :  { %6955 = vmatpush3.bf16.xpose.msk.msra.mxu1 %vm8082_vm3, %v6950_v7 }
0x11cf   :  { %v6962_v41 = vpack.c.bf16 %v7323_v25, %v7322_v32 }
0x11d0   :  { %v2021_v54 = vpop.permute.xlu0 %2020 }
0x11d4   :  { %v2023_v46 = vpop.permute.xlu0 %2022 }
0x11d5   :  { %6386 = vmatmul.mubr.msk.f32.vlgmr.msra.gmra.mrb[24].mxu1 %vm515_vm2, %v8364_v61 }
0x12a8   :  { %v6387_v8 = vpop.f32.mrb[24].mxu1 }
0x12a9   :  { %v1901_v9 = vpop.f32.mrb[25].mxu1  ;;  %v1907_v12 = vadd.f32 %v6387_v8, %v8107_v50 }
0x12aa   :  { %v1902_v11 = vadd.f32 %v1901_v9, %v8102_v47 }
0x12ab   :  { %v1913_v33 = vsel %vm603_vm5, %v1907_v12, -inf }
0x12ac   :  { %v1910_v31 = vsel %vm599_vm4, %v1902_v11, -inf }
0x12ad   :  { %1911 = vmax.xlane.f32.xlu1 %v1910_v31 }
0x12b1   :  { %1914 = vmax.xlane.f32.xlu1 %v1913_v33 }
0x133a   :  { %v1912_v13 = vpop.xlane.xlu1 %1911 }
0x133b   :  { %v1916_v20 = vsub.f32 %v1902_v11, %v1912_v13 }
0x133d   :  { %v1918_v17 = vmul.f32 1.442695, %v1916_v20 }
0x133e   :  { %v1915_v14 = vpop.xlane.xlu1 %1914 }
0x133f   :  { %v1917_v21 = vsub.f32 %v1907_v12, %v1915_v14 }
0x1341   :  { %v1920_v22 = vmul.f32 1.442695, %v1917_v21 }
0x1343   :  { %7477 = vpow2.f32 %v1920_v22 }
0x1344   :  { %7479 = vpow2.f32 %v1918_v17 }
0x134d   :  { %v7478_v23 = vpop.eup %7477 }
0x134e   :  { %v1925_v37 = vsel %vm603_vm5, %v7478_v23, 0.0  ;;  %v7480_v39 = vpop.eup %7479 }
0x134f   :  { %1926 = vadd.xlane.f32.xlu1 %v1925_v37  ;;  %v1922_v24 = vsel %vm599_vm4, %v7480_v39, 0.0 }
0x1353   :  { %1923 = vadd.xlane.f32.xlu1 %v1922_v24 }
0x1364   :  { %7315 = vrot.lane.b32.xlu1 %v8372_v0, %s7614_s26 }
0x13dc   :  { %v1927_v27 = vpop.xlane.xlu1 %1926 }
0x13dd   :  { %7481 = vrcp.f32 %v1927_v27 }
0x13e0   :  { %v1924_v28 = vpop.xlane.xlu1 %1923 }
0x13e1   :  { %7483 = vrcp.f32 %v1924_v28 }
0x13e4   :  { %v7316_v30 = vpop.permute.xlu1 %7315 }
0x13e5   :  { %v7318_v35 = vunpack.i.h.bf16 %v7316_v30  ;;  %v7317_v36 = vunpack.i.l.bf16 %v7316_v30  ;;  %v8445_v30 = vld [vmem:[%s9173_s1 + $0x8] sm:$0x3] }
0x13e7   :  { %v6956_v40 = vpack.c.bf16 %v7318_v35, %v7317_v36  ;;  %v7482_v42 = vpop.eup %7481  ;;  %v8451_v35 = vld [vmem:[%s9173_s1] sm:$0xff] }
0x13e8   :  { %v1931_v45 = vmul.f32 %v7482_v42, %v7478_v23 }
0x13e9   :  { %6958 = vmatprep.subr.msk.bf16.mxu1 %vm8115_vm8, %v6956_v40 }
0x13ea   :  { %6961 = vmatpush3.bf16.msk.msra.mxu1 %vm8115_vm8, %v6956_v40 }
0x13eb   :  { %v7484_v43 = vpop.eup %7483  ;;  %6964 = vmatprep.subr.msk.bf16.mxu1 %vm8082_vm3, %v6962_v41 }
0x13ec   :  { %v1930_v44 = vmul.f32 %v7484_v43, %v7480_v39 }
0x13ee   :  { %6392 = vmatprep.mubr.msk.f32.mxu1 %vm599_vm4, %v1930_v44 }
0x13ef   :  { %6393 = vmatmul.mubr.msk.f32.vlgmr.msra.gmra.mrb[26].mxu1 %vm599_vm4, %v1931_v45 }
0x13f0   :  { %6399 = vmatprep.mubr.msk.f32.mxu1 %vm515_vm2, %v2021_v54 }
0x13f3   :  { %6967 = vmatpush3.bf16.xpose.msk.msra.mxu1 %vm8082_vm3, %v6962_v41 }
0x13fa   :  { %6400 = vmatmul.mubr.msk.f32.vlgmr.msra.gmra.mrb[28].mxu1 %vm515_vm2, %v2023_v46 }
0x14c2   :  { %v8408_v48 = vpop.f32.mrb[26].mxu1 }
0x14c3   :  { %v8410_v51 = vpop.f32.mrb[27].mxu1 }
0x14cd   :  { %v6401_v52 = vpop.f32.mrb[28].mxu1 }
0x14ce   :  { %v2108_v53 = vadd.f32 %v6401_v52, %v8107_v50  ;;  %v2102_v55 = vpop.f32.mrb[29].mxu1 }
0x14cf   :  { %v2103_v56 = vadd.f32 %v2102_v55, %v8102_v47 }
0x14d0   :  { %v2114_v57 = vsel %vm603_vm5, %v2108_v53, -inf }
0x14d1   :  { %2115 = vmax.xlane.f32.xlu0 %v2114_v57  ;;  %v2111_v58 = vsel %vm599_vm4, %v2103_v56, -inf }
0x14d2   :  { %2112 = vmax.xlane.f32.xlu1 %v2111_v58 }
0x14e3   :  { %7325 = vrot.lane.b32.xlu1 %v8372_v0, %s7617_s3 }
0x14e7   :  { %2221 = vrot.lane.b32.xlu1 %v8366_v63, %s7613_s22 }
0x14eb   :  { %2223 = vrot.lane.b32.xlu1 %v8364_v61, %s7613_s22 }
0x155e   :  { %v2116_v34 = vpop.xlane.xlu0 %2115 }
0x155f   :  { %v2118_v50 = vsub.f32 %v2108_v53, %v2116_v34  ;;  %v2113_v59 = vpop.xlane.xlu1 %2112 }
0x1560   :  { %v2117_v60 = vsub.f32 %v2103_v56, %v2113_v59 }
0x1561   :  { %v2121_v47 = vmul.f32 1.442695, %v2118_v50 }
0x1562   :  { %v2119_v62 = vmul.f32 1.442695, %v2117_v60 }
0x1563   :  { %7485 = vpow2.f32 %v2121_v47  ;;  %v7326_v3 = vpop.permute.xlu1 %7325 }
0x1564   :  { %v7328_v5 = vunpack.i.h.bf16 %v7326_v3  ;;  %v7327_v6 = vunpack.i.l.bf16 %v7326_v3  ;;  %7487 = vpow2.f32 %v2119_v62 }
0x1566   :  { %v6968_v7 = vpack.c.bf16 %v7328_v5, %v7327_v6 }
0x1567   :  { %v2222_v39 = vpop.permute.xlu1 %2221 }
0x1568   :  { %6970 = vmatprep.subr.msk.bf16.mxu1 %vm8115_vm8, %v6968_v7 }
0x1569   :  { %6973 = vmatpush3.bf16.msk.msra.mxu1 %vm8115_vm8, %v6968_v7 }
0x156b   :  { %v2224_v24 = vpop.permute.xlu1 %2223 }
0x156d   :  { %v7486_v8 = vpop.eup %7485 }
0x156e   :  { %v2126_v9 = vsel %vm603_vm5, %v7486_v8, 0.0  ;;  %v7488_v11 = vpop.eup %7487 }
0x156f   :  { %2127 = vadd.xlane.f32.xlu0 %v2126_v9  ;;  %v2123_v12 = vsel %vm599_vm4, %v7488_v11, 0.0 }
0x1573   :  { %2124 = vadd.xlane.f32.xlu0 %v2123_v12 }
0x1589   :  { %7330 = vrot.lane.b32.xlu0 %v8372_v0, %s7612_s21 }
0x15fc   :  { %v2128_v31 = vpop.xlane.xlu0 %2127 }
0x15fd   :  { %7489 = vrcp.f32 %v2128_v31 }
0x1600   :  { %v2125_v33 = vpop.xlane.xlu0 %2124 }
0x1601   :  { %7491 = vrcp.f32 %v2125_v33 }
0x1604   :  { %v7331_v13 = vpop.permute.xlu0 %7330 }
0x1605   :  { %v7333_v20 = vunpack.i.h.bf16 %v7331_v13  ;;  %v7332_v14 = vunpack.i.l.bf16 %v7331_v13 }
0x1607   :  { %v6974_v21 = vpack.c.bf16 %v7333_v20, %v7332_v14  ;;  %v7490_v17 = vpop.eup %7489 }
0x1608   :  { %v2132_v37 = vmul.f32 %v7490_v17, %v7486_v8 }
0x1609   :  { %6976 = vmatprep.subr.msk.bf16.mxu1 %vm8082_vm3, %v6974_v21 }
0x160b   :  { %v7492_v22 = vpop.eup %7491 }
0x160c   :  { %v2131_v23 = vmul.f32 %v7492_v22, %v7488_v11 }
0x160e   :  { %6406 = vmatprep.mubr.msk.f32.mxu1 %vm599_vm4, %v2131_v23 }
0x160f   :  { %6407 = vmatmul.mubr.msk.f32.vlgmr.msra.gmra.mrb[30].mxu1 %vm599_vm4, %v2132_v37 }
0x1610   :  { %6979 = vmatpush3.bf16.xpose.msk.msra.mxu1 %vm8082_vm3, %v6974_v21  ;;  %6413 = vmatprep.mubr.msk.f32.mxu1 %vm515_vm2, %v2222_v39 }
0x1617   :  { %6414 = vmatmul.mubr.msk.f32.vlgmr.msra.gmra.mrb[32].mxu1 %vm515_vm2, %v2224_v24 }
0x16e2   :  { %v8438_v27 = vpop.f32.mrb[30].mxu1 }
0x16e3   :  { %v8440_v28 = vpop.f32.mrb[31].mxu1 }
0x16ea   :  { %v6415_v29 = vpop.f32.mrb[32].mxu1 }
0x16eb   :  { %v2309_v25 = vadd.f32 %v8445_v30, %v6415_v29  ;;  %v2303_v32 = vpop.f32.mrb[33].mxu1 }
0x16ec   :  { %v2304_v36 = vadd.f32 %v8451_v35, %v2303_v32 }
0x16ed   :  { %v2315_v40 = vsel %vm603_vm5, %v2309_v25, -inf }
0x16ee   :  { %2316 = vmax.xlane.f32.xlu0 %v2315_v40  ;;  %v2312_v41 = vsel %vm599_vm4, %v2304_v36, -inf }
0x16ef   :  { %2313 = vmax.xlane.f32.xlu1 %v2312_v41 }
0x1700   :  { %7335 = vrot.lane.b32.xlu1 %v8372_v0, %s7616_s0 }
0x1704   :  { %2422 = vrot.lane.b32.xlu1 %v8366_v63, %s9187_s28 }
0x1708   :  { %2424 = vrot.lane.b32.xlu1 %v8364_v61, %s9187_s28 }
0x177b   :  { %v2317_v42 = vpop.xlane.xlu0 %2316 }
0x177c   :  { %v2319_v43 = vsub.f32 %v2309_v25, %v2317_v42  ;;  %v2314_v44 = vpop.xlane.xlu1 %2313 }
0x177d   :  { %v2318_v45 = vsub.f32 %v2304_v36, %v2314_v44 }
0x177e   :  { %v2322_v54 = vmul.f32 1.442695, %v2319_v43 }
0x177f   :  { %v2320_v46 = vmul.f32 1.442695, %v2318_v45 }
0x1780   :  { %7493 = vpow2.f32 %v2322_v54  ;;  %v7336_v52 = vpop.permute.xlu1 %7335 }
0x1781   :  { %v7338_v53 = vunpack.i.h.bf16 %v7336_v52  ;;  %v7337_v55 = vunpack.i.l.bf16 %v7336_v52  ;;  %7495 = vpow2.f32 %v2320_v46  ;;  %v5696_v52 = vld [vmem:[%s9174_s6 + $0x20] sm:$0xff] }
0x1783   :  { %v6980_v56 = vpack.c.bf16 %v7338_v53, %v7337_v55  ;;  %v5698_v53 = vld [vmem:[%s9174_s6 + $0x30] sm:$0xff] }
0x1784   :  { %v2423_v8 = vpop.permute.xlu1 %2422 }
0x1785   :  { %6982 = vmatprep.subr.msk.bf16.mxu1 %vm8115_vm8, %v6980_v56 }
0x1786   :  { %6985 = vmatpush3.bf16.msk.msra.mxu1 %vm8115_vm8, %v6980_v56  ;;  %v5699_v56 = vld [vmem:[%s9174_s6 + $0x38] sm:$0xff] }
0x1788   :  { %v2425_v9 = vpop.permute.xlu1 %2424 }
0x178a   :  { %v7494_v63 = vpop.eup %7493 }
0x178b   :  { %v2327_v61 = vsel %vm603_vm5, %v7494_v63, 0.0  ;;  %v7496_v57 = vpop.eup %7495 }
0x178c   :  { %2328 = vadd.xlane.f32.xlu0 %v2327_v61  ;;  %v2324_v58 = vsel %vm599_vm4, %v7496_v57, 0.0 }
0x1790   :  { %2325 = vadd.xlane.f32.xlu0 %v2324_v58 }
0x17a6   :  { %7340 = vrot.lane.b32.xlu0 %v8372_v0, %s9189_s27 }
0x1819   :  { %v2329_v34 = vpop.xlane.xlu0 %2328 }
0x181a   :  { %7497 = vrcp.f32 %v2329_v34 }
0x181d   :  { %v2326_v50 = vpop.xlane.xlu0 %2325 }
0x181e   :  { %7499 = vrcp.f32 %v2326_v50 }
0x1821   :  { %v7341_v59 = vpop.permute.xlu0 %7340 }
0x1822   :  { %v7343_v60 = vunpack.i.h.bf16 %v7341_v59  ;;  %v7342_v47 = vunpack.i.l.bf16 %v7341_v59 }
0x1824   :  { %v6986_v62 = vpack.c.bf16 %v7343_v60, %v7342_v47  ;;  %v7498_v3 = vpop.eup %7497 }
0x1825   :  { %v2333_v7 = vmul.f32 %v7498_v3, %v7494_v63  ;;  %v7002_v63 = vpack.c.bf16 %v5699_v56, %v5698_v53 }
0x1826   :  { %6988 = vmatprep.subr.msk.bf16.mxu1 %vm8082_vm3, %v6986_v62 }
0x1828   :  { %v7500_v5 = vpop.eup %7499 }
0x1829   :  { %v2332_v6 = vmul.f32 %v7500_v5, %v7496_v57 }
0x182b   :  { %6420 = vmatprep.mubr.msk.f32.mxu1 %vm599_vm4, %v2332_v6 }
0x182c   :  { %6421 = vmatmul.mubr.msk.f32.vlgmr.msra.gmra.mrb[34].mxu1 %vm599_vm4, %v2333_v7 }
0x182d   :  { %6991 = vmatpush3.bf16.xpose.msk.msra.mxu1 %vm8082_vm3, %v6986_v62  ;;  %6427 = vmatprep.mubr.msk.f32.mxu1 %vm515_vm2, %v2423_v8 }
0x1834   :  { %6428 = vmatmul.mubr.msk.f32.vlgmr.msra.gmra.mrb[36].mxu1 %vm515_vm2, %v2425_v9 }
0x18ff   :  { %v6422_v11 = vpop.f32.mrb[34].mxu1 }
0x1900   :  { %v2413_v12 = vpop.f32.mrb[35].mxu1 }
0x1907   :  { %v6429_v31 = vpop.f32.mrb[36].mxu1 }
0x1908   :  { %v2510_v33 = vadd.f32 %v8445_v30, %v6429_v31  ;;  %v2504_v13 = vpop.f32.mrb[37].mxu1 }
0x1909   :  { %v2505_v20 = vadd.f32 %v8451_v35, %v2504_v13 }
0x190a   :  { %v2516_v14 = vsel %vm603_vm5, %v2510_v33, -inf }
0x190b   :  { %2517 = vmax.xlane.f32.xlu0 %v2516_v14  ;;  %v2513_v21 = vsel %vm599_vm4, %v2505_v20, -inf }
0x190c   :  { %2514 = vmax.xlane.f32.xlu1 %v2513_v21 }
0x191d   :  { %7345 = vrot.lane.b32.xlu1 %v8372_v0, %s9185_s29 }
0x1921   :  { %2627 = vrot.lane.b32.xlu1 %v8438_v27, %s9183_s30 }
0x1925   :  { %2633 = vrot.lane.b32.xlu1 %v2413_v12, %s9194_s15 }
0x1929   :  { %2635 = vrot.lane.b32.xlu1 %v6422_v11, %s9194_s15 }
0x1998   :  { %v2518_v17 = vpop.xlane.xlu0 %2517 }
0x1999   :  { %v2520_v22 = vsub.f32 %v2510_v33, %v2518_v17  ;;  %v2515_v23 = vpop.xlane.xlu1 %2514 }
0x199a   :  { %v2519_v37 = vsub.f32 %v2505_v20, %v2515_v23 }
0x199b   :  { %v2523_v39 = vmul.f32 1.442695, %v2520_v22 }
0x199c   :  { %v2521_v24 = vmul.f32 1.442695, %v2519_v37 }
0x199d   :  { %v7346_v29 = vpop.permute.xlu1 %7345 }
0x199e   :  { %7501 = vpow2.f32 %v2521_v24  ;;  %v7348_v25 = vunpack.i.h.bf16 %v7346_v29  ;;  %v7347_v32 = vunpack.i.l.bf16 %v7346_v29  ;;  %v5702_v29 = vld [vmem:[%s9175_s7 + $0x20] sm:$0xff] }
0x199f   :  { %7503 = vpow2.f32 %v2523_v39 }
0x19a0   :  { %v6992_v36 = vpack.c.bf16 %v7348_v25, %v7347_v32  ;;  %v5703_v25 = vld [vmem:[%s9175_s7 + $0x28] sm:$0xff] }
0x19a1   :  { %v2628_v58 = vpop.permute.xlu1 %2627  ;;  %v7006_v32 = vpack.c.bf16 %v5703_v25, %v5702_v29 }
0x19a2   :  { %6994 = vmatprep.subr.msk.bf16.mxu0 %vm8115_vm8, %v6992_v36  ;;  %v2648_v62 = vsel %vm515_vm2, %v8408_v48, %v2628_v58  ;;  %v5710_v58 = vld [vmem:[%s9176_s9 + $0x80] sm:$0xff] }
0x19a3   :  { %6997 = vmatpush3.bf16.msk.msra.mxu0 %vm8115_vm8, %v6992_v36  ;;  %7007 = vmatprep.subr.bf16.mxu1 %v7006_v32  ;;  %v5704_v36 = vld [vmem:[%s9175_s7 + $0x30] sm:$0xff] }
0x19a4   :  { %7009 = vmatpush3.bf16.msra.mxu1 %v7006_v32 }
0x19a5   :  { %v2634_v34 = vpop.permute.xlu1 %2633 }
0x19a8   :  { %v7502_v0 = vpop.eup %7501 }
0x19a9   :  { %v2525_v27 = vsel %vm599_vm4, %v7502_v0, 0.0  ;;  %v7504_v40 = vpop.eup %7503  ;;  %v2636_v59 = vpop.permute.xlu1 %2635 }
0x19aa   :  { %2526 = vadd.xlane.f32.xlu0 %v2525_v27  ;;  %v2528_v41 = vsel %vm603_vm5, %v7504_v40, 0.0  ;;  %v2650_v6 = vsel %vm1341_vm9, %v2648_v62, %v2636_v59  ;;  %v5712_v59 = vld [vmem:[%s9176_s9 + $0x90] sm:$0xff]  ;;  %v5714_v62 = vld [vmem:[%s9176_s9 + $0xa0] sm:$0xff] }
0x19ae   :  { %2529 = vadd.xlane.f32.xlu0 %v2528_v41 }
0x19c4   :  { %2625 = vrot.lane.b32.xlu0 %v8440_v28, %s9183_s30  ;;  %v5697_v28 = vld [vmem:[%s9174_s6 + $0x28] sm:$0xff] }
0x19c5   :  { %v6998_v55 = vpack.c.bf16 %v5697_v28, %v5696_v52  ;;  %v2782_v28 = vrot.slane %v8353_v49, %v8260_v2 }
0x19c7   :  { %6999 = vmatprep.subr.bf16.mxu0 %v6998_v55 }
0x1a37   :  { %v2527_v42 = vpop.xlane.xlu0 %2526 }
0x1a38   :  { %7505 = vrcp.f32 %v2527_v42 }
0x1a3b   :  { %v2530_v43 = vpop.xlane.xlu0 %2529 }
0x1a3c   :  { %7507 = vrcp.f32 %v2530_v43 }
0x1a3f   :  { %v2626_v50 = vpop.permute.xlu0 %2625 }
0x1a40   :  { %v2647_v60 = vsel %vm515_vm2, %v8410_v51, %v2626_v50  ;;  %v2744_v51 = vrot.slane %v8353_v49, %v8226_v26 }
0x1a41   :  { %v2649_v3 = vsel %vm1341_vm9, %v2647_v60, %v2634_v34  ;;  %v5711_v34 = vld [vmem:[%s9176_s9 + $0x88] sm:$0xff]  ;;  %v5713_v60 = vld [vmem:[%s9176_s9 + $0x98] sm:$0xff] }
0x1a42   :  { %v7506_v44 = vpop.eup %7505  ;;  %v7014_v50 = vpack.c.bf16 %v5711_v34, %v5710_v58 }
0x1a43   :  { %v2533_v45 = vmul.f32 %v7506_v44, %v7502_v0  ;;  %v5705_v0 = vld [vmem:[%s9175_s7 + $0x38] sm:$0xff] }
0x1a44   :  { %v7010_v27 = vpack.c.bf16 %v5705_v0, %v5704_v36 }
0x1a45   :  { %6434 = vmatprep.mubr.msk.f32.mxu0 %vm599_vm4, %v2533_v45 }
0x1a46   :  { %v7508_v54 = vpop.eup %7507  ;;  %7011 = vmatprep.subr.bf16.mxu1 %v7010_v27 }
0x1a47   :  { %v2534_v46 = vmul.f32 %v7508_v54, %v7504_v40  ;;  %7013 = vmatpush3.bf16.msra.mxu1 %v7010_v27  ;;  %v2776_v54 = vrot.slane %v8353_v49, %v8257_v1 }
0x1a49   :  { %6435 = vmatmul.mubr.msk.f32.vlgmr.msra.gmra.mrb[14].mxu0 %vm599_vm4, %v2534_v46 }
0x1a4a   :  { %7001 = vmatpush3.bf16.msra.mxu0 %v6998_v55 }
0x1a4b   :  { %7003 = vmatprep.subr.bf16.mxu0 %v7002_v63 }
0x1a4e   :  { %7005 = vmatpush3.bf16.msra.mxu0 %v7002_v63 }
0x1a4f   :  { %7015 = vmatprep.subr.bf16.mxu0 %v7014_v50 }
0x1b1c   :  { %v6436_v61 = vpop.f32.mrb[14].mxu0 }
0x1b1d   :  { %2643 = vrot.lane.b32.xlu1 %v6436_v61, %s9195_s25  ;;  %v2614_v57 = vpop.f32.mrb[15].mxu0 }
0x1b1e   :  { %2641 = vrot.lane.b32.xlu0 %v2614_v57, %s9195_s25 }
0x1b8f   :  { %v2644_v47 = vpop.permute.xlu1 %2643 }
0x1b90   :  { %v2642_v5 = vpop.permute.xlu0 %2641  ;;  %v2652_v8 = vsel %vm1344_vm10, %v2650_v6, %v2644_v47  ;;  %v7018_v47 = vpack.c.bf16 %v5713_v60, %v5712_v59  ;;  %v5716_v6 = vld [vmem:[%s9176_s9 + $0xb0] sm:$0xff] }
0x1b91   :  { %v2651_v7 = vsel %vm1344_vm10, %v2649_v3, %v2642_v5  ;;  %v5715_v3 = vld [vmem:[%s9176_s9 + $0xa8] sm:$0xff] }
0x1b92   :  { %6445 = vmatprep.mubr.msk.f32.mxu0 %vm376_vm0, %v2651_v7  ;;  %v7022_v5 = vpack.c.bf16 %v5715_v3, %v5714_v62  ;;  %v5717_v7 = vld [vmem:[%s9176_s9 + $0xb8] sm:$0xff] }
0x1b93   :  { %6446 = vmatmul.mubr.msk.f32.vlgmr.msra.gmra.mrb[16].mxu0 %vm376_vm0, %v2652_v8  ;;  %v7026_v8 = vpack.c.bf16 %v5717_v7, %v5716_v6 }
0x1b94   :  { %7017 = vmatpush3.bf16.msra.mxu0 %v7014_v50 }
0x1b95   :  { %7019 = vmatprep.subr.bf16.mxu0 %v7018_v47 }
0x1b98   :  { %7021 = vmatpush3.bf16.msra.mxu0 %v7018_v47 }
0x1b99   :  { %7023 = vmatprep.subr.bf16.mxu0 %v7022_v5 }
0x1b9c   :  { %7025 = vmatpush3.bf16.msra.mxu0 %v7022_v5 }
0x1b9d   :  { %7027 = vmatprep.subr.bf16.mxu0 %v7026_v8 }
0x1ba0   :  { %7029 = vmatpush3.bf16.msra.mxu0 %v7026_v8 }
0x1c66   :  { %v6447_v9 = vpop.f32.mrb[16].mxu0 }
0x1c67   :  { %v2740_v11 = vadd.f32 %v6447_v9, %v8326_v15  ;;  %v2730_v48 = vpop.f32.mrb[17].mxu0  ;;  %v5719_v9 = vld [vmem:[%s9176_s9 + $0xc8] sm:$0xff] }
0x1c68   :  { %v2739_v12 = vadd.f32 %v2730_v48, %v8328_v19 }
0x1c69   :  { %v8526_v31 = vadd.f32 %v2744_v51, %v2740_v11  ;;  %v5720_v11 = vld [vmem:[%s9176_s9 + $0xd0] sm:$0xff] }
0x1c6a   :  { %v8528_v33 = vadd.f32 %v2744_v51, %v2739_v12  ;;  %v5718_v51 = vld [vmem:[%s9176_s9 + $0xc0] sm:$0xff]  ;;  %v5721_v12 = vld [vmem:[%s9176_s9 + $0xd8] sm:$0xff] }
0x1c6b   :  { %v2750_v13 = vsel %vm380_vm1, %v8526_v31, 0.0  ;;  %v7030_v48 = vpack.c.bf16 %v5719_v9, %v5718_v51  ;;  %v5727_v51 = vld [vmem:[%s9170_s4 + $0x40] sm:$0xff]  ;;  %v5728_v9 = vld [vmem:[%s9170_s4 + $0x48] sm:$0xff] }
0x1c6c   :  { %2751 = vadd.xlane.f32.xlu1 %v2750_v13  ;;  %v2747_v20 = vsel %vm376_vm0, %v8528_v33, 0.0  ;;  %v7034_v13 = vpack.c.bf16 %v5721_v12, %v5720_v11  ;;  %v7046_v11 = vpack.c.bf16 %v5728_v9, %v5727_v51  ;;  %v5730_v12 = vld [vmem:[%s9170_s4 + $0x58] sm:$0xff] }
0x1c6d   :  { %2748 = vadd.xlane.f32.xlu0 %v2747_v20  ;;  %v5722_v20 = vld [vmem:[%s9176_s9 + $0xe0] sm:$0xff]  ;;  %7031 = vmatprep.subr.bf16.mxu0 %v7030_v48 }
0x1c6e   :  { %7033 = vmatpush3.bf16.msra.mxu0 %v7030_v48  ;;  %7047 = vmatprep.subr.bf16.mxu1 %v7046_v11  ;;  %v5729_v48 = vld [vmem:[%s9170_s4 + $0x50] sm:$0xff] }
0x1c6f   :  { %7035 = vmatprep.subr.bf16.mxu0 %v7034_v13 }
0x1c72   :  { %7037 = vmatpush3.bf16.msra.mxu0 %v7034_v13  ;;  %v7050_v13 = vpack.c.bf16 %v5730_v12, %v5729_v48 }
0x1cf9   :  { %v2752_v14 = vpop.xlane.xlu1 %2751 }
0x1cfa   :  { %v2754_v21 = vmul.f32 0.03125, %v2752_v14  ;;  %v2749_v17 = vpop.xlane.xlu0 %2748  ;;  %v5723_v14 = vld [vmem:[%s9176_s9 + $0xe8] sm:$0xff] }
0x1cfb   :  { %v2753_v22 = vmul.f32 0.03125, %v2749_v17  ;;  %v5724_v17 = vld [vmem:[%s9176_s9 + $0xf0] sm:$0xff] }
0x1cfc   :  { %v2756_v15 = vsub.f32 %v8526_v31, %v2754_v21  ;;  %v7038_v21 = vpack.c.bf16 %v5723_v14, %v5722_v20 }
0x1cfd   :  { %v2755_v19 = vsub.f32 %v8528_v33, %v2753_v22  ;;  %v5725_v22 = vld [vmem:[%s9176_s9 + $0xf8] sm:$0xff] }
0x1cfe   :  { %v2758_v39 = vmul.f32 %v2756_v15, %v2756_v15  ;;  %7039 = vmatprep.subr.bf16.mxu0 %v7038_v21 }
0x1cff   :  { %v2757_v23 = vmul.f32 %v2755_v19, %v2755_v19  ;;  %7041 = vmatpush3.bf16.msra.mxu0 %v7038_v21 }
0x1d00   :  { %v2762_v24 = vsel %vm380_vm1, %v2758_v39, 0.0 }
0x1d01   :  { %v2759_v37 = vsel %vm376_vm0, %v2757_v23, 0.0 }
0x1d02   :  { %2760 = vadd.xlane.f32.xlu0 %v2759_v37 }
0x1d06   :  { %2763 = vadd.xlane.f32.xlu0 %v2762_v24 }
0x1d8f   :  { %v2761_v40 = vpop.xlane.xlu0 %2760 }
0x1d90   :  { %v2765_v41 = vmul.f32 0.03125, %v2761_v40 }
0x1d92   :  { %v2767_v42 = vadd.f32 1e-06, %v2765_v41 }
0x1d93   :  { %v2764_v43 = vpop.xlane.xlu0 %2763 }
0x1d94   :  { %7509 = vrsqrt.f32 %v2767_v42  ;;  %v2766_v44 = vmul.f32 0.03125, %v2764_v43 }
0x1d96   :  { %v2768_v45 = vadd.f32 1e-06, %v2766_v44 }
0x1d98   :  { %7511 = vrsqrt.f32 %v2768_v45 }
0x1d9e   :  { %v7510_v46 = vpop.eup %7509 }
0x1d9f   :  { %v2771_v52 = vmul.f32 %v7510_v46, %v2755_v19  ;;  %v5707_v19 = vld [vmem:[%s9177_s8 + $0x1] ss:$0 sm:$0xff] }
0x1da1   :  { %v2777_v53 = vmul.f32 %v2776_v54, %v2771_v52 }
0x1da2   :  { %v7512_v55 = vpop.eup %7511 }
0x1da3   :  { %v2772_v56 = vmul.f32 %v7512_v55, %v2756_v15  ;;  %v2783_v63 = vadd.f32 %v2782_v28, %v2777_v53  ;;  %v7042_v15 = vpack.c.bf16 %v5725_v22, %v5724_v17 }
0x1da5   :  { %v2778_v61 = vmul.f32 %v2776_v54, %v2772_v56  ;;  %6456 = vmatprep.mubr.msk.f32.mxu1 %vm376_vm0, %v2783_v63  ;;  %7043 = vmatprep.subr.bf16.mxu0 %v7042_v15  ;;  %v2994_v56 = vrot.slane %v8353_v49, %v8320_v10 }
0x1da6   :  { %7045 = vmatpush3.bf16.msra.mxu0 %v7042_v15 }
0x1da7   :  { %v2784_v57 = vadd.f32 %v2782_v28, %v2778_v61 }
0x1da9   :  { %6457 = vmatmul.mubr.msk.f32.vlgmr.msra.gmra.mrb[38].mxu1 %vm376_vm0, %v2784_v57 }
0x1daa   :  { %7049 = vmatpush3.bf16.msra.mxu1 %v7046_v11 }
0x1dab   :  { %7051 = vmatprep.subr.bf16.mxu1 %v7050_v13 }
0x1dae   :  { %7053 = vmatpush3.bf16.msra.mxu1 %v7050_v13 }
0x1e7c   :  { %v6458_v23 = vpop.f32.mrb[38].mxu1 }
0x1e7d   :  { %v2876_v37 = vadd.f32 %v6458_v23, %v5707_v19  ;;  %v2870_v39 = vpop.f32.mrb[39].mxu1 }
0x1e7e   :  { %v2871_v24 = vadd.f32 %v5707_v19, %v2870_v39  ;;  %v8638_v19 = vld [vmem:[%s9171_s10 + $0x10] sm:$0xff] }
0x1e7f   :  { %v2880_v29 = vmul.f32 %v2876_v37, %v2876_v37  ;;  %v3028_v23 = vrot.slane %v8638_v19, %v8041_v16 }
0x1e80   :  { %v2879_v25 = vmul.f32 %v2871_v24, %v2871_v24 }
0x1e81   :  { %v2882_v32 = vmul.f32 %v2880_v29, %v2876_v37 }
0x1e82   :  { %v2881_v36 = vmul.f32 %v2879_v25, %v2871_v24  ;;  %v3034_v25 = vrot.slane %v8638_v19, %v8049_v18 }
0x1e83   :  { %v2884_v0 = vmul.f32 0.044715, %v2882_v32 }
0x1e84   :  { %v2883_v27 = vmul.f32 0.044715, %v2881_v36 }
0x1e85   :  { %v2886_v40 = vadd.f32 %v2884_v0, %v2876_v37 }
0x1e86   :  { %v2885_v41 = vadd.f32 %v2883_v27, %v2871_v24 }
0x1e87   :  { %v2888_v42 = vmul.f32 0.7978846, %v2886_v40  ;;  %v5732_v40 = vld [vmem:[%s9172_s5 + $0x2] ss:$0 sm:$0xff] }
0x1e88   :  { %v2887_v43 = vmul.f32 0.7978846, %v2885_v41 }
0x1e89   :  { %7513 = vtanh.f32 %v2888_v42 }
0x1e8a   :  { %7515 = vtanh.f32 %v2887_v43 }
0x1e93   :  { %v7514_v44 = vpop.eup %7513 }
0x1e94   :  { %v7516_v45 = vpop.eup %7515  ;;  %v2892_v54 = vadd.f32 1.0, %v7514_v44 }
0x1e95   :  { %v2891_v46 = vadd.f32 1.0, %v7516_v45 }
0x1e96   :  { %v2894_v52 = vmul.f32 0.5, %v2892_v54 }
0x1e97   :  { %v2893_v28 = vmul.f32 0.5, %v2891_v46 }
0x1e98   :  { %v2896_v55 = vmul.f32 %v2894_v52, %v2876_v37 }
0x1e99   :  { %v2895_v53 = vmul.f32 %v2893_v28, %v2871_v24 }
0x1e9b   :  { %6491 = vmatprep.mubr.f32.mxu0 %v2895_v53 }
0x1e9c   :  { %6492 = vmatmul.mubr.f32.vlgmr.msra.gmra.mrb[18].mxu0 %v2896_v55 }
0x1f6f   :  { %v6493_v63 = vpop.f32.mrb[18].mxu0 }
0x1f70   :  { %v2990_v61 = vadd.f32 %v6493_v63, %v8526_v31  ;;  %v2980_v57 = vpop.f32.mrb[19].mxu0 }
0x1f71   :  { %v2989_v58 = vadd.f32 %v2980_v57, %v8528_v33 }
0x1f72   :  { %v8611_v34 = vadd.f32 %v2994_v56, %v2990_v61 }
0x1f73   :  { %v8613_v50 = vadd.f32 %v2994_v56, %v2989_v58 }
0x1f74   :  { %v3002_v59 = vsel %vm380_vm1, %v8611_v34, 0.0 }
0x1f75   :  { %3003 = vadd.xlane.f32.xlu1 %v3002_v59  ;;  %v2999_v60 = vsel %vm376_vm0, %v8613_v50, 0.0 }
0x1f76   :  { %3000 = vadd.xlane.f32.xlu0 %v2999_v60 }
0x2002   :  { %v3004_v47 = vpop.xlane.xlu1 %3003 }
0x2003   :  { %v3006_v49 = vmul.f32 0.03125, %v3004_v47  ;;  %v3001_v62 = vpop.xlane.xlu0 %3000 }
0x2004   :  { %v3005_v3 = vmul.f32 0.03125, %v3001_v62 }
0x2005   :  { %v3008_v31 = vsub.f32 %v8611_v34, %v3006_v49 }
0x2006   :  { %v3007_v33 = vsub.f32 %v8613_v50, %v3005_v3 }
0x2007   :  { %v3010_v5 = vmul.f32 %v3008_v31, %v3008_v31 }
0x2008   :  { %v3009_v6 = vmul.f32 %v3007_v33, %v3007_v33 }
0x2009   :  { %v3014_v7 = vsel %vm380_vm1, %v3010_v5, 0.0 }
0x200a   :  { %3015 = vadd.xlane.f32.xlu1 %v3014_v7  ;;  %v3011_v8 = vsel %vm376_vm0, %v3009_v6, 0.0 }
0x200b   :  { %3012 = vadd.xlane.f32.xlu0 %v3011_v8 }
0x2097   :  { %v3016_v20 = vpop.xlane.xlu1 %3015 }
0x2098   :  { %v3018_v14 = vmul.f32 0.03125, %v3016_v20  ;;  %v3013_v21 = vpop.xlane.xlu0 %3012 }
0x2099   :  { %v3017_v17 = vmul.f32 0.03125, %v3013_v21 }
0x209a   :  { %v3020_v22 = vadd.f32 1e-06, %v3018_v14 }
0x209b   :  { %v3019_v15 = vadd.f32 1e-06, %v3017_v17 }
0x209c   :  { %7517 = vrsqrt.f32 %v3020_v22 }
0x209d   :  { %7519 = vrsqrt.f32 %v3019_v15 }
0x20a6   :  { %v7518_v37 = vpop.eup %7517 }
0x20a7   :  { %v7520_v39 = vpop.eup %7519  ;;  %v3024_v24 = vmul.f32 %v7518_v37, %v3008_v31 }
0x20a8   :  { %v3023_v29 = vmul.f32 %v7520_v39, %v3007_v33 }
0x20a9   :  { %v3030_v32 = vmul.f32 %v3028_v23, %v3024_v24 }
0x20aa   :  { %v3029_v36 = vmul.f32 %v3028_v23, %v3023_v29 }
0x20ab   :  { %v3036_v27 = vadd.f32 %v3034_v25, %v3030_v32 }
0x20ac   :  { %v3035_v0 = vadd.f32 %v3034_v25, %v3029_v36 }
0x20ae   :  { %6502 = vmatprep.mubr.msk.f32.mxu1 %vm376_vm0, %v3035_v0 }
0x20af   :  { %6503 = vmatmul.mubr.msk.f32.vlgmr.msra.gmra.mrb[40].mxu1 %vm376_vm0, %v3036_v27 }
0x2182   :  { %v6504_v41 = vpop.f32.mrb[40].mxu1 }
0x2183   :  { %v8649_v42 = vadd.f32 %v6504_v41, %v5732_v40  ;;  %v3122_v43 = vpop.f32.mrb[41].mxu1 }
0x2184   :  { %v8651_v44 = vadd.f32 %v5732_v40, %v3122_v43 }
0x2186   :  { %6509 = vmatprep.mubr.msk.f32.mxu1 %vm515_vm2, %v8651_v44  ;;  %v8657_v45 = vpack.i.bf16 %v8649_v42, %v8651_v44 }
0x2188   :  { %7350 = vrot.lane.b32.xlu0 %v8657_v45, %s7609_s18 }
0x218c   :  { %7360 = vrot.lane.b32.xlu0 %v8657_v45, %s7610_s19 }
0x2190   :  { %3330 = vrot.lane.b32.xlu0 %v8651_v44, %s7611_s20 }
0x2194   :  { %7365 = vrot.lane.b32.xlu0 %v8657_v45, %s7612_s21 }
0x2198   :  { %3531 = vrot.lane.b32.xlu0 %v8651_v44, %s7613_s22 }
0x21fa   :  { %v7351_v54 = vpop.permute.xlu0 %7350 }
0x21fb   :  { %v7353_v46 = vunpack.i.h.bf16 %v7351_v54  ;;  %v7352_v52 = vunpack.i.l.bf16 %v7351_v54 }
0x21fd   :  { %v7054_v28 = vpack.c.bf16 %v7353_v46, %v7352_v52 }
0x21fe   :  { %v7361_v53 = vpop.permute.xlu0 %7360 }
0x21ff   :  { %7056 = vmatprep.subr.msk.bf16.mxu1 %vm8082_vm3, %v7054_v28  ;;  %v7363_v51 = vunpack.i.h.bf16 %v7361_v53  ;;  %v7362_v11 = vunpack.i.l.bf16 %v7361_v53 }
0x2200   :  { %7059 = vmatpush3.bf16.xpose.msk.msra.mxu1 %vm8082_vm3, %v7054_v28 }
0x2201   :  { %v7066_v20 = vpack.c.bf16 %v7363_v51, %v7362_v11 }
0x2202   :  { %v3331_v55 = vpop.permute.xlu0 %3330 }
0x2206   :  { %v7366_v56 = vpop.permute.xlu0 %7365 }
0x2207   :  { %v7368_v63 = vunpack.i.h.bf16 %v7366_v56  ;;  %v7367_v61 = vunpack.i.l.bf16 %v7366_v56  ;;  %6510 = vmatmul.mubr.msk.f32.vlgmr.msra.gmra.mrb[42].mxu1 %vm515_vm2, %v8649_v42 }
0x2209   :  { %v7078_v57 = vpack.c.bf16 %v7368_v63, %v7367_v61 }
0x220a   :  { %v3532_v58 = vpop.permute.xlu0 %3531 }
0x220b   :  { %7080 = vmatprep.subr.msk.bf16.mxu0 %vm8082_vm3, %v7078_v57  ;;  %6537 = vmatprep.mubr.msk.f32.mxu0 %vm515_vm2, %v3532_v58 }
0x220c   :  { %7083 = vmatpush3.bf16.xpose.msk.msra.mxu0 %vm8082_vm3, %v7078_v57 }
0x22da   :  { %v6511_v59 = vpop.f32.mrb[42].mxu1 }
0x22db   :  { %v3211_v60 = vpop.f32.mrb[43].mxu1  ;;  %v3217_v49 = vadd.f32 %v8445_v30, %v6511_v59 }
0x22dc   :  { %v3212_v47 = vadd.f32 %v8451_v35, %v3211_v60 }
0x22dd   :  { %v3223_v3 = vsel %vm603_vm5, %v3217_v49, -inf }
0x22de   :  { %v3220_v62 = vsel %vm599_vm4, %v3212_v47, -inf }
0x22df   :  { %3221 = vmax.xlane.f32.xlu1 %v3220_v62 }
0x22e3   :  { %3224 = vmax.xlane.f32.xlu1 %v3223_v3 }
0x22f4   :  { %7355 = vrot.lane.b32.xlu1 %v8657_v45, %s7614_s26 }
0x236c   :  { %v3222_v31 = vpop.xlane.xlu1 %3221 }
0x236d   :  { %v3226_v33 = vsub.f32 %v3212_v47, %v3222_v31 }
0x236f   :  { %v3228_v7 = vmul.f32 1.442695, %v3226_v33 }
0x2370   :  { %v3225_v5 = vpop.xlane.xlu1 %3224 }
0x2371   :  { %v3227_v6 = vsub.f32 %v3217_v49, %v3225_v5 }
0x2373   :  { %v3230_v8 = vmul.f32 1.442695, %v3227_v6 }
0x2374   :  { %v7356_v9 = vpop.permute.xlu1 %7355 }
0x2375   :  { %7521 = vpow2.f32 %v3230_v8  ;;  %v7358_v48 = vunpack.i.h.bf16 %v7356_v9  ;;  %v7357_v12 = vunpack.i.l.bf16 %v7356_v9 }
0x2376   :  { %7523 = vpow2.f32 %v3228_v7 }
0x2377   :  { %v7060_v13 = vpack.c.bf16 %v7358_v48, %v7357_v12 }
0x2379   :  { %7062 = vmatprep.subr.msk.bf16.mxu1 %vm8115_vm8, %v7060_v13 }
0x237a   :  { %7065 = vmatpush3.bf16.msk.msra.mxu1 %vm8115_vm8, %v7060_v13 }
0x237b   :  { %7068 = vmatprep.subr.msk.bf16.mxu1 %vm8082_vm3, %v7066_v20 }
0x237f   :  { %v7522_v14 = vpop.eup %7521 }
0x2380   :  { %v3235_v21 = vsel %vm603_vm5, %v7522_v14, 0.0  ;;  %v7524_v17 = vpop.eup %7523 }
0x2381   :  { %3236 = vadd.xlane.f32.xlu1 %v3235_v21  ;;  %v3232_v22 = vsel %vm599_vm4, %v7524_v17, 0.0 }
0x2385   :  { %3233 = vadd.xlane.f32.xlu1 %v3232_v22 }
0x2396   :  { %3332 = vrot.lane.b32.xlu1 %v8649_v42, %s7611_s20 }
0x239a   :  { %3533 = vrot.lane.b32.xlu1 %v8649_v42, %s7613_s22 }
0x240e   :  { %v3237_v15 = vpop.xlane.xlu1 %3236 }
0x240f   :  { %7525 = vrcp.f32 %v3237_v15 }
0x2412   :  { %v3234_v23 = vpop.xlane.xlu1 %3233 }
0x2413   :  { %7527 = vrcp.f32 %v3234_v23 }
0x2416   :  { %v3333_v37 = vpop.permute.xlu1 %3332 }
0x2419   :  { %v7526_v24 = vpop.eup %7525 }
0x241a   :  { %v3534_v39 = vpop.permute.xlu1 %3533  ;;  %v3241_v32 = vmul.f32 %v7526_v24, %v7522_v14 }
0x241b   :  { %6538 = vmatmul.mubr.msk.f32.vlgmr.msra.gmra.mrb[20].mxu0 %vm515_vm2, %v3534_v39 }
0x241d   :  { %v7528_v29 = vpop.eup %7527 }
0x241e   :  { %v3240_v25 = vmul.f32 %v7528_v29, %v7524_v17 }
0x2420   :  { %6516 = vmatprep.mubr.msk.f32.mxu1 %vm599_vm4, %v3240_v25 }
0x2421   :  { %6517 = vmatmul.mubr.msk.f32.vlgmr.msra.gmra.mrb[44].mxu1 %vm599_vm4, %v3241_v32 }
0x2422   :  { %7071 = vmatpush3.bf16.xpose.msk.msra.mxu1 %vm8082_vm3, %v7066_v20  ;;  %6523 = vmatprep.mubr.msk.f32.mxu1 %vm515_vm2, %v3331_v55 }
0x2429   :  { %6524 = vmatmul.mubr.msk.f32.vlgmr.msra.gmra.mrb[46].mxu1 %vm515_vm2, %v3333_v37 }
0x24ee   :  { %v6539_v36 = vpop.f32.mrb[20].mxu0 }
0x24ef   :  { %v3613_v0 = vpop.f32.mrb[21].mxu0  ;;  %v3619_v55 = vadd.f32 %v8445_v30, %v6539_v36 }
0x24f0   :  { %v3614_v28 = vadd.f32 %v8451_v35, %v3613_v0 }
0x24f1   :  { %v3625_v63 = vsel %vm603_vm5, %v3619_v55, -inf }
0x24f2   :  { %v3622_v56 = vsel %vm599_vm4, %v3614_v28, -inf }
0x24f4   :  { %v8705_v27 = vpop.f32.mrb[44].mxu1 }
0x24f5   :  { %v8707_v40 = vpop.f32.mrb[45].mxu1 }
0x24fc   :  { %v6525_v41 = vpop.f32.mrb[46].mxu1 }
0x24fd   :  { %v3418_v43 = vadd.f32 %v8445_v30, %v6525_v41  ;;  %v3412_v54 = vpop.f32.mrb[47].mxu1 }
0x24fe   :  { %v3413_v46 = vadd.f32 %v8451_v35, %v3412_v54 }
0x24ff   :  { %v3424_v52 = vsel %vm603_vm5, %v3418_v43, -inf }
0x2500   :  { %3425 = vmax.xlane.f32.xlu1 %v3424_v52  ;;  %v3421_v53 = vsel %vm599_vm4, %v3413_v46, -inf }
0x2501   :  { %3422 = vmax.xlane.f32.xlu0 %v3421_v53 }
0x2505   :  { %3623 = vmax.xlane.f32.xlu0 %v3622_v56 }
0x2509   :  { %3626 = vmax.xlane.f32.xlu0 %v3625_v63 }
0x258d   :  { %v3426_v58 = vpop.xlane.xlu1 %3425 }
0x258e   :  { %v3423_v61 = vpop.xlane.xlu0 %3422  ;;  %v3428_v47 = vsub.f32 %v3418_v43, %v3426_v58 }
0x258f   :  { %v3427_v57 = vsub.f32 %v3413_v46, %v3423_v61 }
0x2590   :  { %v3431_v33 = vmul.f32 1.442695, %v3428_v47 }
0x2591   :  { %v3429_v49 = vmul.f32 1.442695, %v3427_v57 }
0x2592   :  { %v3624_v59 = vpop.xlane.xlu0 %3623 }
0x2593   :  { %v3628_v60 = vsub.f32 %v3614_v28, %v3624_v59 }
0x2595   :  { %v3630_v62 = vmul.f32 1.442695, %v3628_v60 }
0x2596   :  { %v3627_v3 = vpop.xlane.xlu0 %3626 }
0x2597   :  { %7529 = vpow2.f32 %v3630_v62  ;;  %v3629_v31 = vsub.f32 %v3619_v55, %v3627_v3 }
0x2598   :  { %7531 = vpow2.f32 %v3429_v49 }
0x2599   :  { %v3632_v5 = vmul.f32 1.442695, %v3629_v31 }
0x259b   :  { %7533 = vpow2.f32 %v3632_v5 }
0x259c   :  { %7535 = vpow2.f32 %v3431_v33 }
0x25a1   :  { %v7530_v6 = vpop.eup %7529 }
0x25a2   :  { %v3634_v7 = vsel %vm599_vm4, %v7530_v6, 0.0  ;;  %v7532_v8 = vpop.eup %7531 }
0x25a3   :  { %3635 = vadd.xlane.f32.xlu0 %v3634_v7  ;;  %v3433_v9 = vsel %vm599_vm4, %v7532_v8, 0.0 }
0x25a5   :  { %v7534_v51 = vpop.eup %7533 }
0x25a6   :  { %v3637_v11 = vsel %vm603_vm5, %v7534_v51, 0.0  ;;  %v7536_v48 = vpop.eup %7535 }
0x25a7   :  { %3434 = vadd.xlane.f32.xlu0 %v3433_v9  ;;  %3638 = vadd.xlane.f32.xlu1 %v3637_v11  ;;  %v3436_v12 = vsel %vm603_vm5, %v7536_v48, 0.0 }
0x25ab   :  { %3437 = vadd.xlane.f32.xlu1 %v3436_v12 }
0x25bc   :  { %7375 = vrot.lane.b32.xlu1 %v8657_v45, %s7616_s0 }
0x25bd   :  { %7370 = vrot.lane.b32.xlu0 %v8657_v45, %s7617_s3 }
0x25c0   :  { %7380 = vrot.lane.b32.xlu1 %v8657_v45, %s9189_s27 }
0x25c1   :  { %3734 = vrot.lane.b32.xlu0 %v8649_v42, %s9187_s28 }
0x25c4   :  { %3732 = vrot.lane.b32.xlu1 %v8651_v44, %s9187_s28 }
0x2630   :  { %v3636_v13 = vpop.xlane.xlu0 %3635 }
0x2634   :  { %v3639_v20 = vpop.xlane.xlu1 %3638  ;;  %v3435_v14 = vpop.xlane.xlu0 %3434 }
0x2635   :  { %7537 = vrcp.f32 %v3435_v14 }
0x2636   :  { %7539 = vrcp.f32 %v3636_v13 }
0x2638   :  { %v3438_v21 = vpop.xlane.xlu1 %3437  ;;  %v7371_v17 = vpop.permute.xlu0 %7370 }
0x2639   :  { %7541 = vrcp.f32 %v3438_v21  ;;  %v7373_v22 = vunpack.i.h.bf16 %v7371_v17  ;;  %v7372_v15 = vunpack.i.l.bf16 %v7371_v17 }
0x263a   :  { %7543 = vrcp.f32 %v3639_v20 }
0x263b   :  { %v7072_v23 = vpack.c.bf16 %v7373_v22, %v7372_v15  ;;  %v5763_v22 = vld [vmem:[%s9174_s6 + $0x40] sm:$0xff]  ;;  %v5764_v15 = vld [vmem:[%s9174_s6 + $0x48] sm:$0xff] }
0x263c   :  { %v7376_v37 = vpop.permute.xlu1 %7375  ;;  %v3735_v55 = vpop.permute.xlu0 %3734 }
0x263d   :  { %v7378_v39 = vunpack.i.h.bf16 %v7376_v37  ;;  %v7377_v24 = vunpack.i.l.bf16 %v7376_v37  ;;  %7074 = vmatprep.subr.msk.bf16.mxu1 %vm8115_vm8, %v7072_v23  ;;  %v7102_v37 = vpack.c.bf16 %v5764_v15, %v5763_v22 }
0x263e   :  { %7077 = vmatpush3.bf16.msk.msra.mxu1 %vm8115_vm8, %v7072_v23  ;;  %v5765_v23 = vld [vmem:[%s9174_s6 + $0x50] sm:$0xff] }
0x263f   :  { %v7084_v42 = vpack.c.bf16 %v7378_v39, %v7377_v24  ;;  %v7538_v44 = vpop.eup %7537  ;;  %v5766_v39 = vld [vmem:[%s9174_s6 + $0x58] sm:$0xff] }
0x2640   :  { %v7381_v29 = vpop.permute.xlu1 %7380  ;;  %v3441_v25 = vmul.f32 %v7538_v44, %v7532_v8  ;;  %v7540_v32 = vpop.eup %7539  ;;  %v7106_v24 = vpack.c.bf16 %v5766_v39, %v5765_v23 }
0x2641   :  { %7086 = vmatprep.subr.msk.bf16.mxu1 %vm8115_vm8, %v7084_v42  ;;  %v7383_v36 = vunpack.i.h.bf16 %v7381_v29  ;;  %v7382_v0 = vunpack.i.l.bf16 %v7381_v29  ;;  %v3642_v46 = vmul.f32 %v7540_v32, %v7530_v6 }
0x2642   :  { %6530 = vmatprep.mubr.msk.f32.mxu1 %vm599_vm4, %v3441_v25 }
0x2643   :  { %v7542_v41 = vpop.eup %7541  ;;  %v7090_v52 = vpack.c.bf16 %v7383_v36, %v7382_v0 }
0x2644   :  { %v3442_v43 = vmul.f32 %v7542_v41, %v7536_v48  ;;  %v7544_v54 = vpop.eup %7543  ;;  %v3733_v53 = vpop.permute.xlu1 %3732 }
0x2645   :  { %v3643_v28 = vmul.f32 %v7544_v54, %v7534_v51 }
0x2646   :  { %6531 = vmatmul.mubr.msk.f32.vlgmr.msra.gmra.mrb[48].mxu1 %vm599_vm4, %v3442_v43 }
0x2647   :  { %7089 = vmatpush3.bf16.msk.msra.mxu1 %vm8115_vm8, %v7084_v42  ;;  %6544 = vmatprep.mubr.msk.f32.mxu1 %vm599_vm4, %v3642_v46 }
0x2648   :  { %7092 = vmatprep.subr.msk.bf16.mxu1 %vm8082_vm3, %v7090_v52 }
0x264a   :  { %6545 = vmatmul.mubr.msk.f32.vlgmr.msra.gmra.mrb[50].mxu1 %vm599_vm4, %v3643_v28 }
0x264b   :  { %6551 = vmatprep.mubr.msk.f32.mxu1 %vm515_vm2, %v3733_v53 }
0x2650   :  { %7095 = vmatpush3.bf16.xpose.msk.msra.mxu1 %vm8082_vm3, %v7090_v52 }
0x2657   :  { %6552 = vmatmul.mubr.msk.f32.vlgmr.msra.gmra.mrb[52].mxu1 %vm515_vm2, %v3735_v55 }
0x2719   :  { %v6532_v56 = vpop.f32.mrb[48].mxu1 }
0x271a   :  { %v3522_v63 = vpop.f32.mrb[49].mxu1 }
0x271d   :  { %v6546_v61 = vpop.f32.mrb[50].mxu1 }
0x271e   :  { %v3723_v57 = vpop.f32.mrb[51].mxu1 }
0x272a   :  { %v6553_v58 = vpop.f32.mrb[52].mxu1 }
0x272b   :  { %v3820_v59 = vadd.f32 %v8445_v30, %v6553_v58  ;;  %v3814_v60 = vpop.f32.mrb[53].mxu1 }
0x272c   :  { %v3815_v47 = vadd.f32 %v8451_v35, %v3814_v60 }
0x272d   :  { %v3826_v49 = vsel %vm603_vm5, %v3820_v59, -inf }
0x272e   :  { %3827 = vmax.xlane.f32.xlu0 %v3826_v49  ;;  %v3823_v62 = vsel %vm599_vm4, %v3815_v47, -inf }
0x272f   :  { %3824 = vmax.xlane.f32.xlu1 %v3823_v62 }
0x2740   :  { %7385 = vrot.lane.b32.xlu1 %v8657_v45, %s9196_s16 }
0x2744   :  { %3937 = vrot.lane.b32.xlu1 %v6532_v56, %s9197_s17 }
0x2748   :  { %3943 = vrot.lane.b32.xlu1 %v3723_v57, %s9194_s15 }
0x274c   :  { %3945 = vrot.lane.b32.xlu1 %v6546_v61, %s9194_s15 }
0x27bb   :  { %v3828_v3 = vpop.xlane.xlu0 %3827 }
0x27bc   :  { %v3830_v30 = vsub.f32 %v3820_v59, %v3828_v3  ;;  %v3825_v31 = vpop.xlane.xlu1 %3824 }
0x27bd   :  { %v3829_v33 = vsub.f32 %v3815_v47, %v3825_v31 }
0x27be   :  { %v3833_v35 = vmul.f32 1.442695, %v3830_v30 }
0x27bf   :  { %v3831_v5 = vmul.f32 1.442695, %v3829_v33 }
0x27c0   :  { %v7386_v6 = vpop.permute.xlu1 %7385 }
0x27c1   :  { %7545 = vpow2.f32 %v3831_v5  ;;  %v7388_v7 = vunpack.i.h.bf16 %v7386_v6  ;;  %v7387_v8 = vunpack.i.l.bf16 %v7386_v6  ;;  %v5770_v5 = vld [vmem:[%s9175_s7 + $0x48] sm:$0xff] }
0x27c2   :  { %7547 = vpow2.f32 %v3833_v35  ;;  %v5769_v35 = vld [vmem:[%s9175_s7 + $0x40] sm:$0xff] }
0x27c3   :  { %v7096_v51 = vpack.c.bf16 %v7388_v7, %v7387_v8  ;;  %v7110_v6 = vpack.c.bf16 %v5770_v5, %v5769_v35  ;;  %v5771_v7 = vld [vmem:[%s9175_s7 + $0x50] sm:$0xff]  ;;  %v5772_v8 = vld [vmem:[%s9175_s7 + $0x58] sm:$0xff] }
0x27c4   :  { %v3938_v29 = vpop.permute.xlu1 %3937 }
0x27c5   :  { %7098 = vmatprep.subr.msk.bf16.mxu0 %vm8115_vm8, %v7096_v51  ;;  %v3958_v43 = vsel %vm515_vm2, %v8705_v27, %v3938_v29  ;;  %7111 = vmatprep.subr.bf16.mxu1 %v7110_v6 }
0x27c6   :  { %7101 = vmatpush3.bf16.msk.msra.mxu0 %vm8115_vm8, %v7096_v51  ;;  %7113 = vmatpush3.bf16.msra.mxu1 %v7110_v6  ;;  %v7114_v51 = vpack.c.bf16 %v5772_v8, %v5771_v7 }
0x27c7   :  { %7103 = vmatprep.subr.bf16.mxu0 %v7102_v37 }
0x27c8   :  { %v3944_v25 = vpop.permute.xlu1 %3943  ;;  %7115 = vmatprep.subr.bf16.mxu1 %v7114_v51 }
0x27ca   :  { %7117 = vmatpush3.bf16.msra.mxu1 %v7114_v51 }
0x27cb   :  { %v7546_v45 = vpop.eup %7545 }
0x27cc   :  { %v3835_v9 = vsel %vm599_vm4, %v7546_v45, 0.0  ;;  %v7548_v11 = vpop.eup %7547  ;;  %v3946_v36 = vpop.permute.xlu1 %3945 }
0x27cd   :  { %3836 = vadd.xlane.f32.xlu0 %v3835_v9  ;;  %v3838_v48 = vsel %vm603_vm5, %v7548_v11, 0.0  ;;  %v3960_v52 = vsel %vm1341_vm9, %v3958_v43, %v3946_v36 }
0x27d1   :  { %3839 = vadd.xlane.f32.xlu0 %v3838_v48 }
0x27e7   :  { %3935 = vrot.lane.b32.xlu0 %v3522_v63, %s9197_s17 }
0x285a   :  { %v3837_v12 = vpop.xlane.xlu0 %3836 }
0x285b   :  { %7549 = vrcp.f32 %v3837_v12 }
0x285e   :  { %v3840_v13 = vpop.xlane.xlu0 %3839 }
0x285f   :  { %7551 = vrcp.f32 %v3840_v13 }
0x2862   :  { %v3936_v32 = vpop.permute.xlu0 %3935 }
0x2863   :  { %v3957_v0 = vsel %vm515_vm2, %v8707_v40, %v3936_v32  ;;  %v4054_v40 = vrot.slane %v8638_v19, %v8226_v26  ;;  %v5780_v32 = vld [vmem:[%s9176_s9 + $0x118] sm:$0xff] }
0x2864   :  { %v3959_v54 = vsel %vm1341_vm9, %v3957_v0, %v3944_v25  ;;  %v5779_v25 = vld [vmem:[%s9176_s9 + $0x110] sm:$0xff]  ;;  %v5781_v0 = vld [vmem:[%s9176_s9 + $0x120] sm:$0xff] }
0x2865   :  { %v7550_v20 = vpop.eup %7549  ;;  %v7122_v36 = vpack.c.bf16 %v5780_v32, %v5779_v25 }
0x2866   :  { %v3843_v14 = vmul.f32 %v7550_v20, %v7546_v45  ;;  %v4086_v20 = vrot.slane %v8638_v19, %v8257_v1 }
0x2868   :  { %6558 = vmatprep.mubr.msk.f32.mxu0 %vm599_vm4, %v3843_v14 }
0x2869   :  { %v7552_v21 = vpop.eup %7551 }
0x286a   :  { %v3844_v17 = vmul.f32 %v7552_v21, %v7548_v11 }
0x286c   :  { %6559 = vmatmul.mubr.msk.f32.vlgmr.msra.gmra.mrb[22].mxu0 %vm599_vm4, %v3844_v17  ;;  %v4092_v17 = vrot.slane %v8638_v19, %v8260_v2 }
0x286d   :  { %7105 = vmatpush3.bf16.msra.mxu0 %v7102_v37 }
0x286e   :  { %7107 = vmatprep.subr.bf16.mxu0 %v7106_v24 }
0x2871   :  { %7109 = vmatpush3.bf16.msra.mxu0 %v7106_v24 }
0x293f   :  { %v6560_v42 = vpop.f32.mrb[22].mxu0 }
0x2940   :  { %3953 = vrot.lane.b32.xlu1 %v6560_v42, %s9195_s25  ;;  %v3924_v44 = vpop.f32.mrb[23].mxu0  ;;  %v5777_v42 = vld [vmem:[%s9176_s9 + $0x100] sm:$0xff] }
0x2941   :  { %3951 = vrot.lane.b32.xlu0 %v3924_v44, %s9195_s25  ;;  %v5778_v44 = vld [vmem:[%s9176_s9 + $0x108] sm:$0xff] }
0x2942   :  { %v7118_v29 = vpack.c.bf16 %v5778_v44, %v5777_v42 }
0x2944   :  { %7119 = vmatprep.subr.bf16.mxu0 %v7118_v29 }
0x29b2   :  { %v3954_v41 = vpop.permute.xlu1 %3953 }
0x29b3   :  { %v3952_v46 = vpop.permute.xlu0 %3951  ;;  %v3962_v53 = vsel %vm1344_vm10, %v3960_v52, %v3954_v41  ;;  %v5782_v41 = vld [vmem:[%s9176_s9 + $0x128] sm:$0xff] }
0x29b4   :  { %v3961_v28 = vsel %vm1344_vm10, %v3959_v54, %v3952_v46  ;;  %v7126_v43 = vpack.c.bf16 %v5782_v41, %v5781_v0  ;;  %v5783_v54 = vld [vmem:[%s9176_s9 + $0x130] sm:$0xff]  ;;  %v5784_v46 = vld [vmem:[%s9176_s9 + $0x138] sm:$0xff] }
0x29b5   :  { %6569 = vmatprep.mubr.msk.f32.mxu0 %vm376_vm0, %v3961_v28  ;;  %v7130_v52 = vpack.c.bf16 %v5784_v46, %v5783_v54  ;;  %v5785_v28 = vld [vmem:[%s9176_s9 + $0x140] sm:$0xff] }
0x29b6   :  { %6570 = vmatmul.mubr.msk.f32.vlgmr.msra.gmra.mrb[24].mxu0 %vm376_vm0, %v3962_v53  ;;  %v5786_v53 = vld [vmem:[%s9176_s9 + $0x148] sm:$0xff]  ;;  %v5794_v46 = vld [vmem:[%s9170_s4 + $0x60] sm:$0xff] }
0x29b7   :  { %7121 = vmatpush3.bf16.msra.mxu0 %v7118_v29 }
0x29b8   :  { %7123 = vmatprep.subr.bf16.mxu0 %v7122_v36 }
0x29bb   :  { %7125 = vmatpush3.bf16.msra.mxu0 %v7122_v36 }
0x29bc   :  { %7127 = vmatprep.subr.bf16.mxu0 %v7126_v43 }
0x29bf   :  { %7129 = vmatpush3.bf16.msra.mxu0 %v7126_v43 }
0x29c0   :  { %7131 = vmatprep.subr.bf16.mxu0 %v7130_v52 }
0x29c3   :  { %7133 = vmatpush3.bf16.msra.mxu0 %v7130_v52  ;;  %v5795_v52 = vld [vmem:[%s9170_s4 + $0x68] sm:$0xff] }
0x2a89   :  { %v6571_v55 = vpop.f32.mrb[24].mxu0 }
0x2a8a   :  { %v4050_v56 = vadd.f32 %v6571_v55, %v8611_v34  ;;  %v4040_v27 = vpop.f32.mrb[25].mxu0  ;;  %v7134_v55 = vpack.c.bf16 %v5786_v53, %v5785_v28  ;;  %v7150_v28 = vpack.c.bf16 %v5795_v52, %v5794_v46  ;;  %v5796_v53 = vld [vmem:[%s9170_s4 + $0x70] sm:$0xff] }
0x2a8b   :  { %v4049_v63 = vadd.f32 %v4040_v27, %v8613_v50 }
0x2a8c   :  { %v8795_v61 = vadd.f32 %v4054_v40, %v4050_v56  ;;  %v5788_v56 = vld [vmem:[%s9176_s9 + $0x158] sm:$0xff]  ;;  %7135 = vmatprep.subr.bf16.mxu0 %v7134_v55  ;;  %7151 = vmatprep.subr.bf16.mxu1 %v7150_v28 }
0x2a8d   :  { %v8797_v57 = vadd.f32 %v4054_v40, %v4049_v63  ;;  %v5787_v40 = vld [vmem:[%s9176_s9 + $0x150] sm:$0xff]  ;;  %v5789_v63 = vld [vmem:[%s9176_s9 + $0x160] sm:$0xff]  ;;  %7137 = vmatpush3.bf16.msra.mxu0 %v7134_v55 }
0x2a8e   :  { %v4060_v58 = vsel %vm380_vm1, %v8795_v61, 0.0  ;;  %v7138_v27 = vpack.c.bf16 %v5788_v56, %v5787_v40  ;;  %v5797_v40 = vld [vmem:[%s9170_s4 + $0x78] sm:$0xff] }
0x2a8f   :  { %4061 = vadd.xlane.f32.xlu1 %v4060_v58  ;;  %v4057_v59 = vsel %vm376_vm0, %v8797_v57, 0.0  ;;  %v5790_v58 = vld [vmem:[%s9176_s9 + $0x168] sm:$0xff]  ;;  %v7154_v55 = vpack.c.bf16 %v5797_v40, %v5796_v53 }
0x2a90   :  { %4058 = vadd.xlane.f32.xlu0 %v4057_v59  ;;  %7139 = vmatprep.subr.bf16.mxu0 %v7138_v27  ;;  %v7142_v59 = vpack.c.bf16 %v5790_v58, %v5789_v63 }
0x2a91   :  { %7141 = vmatpush3.bf16.msra.mxu0 %v7138_v27 }
0x2a92   :  { %7143 = vmatprep.subr.bf16.mxu0 %v7142_v59 }
0x2a95   :  { %7145 = vmatpush3.bf16.msra.mxu0 %v7142_v59 }
0x2b1c   :  { %v4062_v60 = vpop.xlane.xlu1 %4061 }
0x2b1d   :  { %v4064_v47 = vmul.f32 0.03125, %v4062_v60  ;;  %v4059_v49 = vpop.xlane.xlu0 %4058  ;;  %v5791_v60 = vld [vmem:[%s9176_s9 + $0x170] sm:$0xff] }
0x2b1e   :  { %v4063_v62 = vmul.f32 0.03125, %v4059_v49 }
0x2b1f   :  { %v4066_v34 = vsub.f32 %v8795_v61, %v4064_v47  ;;  %v5792_v47 = vld [vmem:[%s9176_s9 + $0x178] sm:$0xff] }
0x2b20   :  { %v4065_v50 = vsub.f32 %v8797_v57, %v4063_v62  ;;  %v7146_v49 = vpack.c.bf16 %v5792_v47, %v5791_v60  ;;  %v5774_v62 = vld [vmem:[%s9177_s8 + $0x2] ss:$0 sm:$0xff]  ;;  %v8907_v47 = vld [vmem:[%s9171_s10 + $0x18] sm:$0xff] }
0x2b21   :  { %v4068_v31 = vmul.f32 %v4066_v34, %v4066_v34 }
0x2b22   :  { %v4067_v3 = vmul.f32 %v4065_v50, %v4065_v50  ;;  %7147 = vmatprep.subr.bf16.mxu0 %v7146_v49 }
0x2b23   :  { %v4072_v33 = vsel %vm380_vm1, %v4068_v31, 0.0  ;;  %7149 = vmatpush3.bf16.msra.mxu0 %v7146_v49  ;;  %v4338_v49 = vrot.slane %v8907_v47, %v8041_v16 }
0x2b24   :  { %v4069_v30 = vsel %vm376_vm0, %v4067_v3, 0.0 }
0x2b25   :  { %4070 = vadd.xlane.f32.xlu0 %v4069_v30 }
0x2b29   :  { %4073 = vadd.xlane.f32.xlu0 %v4072_v33 }
0x2bb2   :  { %v4071_v45 = vpop.xlane.xlu0 %4070 }
0x2bb3   :  { %v4075_v9 = vmul.f32 0.03125, %v4071_v45 }
0x2bb5   :  { %v4077_v11 = vadd.f32 1e-06, %v4075_v9 }
0x2bb6   :  { %v4074_v48 = vpop.xlane.xlu0 %4073 }
0x2bb7   :  { %7553 = vrsqrt.f32 %v4077_v11  ;;  %v4076_v12 = vmul.f32 0.03125, %v4074_v48 }
0x2bb9   :  { %v4078_v13 = vadd.f32 1e-06, %v4076_v12 }
0x2bbb   :  { %7555 = vrsqrt.f32 %v4078_v13 }
0x2bc1   :  { %v7554_v14 = vpop.eup %7553 }
0x2bc2   :  { %v4081_v21 = vmul.f32 %v7554_v14, %v4065_v50 }
0x2bc4   :  { %v4087_v22 = vmul.f32 %v4086_v20, %v4081_v21 }
0x2bc5   :  { %v7556_v15 = vpop.eup %7555 }
0x2bc6   :  { %v4082_v23 = vmul.f32 %v7556_v15, %v4066_v34  ;;  %v4093_v37 = vadd.f32 %v4092_v17, %v4087_v22  ;;  %v4304_v22 = vrot.slane %v8638_v19, %v8320_v10 }
0x2bc8   :  { %v4088_v39 = vmul.f32 %v4086_v20, %v4082_v23  ;;  %6580 = vmatprep.mubr.msk.f32.mxu1 %vm376_vm0, %v4093_v37 }
0x2bca   :  { %v4094_v24 = vadd.f32 %v4092_v17, %v4088_v39 }
0x2bcc   :  { %6581 = vmatmul.mubr.msk.f32.vlgmr.msra.gmra.mrb[54].mxu1 %vm376_vm0, %v4094_v24 }
0x2bcd   :  { %7153 = vmatpush3.bf16.msra.mxu1 %v7150_v28 }
0x2bce   :  { %7155 = vmatprep.subr.bf16.mxu1 %v7154_v55 }
0x2bd1   :  { %7157 = vmatpush3.bf16.msra.mxu1 %v7154_v55 }
0x2c9f   :  { %v6582_v34 = vpop.f32.mrb[54].mxu1 }
0x2ca0   :  { %v4186_v50 = vadd.f32 %v6582_v34, %v5774_v62  ;;  %v4180_v3 = vpop.f32.mrb[55].mxu1 }
0x2ca1   :  { %v4181_v30 = vadd.f32 %v5774_v62, %v4180_v3 }
0x2ca2   :  { %v4190_v31 = vmul.f32 %v4186_v50, %v4186_v50 }
0x2ca3   :  { %v4189_v33 = vmul.f32 %v4181_v30, %v4181_v30 }
0x2ca4   :  { %v4192_v35 = vmul.f32 %v4190_v31, %v4186_v50 }
0x2ca5   :  { %v4191_v5 = vmul.f32 %v4189_v33, %v4181_v30 }
0x2ca6   :  { %v4194_v6 = vmul.f32 0.044715, %v4192_v35 }
0x2ca7   :  { %v4193_v7 = vmul.f32 0.044715, %v4191_v5 }
0x2ca8   :  { %v4196_v8 = vadd.f32 %v4194_v6, %v4186_v50  ;;  %v5799_v6 = vld [vmem:[%s9172_s5 + $0x3] ss:$0 sm:$0xff] }
0x2ca9   :  { %v4195_v51 = vadd.f32 %v4193_v7, %v4181_v30 }
0x2caa   :  { %v4198_v45 = vmul.f32 0.7978846, %v4196_v8 }
0x2cab   :  { %v4197_v9 = vmul.f32 0.7978846, %v4195_v51 }
0x2cac   :  { %7557 = vtanh.f32 %v4198_v45 }
0x2cad   :  { %7559 = vtanh.f32 %v4197_v9 }
0x2cb6   :  { %v7558_v11 = vpop.eup %7557 }
0x2cb7   :  { %v7560_v48 = vpop.eup %7559  ;;  %v4202_v12 = vadd.f32 1.0, %v7558_v11 }
0x2cb8   :  { %v4201_v13 = vadd.f32 1.0, %v7560_v48 }
0x2cb9   :  { %v4204_v20 = vmul.f32 0.5, %v4202_v12 }
0x2cba   :  { %v4203_v14 = vmul.f32 0.5, %v4201_v13 }
0x2cbb   :  { %v4206_v17 = vmul.f32 %v4204_v20, %v4186_v50 }
0x2cbc   :  { %v4205_v21 = vmul.f32 %v4203_v14, %v4181_v30  ;;  %v4344_v30 = vrot.slane %v8907_v47, %v8049_v18 }
0x2cbe   :  { %6615 = vmatprep.mubr.f32.mxu0 %v4205_v21 }
0x2cbf   :  { %6616 = vmatmul.mubr.f32.vlgmr.msra.gmra.mrb[26].mxu0 %v4206_v17 }
0x2d92   :  { %v6617_v15 = vpop.f32.mrb[26].mxu0 }
0x2d93   :  { %v4300_v23 = vadd.f32 %v6617_v15, %v8795_v61  ;;  %v4290_v37 = vpop.f32.mrb[27].mxu0 }
0x2d94   :  { %v4299_v39 = vadd.f32 %v4290_v37, %v8797_v57  ;;  %v8952_v37 = vld [vmem:[%s9173_s1] sm:$0xff] }
0x2d95   :  { %v8880_v24 = vadd.f32 %v4304_v22, %v4300_v23 }
0x2d96   :  { %v8882_v42 = vadd.f32 %v4304_v22, %v4299_v39 }
0x2d97   :  { %v4312_v44 = vsel %vm380_vm1, %v8880_v24, 0.0 }
0x2d98   :  { %4313 = vadd.xlane.f32.xlu1 %v4312_v44  ;;  %v4309_v29 = vsel %vm376_vm0, %v8882_v42, 0.0  ;;  %v8958_v44 = vld [vmem:[%s9173_s1 + $0x8] sm:$0x3]  ;;  %s9198_s1 = smov 72  }
0x2d99   :  { %4310 = vadd.xlane.f32.xlu0 %v4309_v29 }
0x2e25   :  { %v4314_v25 = vpop.xlane.xlu1 %4313 }
0x2e26   :  { %v4316_v19 = vmul.f32 0.03125, %v4314_v25  ;;  %v4311_v32 = vpop.xlane.xlu0 %4310 }
0x2e27   :  { %v4315_v36 = vmul.f32 0.03125, %v4311_v32 }
0x2e28   :  { %v4318_v61 = vsub.f32 %v8880_v24, %v4316_v19 }
0x2e29   :  { %v4317_v57 = vsub.f32 %v8882_v42, %v4315_v36 }
0x2e2a   :  { %v4320_v0 = vmul.f32 %v4318_v61, %v4318_v61 }
0x2e2b   :  { %v4319_v41 = vmul.f32 %v4317_v57, %v4317_v57 }
0x2e2c   :  { %v4324_v43 = vsel %vm380_vm1, %v4320_v0, 0.0 }
0x2e2d   :  { %4325 = vadd.xlane.f32.xlu1 %v4324_v43  ;;  %v4321_v54 = vsel %vm376_vm0, %v4319_v41, 0.0 }
0x2e2e   :  { %4322 = vadd.xlane.f32.xlu0 %v4321_v54 }
0x2eba   :  { %v4326_v56 = vpop.xlane.xlu1 %4325 }
0x2ebb   :  { %v4328_v27 = vmul.f32 0.03125, %v4326_v56  ;;  %v4323_v63 = vpop.xlane.xlu0 %4322 }
0x2ebc   :  { %v4327_v58 = vmul.f32 0.03125, %v4323_v63 }
0x2ebd   :  { %v4330_v59 = vadd.f32 1e-06, %v4328_v27 }
0x2ebe   :  { %v4329_v60 = vadd.f32 1e-06, %v4327_v58 }
0x2ebf   :  { %7561 = vrsqrt.f32 %v4330_v59 }
0x2ec0   :  { %7563 = vrsqrt.f32 %v4329_v60 }
0x2ec9   :  { %v7562_v62 = vpop.eup %7561 }
0x2eca   :  { %v7564_v34 = vpop.eup %7563  ;;  %v4334_v50 = vmul.f32 %v7562_v62, %v4318_v61 }
0x2ecb   :  { %v4333_v3 = vmul.f32 %v7564_v34, %v4317_v57 }
0x2ecc   :  { %v4340_v31 = vmul.f32 %v4338_v49, %v4334_v50 }
0x2ecd   :  { %v4339_v33 = vmul.f32 %v4338_v49, %v4333_v3 }
0x2ece   :  { %v4346_v5 = vadd.f32 %v4344_v30, %v4340_v31 }
0x2ecf   :  { %v4345_v35 = vadd.f32 %v4344_v30, %v4339_v33 }
0x2ed1   :  { %6626 = vmatprep.mubr.msk.f32.mxu1 %vm376_vm0, %v4345_v35 }
0x2ed2   :  { %6627 = vmatmul.mubr.msk.f32.vlgmr.msra.gmra.mrb[56].mxu1 %vm376_vm0, %v4346_v5 }
0x2fa5   :  { %v6628_v16 = vpop.f32.mrb[56].mxu1 }
0x2fa6   :  { %v8918_v7 = vadd.f32 %v6628_v16, %v5799_v6  ;;  %v4432_v8 = vpop.f32.mrb[57].mxu1 }
0x2fa7   :  { %v8920_v51 = vadd.f32 %v5799_v6, %v4432_v8 }
0x2fa9   :  { %6633 = vmatprep.mubr.msk.f32.mxu1 %vm515_vm2, %v8920_v51  ;;  %v8926_v18 = vpack.i.bf16 %v8918_v7, %v8920_v51 }
0x2fab   :  { %7390 = vrot.lane.b32.xlu0 %v8926_v18, %s7609_s18 }
0x2faf   :  { %7400 = vrot.lane.b32.xlu0 %v8926_v18, %s7610_s19 }
0x2fb3   :  { %4640 = vrot.lane.b32.xlu0 %v8920_v51, %s7611_s20 }
0x2fb7   :  { %7405 = vrot.lane.b32.xlu0 %v8926_v18, %s7612_s21 }
0x2fbb   :  { %4841 = vrot.lane.b32.xlu0 %v8920_v51, %s7613_s22 }
0x301d   :  { %v7391_v45 = vpop.permute.xlu0 %7390 }
0x301e   :  { %v7393_v9 = vunpack.i.h.bf16 %v7391_v45  ;;  %v7392_v11 = vunpack.i.l.bf16 %v7391_v45 }
0x3020   :  { %v7158_v48 = vpack.c.bf16 %v7393_v9, %v7392_v11 }
0x3021   :  { %v7401_v12 = vpop.permute.xlu0 %7400 }
0x3022   :  { %7160 = vmatprep.subr.msk.bf16.mxu1 %vm8082_vm3, %v7158_v48  ;;  %v7403_v43 = vunpack.i.h.bf16 %v7401_v12  ;;  %v7402_v46 = vunpack.i.l.bf16 %v7401_v12 }
0x3023   :  { %7163 = vmatpush3.bf16.xpose.msk.msra.mxu1 %vm8082_vm3, %v7158_v48 }
0x3024   :  { %v7170_v40 = vpack.c.bf16 %v7403_v43, %v7402_v46 }
0x3025   :  { %v4641_v13 = vpop.permute.xlu0 %4640 }
0x3029   :  { %v7406_v20 = vpop.permute.xlu0 %7405 }
0x302a   :  { %v7408_v14 = vunpack.i.h.bf16 %v7406_v20  ;;  %v7407_v21 = vunpack.i.l.bf16 %v7406_v20  ;;  %6634 = vmatmul.mubr.msk.f32.vlgmr.msra.gmra.mrb[58].mxu1 %vm515_vm2, %v8918_v7 }
0x302c   :  { %v7182_v17 = vpack.c.bf16 %v7408_v14, %v7407_v21 }
0x302d   :  { %v4842_v22 = vpop.permute.xlu0 %4841 }
0x302e   :  { %7184 = vmatprep.subr.msk.bf16.mxu0 %vm8082_vm3, %v7182_v17  ;;  %6661 = vmatprep.mubr.msk.f32.mxu0 %vm515_vm2, %v4842_v22 }
0x302f   :  { %7187 = vmatpush3.bf16.xpose.msk.msra.mxu0 %vm8082_vm3, %v7182_v17 }
0x30fd   :  { %v6635_v15 = vpop.f32.mrb[58].mxu1 }
0x30fe   :  { %v4521_v23 = vpop.f32.mrb[59].mxu1  ;;  %v4527_v29 = vadd.f32 %v8958_v44, %v6635_v15 }
0x30ff   :  { %v4522_v39 = vadd.f32 %v8952_v37, %v4521_v23 }
0x3100   :  { %v4533_v19 = vsel %vm603_vm5, %v4527_v29, -inf }
0x3101   :  { %v4530_v25 = vsel %vm599_vm4, %v4522_v39, -inf }
0x3102   :  { %4531 = vmax.xlane.f32.xlu1 %v4530_v25 }
0x3106   :  { %4534 = vmax.xlane.f32.xlu1 %v4533_v19 }
0x3117   :  { %7395 = vrot.lane.b32.xlu1 %v8926_v18, %s7614_s26 }
0x318f   :  { %v4532_v32 = vpop.xlane.xlu1 %4531 }
0x3190   :  { %v4536_v36 = vsub.f32 %v4522_v39, %v4532_v32 }
0x3192   :  { %v4538_v0 = vmul.f32 1.442695, %v4536_v36 }
0x3193   :  { %v4535_v61 = vpop.xlane.xlu1 %4534 }
0x3194   :  { %v4537_v57 = vsub.f32 %v4527_v29, %v4535_v61 }
0x3196   :  { %v4540_v41 = vmul.f32 1.442695, %v4537_v57 }
0x3197   :  { %v7396_v54 = vpop.permute.xlu1 %7395 }
0x3198   :  { %7565 = vpow2.f32 %v4540_v41  ;;  %v7398_v52 = vunpack.i.h.bf16 %v7396_v54  ;;  %v7397_v28 = vunpack.i.l.bf16 %v7396_v54 }
0x3199   :  { %7567 = vpow2.f32 %v4538_v0 }
0x319a   :  { %v7164_v53 = vpack.c.bf16 %v7398_v52, %v7397_v28 }
0x319c   :  { %7166 = vmatprep.subr.msk.bf16.mxu1 %vm8115_vm8, %v7164_v53 }
0x319d   :  { %7169 = vmatpush3.bf16.msk.msra.mxu1 %vm8115_vm8, %v7164_v53 }
0x319e   :  { %7172 = vmatprep.subr.msk.bf16.mxu1 %vm8082_vm3, %v7170_v40 }
0x31a2   :  { %v7566_v55 = vpop.eup %7565 }
0x31a3   :  { %v4545_v56 = vsel %vm603_vm5, %v7566_v55, 0.0  ;;  %v7568_v27 = vpop.eup %7567 }
0x31a4   :  { %4546 = vadd.xlane.f32.xlu1 %v4545_v56  ;;  %v4542_v63 = vsel %vm599_vm4, %v7568_v27, 0.0 }
0x31a8   :  { %4543 = vadd.xlane.f32.xlu1 %v4542_v63 }
0x31b9   :  { %4642 = vrot.lane.b32.xlu1 %v8918_v7, %s7611_s20  ;;  %s9199_s20 = smov 104  }
0x31bd   :  { %4843 = vrot.lane.b32.xlu1 %v8918_v7, %s7613_s22 }
0x3231   :  { %v4547_v58 = vpop.xlane.xlu1 %4546 }
0x3232   :  { %7569 = vrcp.f32 %v4547_v58 }
0x3235   :  { %v4544_v59 = vpop.xlane.xlu1 %4543 }
0x3236   :  { %7571 = vrcp.f32 %v4544_v59 }
0x3239   :  { %v4643_v60 = vpop.permute.xlu1 %4642 }
0x323c   :  { %v7570_v62 = vpop.eup %7569 }
0x323d   :  { %v4844_v49 = vpop.permute.xlu1 %4843  ;;  %v4551_v3 = vmul.f32 %v7570_v62, %v7566_v55 }
0x323e   :  { %6662 = vmatmul.mubr.msk.f32.vlgmr.msra.gmra.mrb[28].mxu0 %vm515_vm2, %v4844_v49 }
0x3240   :  { %v7572_v34 = vpop.eup %7571 }
0x3241   :  { %v4550_v50 = vmul.f32 %v7572_v34, %v7568_v27 }
0x3243   :  { %6640 = vmatprep.mubr.msk.f32.mxu1 %vm599_vm4, %v4550_v50 }
0x3244   :  { %6641 = vmatmul.mubr.msk.f32.vlgmr.msra.gmra.mrb[60].mxu1 %vm599_vm4, %v4551_v3 }
0x3245   :  { %7175 = vmatpush3.bf16.xpose.msk.msra.mxu1 %vm8082_vm3, %v7170_v40  ;;  %6647 = vmatprep.mubr.msk.f32.mxu1 %vm515_vm2, %v4641_v13 }
0x324c   :  { %6648 = vmatmul.mubr.msk.f32.vlgmr.msra.gmra.mrb[62].mxu1 %vm515_vm2, %v4643_v60 }
0x3311   :  { %v6663_v30 = vpop.f32.mrb[28].mxu0 }
0x3312   :  { %v4923_v31 = vpop.f32.mrb[29].mxu0  ;;  %v4929_v48 = vadd.f32 %v8958_v44, %v6663_v30 }
0x3313   :  { %v4924_v9 = vadd.f32 %v8952_v37, %v4923_v31 }
0x3314   :  { %v4935_v13 = vsel %vm603_vm5, %v4929_v48, -inf }
0x3315   :  { %v4932_v12 = vsel %vm599_vm4, %v4924_v9, -inf }
0x3317   :  { %v8984_v33 = vpop.f32.mrb[60].mxu1 }
0x3318   :  { %v8986_v35 = vpop.f32.mrb[61].mxu1 }
0x331f   :  { %v6649_v5 = vpop.f32.mrb[62].mxu1 }
0x3320   :  { %v4728_v6 = vadd.f32 %v8958_v44, %v6649_v5  ;;  %v4722_v16 = vpop.f32.mrb[63].mxu1 }
0x3321   :  { %v4723_v8 = vadd.f32 %v8952_v37, %v4722_v16 }
0x3322   :  { %v4734_v45 = vsel %vm603_vm5, %v4728_v6, -inf }
0x3323   :  { %4735 = vmax.xlane.f32.xlu1 %v4734_v45  ;;  %v4731_v11 = vsel %vm599_vm4, %v4723_v8, -inf }
0x3324   :  { %4732 = vmax.xlane.f32.xlu0 %v4731_v11 }
0x3328   :  { %4933 = vmax.xlane.f32.xlu0 %v4932_v12 }
0x332c   :  { %4936 = vmax.xlane.f32.xlu0 %v4935_v13 }
0x33b0   :  { %v4736_v21 = vpop.xlane.xlu1 %4735 }
0x33b1   :  { %v4733_v20 = vpop.xlane.xlu0 %4732  ;;  %v4738_v15 = vsub.f32 %v4728_v6, %v4736_v21 }
0x33b2   :  { %v4737_v14 = vsub.f32 %v4723_v8, %v4733_v20 }
0x33b3   :  { %v4741_v19 = vmul.f32 1.442695, %v4738_v15 }
0x33b4   :  { %v4739_v23 = vmul.f32 1.442695, %v4737_v14 }
0x33b5   :  { %v4934_v17 = vpop.xlane.xlu0 %4933 }
0x33b6   :  { %v4938_v22 = vsub.f32 %v4924_v9, %v4934_v17 }
0x33b8   :  { %v4940_v39 = vmul.f32 1.442695, %v4938_v22 }
0x33b9   :  { %v4937_v29 = vpop.xlane.xlu0 %4936 }
0x33ba   :  { %7573 = vpow2.f32 %v4940_v39  ;;  %v4939_v25 = vsub.f32 %v4929_v48, %v4937_v29 }
0x33bb   :  { %7575 = vpow2.f32 %v4739_v23 }
0x33bc   :  { %v4942_v32 = vmul.f32 1.442695, %v4939_v25 }
0x33be   :  { %7577 = vpow2.f32 %v4942_v32 }
0x33bf   :  { %7579 = vpow2.f32 %v4741_v19 }
0x33c4   :  { %v7574_v36 = vpop.eup %7573 }
0x33c5   :  { %v4944_v61 = vsel %vm599_vm4, %v7574_v36, 0.0  ;;  %v7576_v57 = vpop.eup %7575 }
0x33c6   :  { %4945 = vadd.xlane.f32.xlu0 %v4944_v61  ;;  %v4743_v41 = vsel %vm599_vm4, %v7576_v57, 0.0 }
0x33c8   :  { %v7578_v0 = vpop.eup %7577 }
0x33c9   :  { %v4947_v43 = vsel %vm603_vm5, %v7578_v0, 0.0  ;;  %v7580_v54 = vpop.eup %7579 }
0x33ca   :  { %4744 = vadd.xlane.f32.xlu0 %v4743_v41  ;;  %4948 = vadd.xlane.f32.xlu1 %v4947_v43  ;;  %v4746_v46 = vsel %vm603_vm5, %v7580_v54, 0.0 }
0x33ce   :  { %4747 = vadd.xlane.f32.xlu1 %v4746_v46 }
0x33df   :  { %7415 = vrot.lane.b32.xlu1 %v8926_v18, %s7616_s0 }
0x33e0   :  { %7410 = vrot.lane.b32.xlu0 %v8926_v18, %s7617_s3 }
0x33e3   :  { %7420 = vrot.lane.b32.xlu1 %v8926_v18, %s9198_s1 }
0x33e4   :  { %5044 = vrot.lane.b32.xlu0 %v8918_v7, %s9199_s20 }
0x33e7   :  { %5042 = vrot.lane.b32.xlu1 %v8920_v51, %s9199_s20 }
0x3453   :  { %v4946_v52 = vpop.xlane.xlu0 %4945 }
0x3457   :  { %v4949_v28 = vpop.xlane.xlu1 %4948  ;;  %v4745_v53 = vpop.xlane.xlu0 %4744 }
0x3458   :  { %7581 = vrcp.f32 %v4745_v53  ;;  %v5831_v53 = vld [vmem:[%s9174_s6 + $0x68] sm:$0xff] }
0x3459   :  { %7583 = vrcp.f32 %v4946_v52 }
0x345b   :  { %v4748_v40 = vpop.xlane.xlu1 %4747  ;;  %v7411_v55 = vpop.permute.xlu0 %7410 }
0x345c   :  { %7585 = vrcp.f32 %v4748_v40  ;;  %v7413_v56 = vunpack.i.h.bf16 %v7411_v55  ;;  %v7412_v27 = vunpack.i.l.bf16 %v7411_v55  ;;  %v5832_v40 = vld [vmem:[%s9174_s6 + $0x70] sm:$0xff] }
0x345d   :  { %7587 = vrcp.f32 %v4949_v28  ;;  %v5830_v28 = vld [vmem:[%s9174_s6 + $0x60] sm:$0xff] }
0x345e   :  { %v7176_v63 = vpack.c.bf16 %v7413_v56, %v7412_v27  ;;  %v7206_v55 = vpack.c.bf16 %v5831_v53, %v5830_v28  ;;  %v5833_v56 = vld [vmem:[%s9174_s6 + $0x78] sm:$0xff]  ;;  %v5844_v53 = vld [vmem:[%s9176_s9 + $0x180] sm:$0xff] }
0x345f   :  { %v7416_v58 = vpop.permute.xlu1 %7415  ;;  %v5045_v9 = vpop.permute.xlu0 %5044  ;;  %v7210_v27 = vpack.c.bf16 %v5833_v56, %v5832_v40 }
0x3460   :  { %v7418_v59 = vunpack.i.h.bf16 %v7416_v58  ;;  %v7417_v60 = vunpack.i.l.bf16 %v7416_v58  ;;  %7178 = vmatprep.subr.msk.bf16.mxu1 %vm8115_vm8, %v7176_v63 }
0x3461   :  { %7181 = vmatpush3.bf16.msk.msra.mxu1 %vm8115_vm8, %v7176_v63 }
0x3462   :  { %v7188_v7 = vpack.c.bf16 %v7418_v59, %v7417_v60  ;;  %v7582_v51 = vpop.eup %7581 }
0x3463   :  { %v7421_v49 = vpop.permute.xlu1 %7420  ;;  %v4751_v62 = vmul.f32 %v7582_v51, %v7576_v57  ;;  %v7584_v34 = vpop.eup %7583 }
0x3464   :  { %7190 = vmatprep.subr.msk.bf16.mxu1 %vm8115_vm8, %v7188_v7  ;;  %v7423_v50 = vunpack.i.h.bf16 %v7421_v49  ;;  %v7422_v3 = vunpack.i.l.bf16 %v7421_v49  ;;  %v4952_v6 = vmul.f32 %v7584_v34, %v7574_v36 }
0x3465   :  { %6654 = vmatprep.mubr.msk.f32.mxu1 %vm599_vm4, %v4751_v62 }
0x3466   :  { %v7586_v30 = vpop.eup %7585  ;;  %v7194_v16 = vpack.c.bf16 %v7423_v50, %v7422_v3 }
0x3467   :  { %v4752_v31 = vmul.f32 %v7586_v30, %v7580_v54  ;;  %v7588_v5 = vpop.eup %7587  ;;  %v5043_v45 = vpop.permute.xlu1 %5042 }
0x3468   :  { %v4953_v8 = vmul.f32 %v7588_v5, %v7578_v0 }
0x3469   :  { %6655 = vmatmul.mubr.msk.f32.vlgmr.msra.gmra.mrb[64].mxu1 %vm599_vm4, %v4752_v31 }
0x346a   :  { %7193 = vmatpush3.bf16.msk.msra.mxu1 %vm8115_vm8, %v7188_v7  ;;  %6668 = vmatprep.mubr.msk.f32.mxu1 %vm599_vm4, %v4952_v6 }
0x346b   :  { %7196 = vmatprep.subr.msk.bf16.mxu1 %vm8082_vm3, %v7194_v16 }
0x346d   :  { %6669 = vmatmul.mubr.msk.f32.vlgmr.msra.gmra.mrb[66].mxu1 %vm599_vm4, %v4953_v8 }
0x346e   :  { %6675 = vmatprep.mubr.msk.f32.mxu1 %vm515_vm2, %v5043_v45 }
0x3473   :  { %7199 = vmatpush3.bf16.xpose.msk.msra.mxu1 %vm8082_vm3, %v7194_v16 }
0x347a   :  { %6676 = vmatmul.mubr.msk.f32.vlgmr.msra.gmra.mrb[68].mxu1 %vm515_vm2, %v5045_v9 }
0x353c   :  { %v6656_v11 = vpop.f32.mrb[64].mxu1 }
0x353d   :  { %v4832_v48 = vpop.f32.mrb[65].mxu1 }
0x3540   :  { %v6670_v12 = vpop.f32.mrb[66].mxu1 }
0x3541   :  { %v5033_v13 = vpop.f32.mrb[67].mxu1 }
0x354d   :  { %v6677_v20 = vpop.f32.mrb[68].mxu1 }
0x354e   :  { %v5130_v14 = vadd.f32 %v8958_v44, %v6677_v20  ;;  %v5124_v21 = vpop.f32.mrb[69].mxu1 }
0x354f   :  { %v5125_v17 = vadd.f32 %v8952_v37, %v5124_v21 }
0x3550   :  { %v5136_v22 = vsel %vm603_vm5, %v5130_v14, -inf }
0x3551   :  { %5137 = vmax.xlane.f32.xlu0 %v5136_v22  ;;  %v5133_v15 = vsel %vm599_vm4, %v5125_v17, -inf }
0x3552   :  { %5134 = vmax.xlane.f32.xlu1 %v5133_v15  ;;  %v5836_v15 = vld [vmem:[%s9175_s7 + $0x60] sm:$0xff] }
0x3563   :  { %7425 = vrot.lane.b32.xlu1 %v8926_v18, %s9196_s16 }
0x3567   :  { %5247 = vrot.lane.b32.xlu1 %v6656_v11, %s9197_s17 }
0x356b   :  { %5253 = vrot.lane.b32.xlu1 %v5033_v13, %s9194_s15 }
0x356f   :  { %5255 = vrot.lane.b32.xlu1 %v6670_v12, %s9194_s15 }
0x35de   :  { %v5138_v38 = vpop.xlane.xlu0 %5137 }
0x35df   :  { %v5140_v44 = vsub.f32 %v5130_v14, %v5138_v38  ;;  %v5135_v23 = vpop.xlane.xlu1 %5134  ;;  %v5837_v38 = vld [vmem:[%s9175_s7 + $0x68] sm:$0xff] }
0x35e0   :  { %v5139_v39 = vsub.f32 %v5125_v17, %v5135_v23  ;;  %v5838_v23 = vld [vmem:[%s9175_s7 + $0x70] sm:$0xff] }
0x35e1   :  { %v5143_v37 = vmul.f32 1.442695, %v5140_v44  ;;  %v7214_v44 = vpack.c.bf16 %v5837_v38, %v5836_v15 }
0x35e2   :  { %v5141_v29 = vmul.f32 1.442695, %v5139_v39  ;;  %v5839_v39 = vld [vmem:[%s9175_s7 + $0x78] sm:$0xff] }
0x35e3   :  { %v7426_v25 = vpop.permute.xlu1 %7425  ;;  %7215 = vmatprep.subr.bf16.mxu1 %v7214_v44 }
0x35e4   :  { %7589 = vpow2.f32 %v5141_v29  ;;  %v7428_v19 = vunpack.i.h.bf16 %v7426_v25  ;;  %v7427_v32 = vunpack.i.l.bf16 %v7426_v25  ;;  %7217 = vmatpush3.bf16.msra.mxu1 %v7214_v44 }
0x35e5   :  { %7591 = vpow2.f32 %v5143_v37  ;;  %v7218_v37 = vpack.c.bf16 %v5839_v39, %v5838_v23 }
0x35e6   :  { %v7200_v36 = vpack.c.bf16 %v7428_v19, %v7427_v32 }
0x35e7   :  { %v5248_v59 = vpop.permute.xlu1 %5247  ;;  %7219 = vmatprep.subr.bf16.mxu1 %v7218_v37 }
0x35e8   :  { %7202 = vmatprep.subr.msk.bf16.mxu0 %vm8115_vm8, %v7200_v36  ;;  %v5268_v34 = vsel %vm515_vm2, %v8984_v33, %v5248_v59  ;;  %7221 = vmatpush3.bf16.msra.mxu1 %v7218_v37  ;;  %v5850_v59 = vld [vmem:[%s9176_s9 + $0x1b0] sm:$0xff] }
0x35e9   :  { %7205 = vmatpush3.bf16.msk.msra.mxu0 %vm8115_vm8, %v7200_v36 }
0x35ea   :  { %7207 = vmatprep.subr.bf16.mxu0 %v7206_v55 }
0x35eb   :  { %v5254_v60 = vpop.permute.xlu1 %5253 }
0x35ee   :  { %v7590_v18 = vpop.eup %7589 }
0x35ef   :  { %v5145_v61 = vsel %vm599_vm4, %v7590_v18, 0.0  ;;  %v7592_v57 = vpop.eup %7591  ;;  %v5256_v51 = vpop.permute.xlu1 %5255 }
0x35f0   :  { %5146 = vadd.xlane.f32.xlu0 %v5145_v61  ;;  %v5148_v0 = vsel %vm603_vm5, %v7592_v57, 0.0  ;;  %v5270_v30 = vsel %vm1341_vm9, %v5268_v34, %v5256_v51  ;;  %v5396_v61 = vrot.slane %v8907_v47, %v8257_v1  ;;  %v5845_v1 = vld [vmem:[%s9176_s9 + $0x188] sm:$0xff]  ;;  %v5852_v51 = vld [vmem:[%s9176_s9 + $0x1c0] sm:$0xff] }
0x35f1   :  { %v7222_v40 = vpack.c.bf16 %v5845_v1, %v5844_v53 }
0x35f4   :  { %5149 = vadd.xlane.f32.xlu0 %v5148_v0 }
0x360a   :  { %5245 = vrot.lane.b32.xlu0 %v4832_v48, %s9197_s17 }
0x367d   :  { %v5147_v41 = vpop.xlane.xlu0 %5146 }
0x367e   :  { %7593 = vrcp.f32 %v5147_v41  ;;  %v5402_v41 = vrot.slane %v8907_v47, %v8260_v2  ;;  %v5846_v2 = vld [vmem:[%s9176_s9 + $0x190] sm:$0xff] }
0x3681   :  { %v5150_v43 = vpop.xlane.xlu0 %5149 }
0x3682   :  { %7595 = vrcp.f32 %v5150_v43 }
0x3685   :  { %v5246_v7 = vpop.permute.xlu0 %5245 }
0x3686   :  { %v5267_v49 = vsel %vm515_vm2, %v8986_v35, %v5246_v7  ;;  %v5364_v35 = vrot.slane %v8907_v47, %v8226_v26 }
0x3687   :  { %v5269_v50 = vsel %vm1341_vm9, %v5267_v49, %v5254_v60  ;;  %v5851_v60 = vld [vmem:[%s9176_s9 + $0x1b8] sm:$0xff]  ;;  %v5853_v49 = vld [vmem:[%s9176_s9 + $0x1c8] sm:$0xff] }
0x3688   :  { %v7594_v54 = vpop.eup %7593  ;;  %v7234_v7 = vpack.c.bf16 %v5851_v60, %v5850_v59  ;;  %v7238_v34 = vpack.c.bf16 %v5853_v49, %v5852_v51 }
0x3689   :  { %v5153_v46 = vmul.f32 %v7594_v54, %v7590_v18 }
0x368b   :  { %6682 = vmatprep.mubr.msk.f32.mxu0 %vm599_vm4, %v5153_v46 }
0x368c   :  { %v7596_v4 = vpop.eup %7595 }
0x368d   :  { %v5154_v52 = vmul.f32 %v7596_v4, %v7592_v57 }
0x368f   :  { %6683 = vmatmul.mubr.msk.f32.vlgmr.msra.gmra.mrb[30].mxu0 %vm599_vm4, %v5154_v52 }
0x3690   :  { %7209 = vmatpush3.bf16.msra.mxu0 %v7206_v55  ;;  %v5847_v55 = vld [vmem:[%s9176_s9 + $0x198] sm:$0xff] }
0x3691   :  { %7211 = vmatprep.subr.bf16.mxu0 %v7210_v27  ;;  %v7226_v56 = vpack.c.bf16 %v5847_v55, %v5846_v2 }
0x3694   :  { %7213 = vmatpush3.bf16.msra.mxu0 %v7210_v27  ;;  %v5848_v27 = vld [vmem:[%s9176_s9 + $0x1a0] sm:$0xff] }
0x3695   :  { %7223 = vmatprep.subr.bf16.mxu0 %v7222_v40 }
0x3762   :  { %v6684_v63 = vpop.f32.mrb[30].mxu0 }
0x3763   :  { %5263 = vrot.lane.b32.xlu1 %v6684_v63, %s9195_s25  ;;  %v5234_v58 = vpop.f32.mrb[31].mxu0  ;;  %v5849_v63 = vld [vmem:[%s9176_s9 + $0x1a8] sm:$0xff] }
0x3764   :  { %5261 = vrot.lane.b32.xlu0 %v5234_v58, %s9195_s25  ;;  %v7230_v58 = vpack.c.bf16 %v5849_v63, %v5848_v27 }
0x37d5   :  { %v5264_v62 = vpop.permute.xlu1 %5263 }
0x37d6   :  { %v5262_v3 = vpop.permute.xlu0 %5261  ;;  %v5272_v5 = vsel %vm1344_vm10, %v5270_v30, %v5264_v62  ;;  %v5854_v62 = vld [vmem:[%s9176_s9 + $0x1d0] sm:$0xff]  ;;  %v5856_v30 = vld [vmem:[%s9176_s9 + $0x1e0] sm:$0xff] }
0x37d7   :  { %v5271_v31 = vsel %vm1344_vm10, %v5269_v50, %v5262_v3  ;;  %v5855_v50 = vld [vmem:[%s9176_s9 + $0x1d8] sm:$0xff] }
0x37d8   :  { %6693 = vmatprep.mubr.msk.f32.mxu0 %vm376_vm0, %v5271_v31  ;;  %v7242_v3 = vpack.c.bf16 %v5855_v50, %v5854_v62  ;;  %v5857_v31 = vld [vmem:[%s9176_s9 + $0x1e8] sm:$0xff] }
0x37d9   :  { %6694 = vmatmul.mubr.msk.f32.vlgmr.msra.gmra.mrb[32].mxu0 %vm376_vm0, %v5272_v5  ;;  %v7246_v5 = vpack.c.bf16 %v5857_v31, %v5856_v30 }
0x37da   :  { %7225 = vmatpush3.bf16.msra.mxu0 %v7222_v40 }
0x37db   :  { %7227 = vmatprep.subr.bf16.mxu0 %v7226_v56 }
0x37de   :  { %7229 = vmatpush3.bf16.msra.mxu0 %v7226_v56 }
0x37df   :  { %7231 = vmatprep.subr.bf16.mxu0 %v7230_v58 }
0x37e2   :  { %7233 = vmatpush3.bf16.msra.mxu0 %v7230_v58 }
0x37e3   :  { %7235 = vmatprep.subr.bf16.mxu0 %v7234_v7 }
0x37e6   :  { %7237 = vmatpush3.bf16.msra.mxu0 %v7234_v7 }
0x37e7   :  { %7239 = vmatprep.subr.bf16.mxu0 %v7238_v34 }
0x37ea   :  { %7241 = vmatpush3.bf16.msra.mxu0 %v7238_v34 }
0x37eb   :  { %7243 = vmatprep.subr.bf16.mxu0 %v7242_v3 }
0x37ee   :  { %7245 = vmatpush3.bf16.msra.mxu0 %v7242_v3 }
0x37ef   :  { %7247 = vmatprep.subr.bf16.mxu0 %v7246_v5 }
0x37f2   :  { %7249 = vmatpush3.bf16.msra.mxu0 %v7246_v5 }
0x38ac   :  { %v6695_v6 = vpop.f32.mrb[32].mxu0 }
0x38ad   :  { %v5360_v16 = vadd.f32 %v6695_v6, %v8880_v24  ;;  %v5350_v33 = vpop.f32.mrb[33].mxu0  ;;  %v5859_v6 = vld [vmem:[%s9176_s9 + $0x1f8] sm:$0xff] }
0x38ae   :  { %v5359_v8 = vadd.f32 %v5350_v33, %v8882_v42  ;;  %v5841_v33 = vld [vmem:[%s9177_s8 + $0x3] ss:$0 sm:$0xff] }
0x38af   :  { %v9074_v45 = vadd.f32 %v5364_v35, %v5360_v16 }
0x38b0   :  { %v9076_v9 = vadd.f32 %v5364_v35, %v5359_v8  ;;  %v5858_v35 = vld [vmem:[%s9176_s9 + $0x1f0] sm:$0xff] }
0x38b1   :  { %v5370_v11 = vsel %vm380_vm1, %v9074_v45, 0.0  ;;  %v7250_v16 = vpack.c.bf16 %v5859_v6, %v5858_v35 }
0x38b2   :  { %5371 = vadd.xlane.f32.xlu1 %v5370_v11  ;;  %v5367_v48 = vsel %vm376_vm0, %v9076_v9, 0.0 }
0x38b3   :  { %5368 = vadd.xlane.f32.xlu0 %v5367_v48  ;;  %7251 = vmatprep.subr.bf16.mxu0 %v7250_v16 }
0x38b4   :  { %7253 = vmatpush3.bf16.msra.mxu0 %v7250_v16 }
0x393f   :  { %v5372_v12 = vpop.xlane.xlu1 %5371 }
0x3940   :  { %v5374_v26 = vmul.f32 0.03125, %v5372_v12  ;;  %v5369_v13 = vpop.xlane.xlu0 %5368 }
0x3941   :  { %v5373_v20 = vmul.f32 0.03125, %v5369_v13 }
0x3942   :  { %v5376_v24 = vsub.f32 %v9074_v45, %v5374_v26 }
0x3943   :  { %v5375_v42 = vsub.f32 %v9076_v9, %v5373_v20 }
0x3944   :  { %v5378_v17 = vmul.f32 %v5376_v24, %v5376_v24 }
0x3945   :  { %v5377_v14 = vmul.f32 %v5375_v42, %v5375_v42 }
0x3946   :  { %v5382_v22 = vsel %vm380_vm1, %v5378_v17, 0.0 }
0x3947   :  { %v5379_v21 = vsel %vm376_vm0, %v5377_v14, 0.0 }
0x3948   :  { %5380 = vadd.xlane.f32.xlu0 %v5379_v21 }
0x394c   :  { %5383 = vadd.xlane.f32.xlu0 %v5382_v22 }
0x39d5   :  { %v5381_v29 = vpop.xlane.xlu0 %5380 }
0x39d6   :  { %v5385_v25 = vmul.f32 0.03125, %v5381_v29 }
0x39d8   :  { %v5387_v19 = vadd.f32 1e-06, %v5385_v25 }
0x39d9   :  { %v5384_v32 = vpop.xlane.xlu0 %5383 }
0x39da   :  { %7597 = vrsqrt.f32 %v5387_v19  ;;  %v5386_v36 = vmul.f32 0.03125, %v5384_v32  ;;  %v5614_v32 = vrot.slane %v8907_v47, %v8320_v10 }
0x39dc   :  { %v5388_v18 = vadd.f32 1e-06, %v5386_v36 }
0x39de   :  { %7599 = vrsqrt.f32 %v5388_v18 }
0x39e4   :  { %v7598_v57 = vpop.eup %7597 }
0x39e5   :  { %v5391_v0 = vmul.f32 %v7598_v57, %v5375_v42 }
0x39e7   :  { %v5397_v43 = vmul.f32 %v5396_v61, %v5391_v0 }
0x39e8   :  { %v7600_v54 = vpop.eup %7599 }
0x39e9   :  { %v5392_v46 = vmul.f32 %v7600_v54, %v5376_v24  ;;  %v5403_v4 = vadd.f32 %v5402_v41, %v5397_v43 }
0x39eb   :  { %v5398_v52 = vmul.f32 %v5396_v61, %v5392_v46  ;;  %6704 = vmatprep.mubr.msk.f32.mxu1 %vm376_vm0, %v5403_v4 }
0x39ed   :  { %v5404_v28 = vadd.f32 %v5402_v41, %v5398_v52 }
0x39ef   :  { %6705 = vmatmul.mubr.msk.f32.vlgmr.msra.gmra.mrb[70].mxu1 %vm376_vm0, %v5404_v28 }
0x3ac2   :  { %v6706_v8 = vpop.f32.mrb[70].mxu1 }
0x3ac3   :  { %v5496_v11 = vadd.f32 %v6706_v8, %v5841_v33  ;;  %v5490_v48 = vpop.f32.mrb[71].mxu1 }
0x3ac4   :  { %v5491_v12 = vadd.f32 %v5841_v33, %v5490_v48 }
0x3ac5   :  { %v5500_v26 = vmul.f32 %v5496_v11, %v5496_v11 }
0x3ac6   :  { %v5499_v13 = vmul.f32 %v5491_v12, %v5491_v12 }
0x3ac7   :  { %v5502_v20 = vmul.f32 %v5500_v26, %v5496_v11 }
0x3ac8   :  { %v5501_v24 = vmul.f32 %v5499_v13, %v5491_v12 }
0x3ac9   :  { %v5504_v42 = vmul.f32 0.044715, %v5502_v20 }
0x3aca   :  { %v5503_v14 = vmul.f32 0.044715, %v5501_v24 }
0x3acb   :  { %v5506_v21 = vadd.f32 %v5504_v42, %v5496_v11 }
0x3acc   :  { %v5505_v17 = vadd.f32 %v5503_v14, %v5491_v12 }
0x3acd   :  { %v5508_v22 = vmul.f32 0.7978846, %v5506_v21 }
0x3ace   :  { %v5507_v15 = vmul.f32 0.7978846, %v5505_v17 }
0x3acf   :  { %7601 = vtanh.f32 %v5508_v22 }
0x3ad0   :  { %7603 = vtanh.f32 %v5507_v15 }
0x3ad9   :  { %v7602_v38 = vpop.eup %7601 }
0x3ada   :  { %v7604_v44 = vpop.eup %7603  ;;  %v5512_v23 = vadd.f32 1.0, %v7602_v38 }
0x3adb   :  { %v5511_v39 = vadd.f32 1.0, %v7604_v44 }
0x3adc   :  { %v5514_v37 = vmul.f32 0.5, %v5512_v23 }
0x3add   :  { %v5513_v29 = vmul.f32 0.5, %v5511_v39 }
0x3ade   :  { %v5516_v19 = vmul.f32 %v5514_v37, %v5496_v11 }
0x3adf   :  { %v5515_v25 = vmul.f32 %v5513_v29, %v5491_v12 }
0x3ae1   :  { %6739 = vmatprep.mubr.f32.mxu0 %v5515_v25 }
0x3ae2   :  { %6740 = vmatmul.mubr.f32.vlgmr.msra.gmra.mrb[34].mxu0 %v5516_v19 }
0x3bb5   :  { %v6741_v36 = vpop.f32.mrb[34].mxu0 }
0x3bb6   :  { %v5610_v18 = vadd.f32 %v6741_v36, %v9074_v45  ;;  %v5600_v61 = vpop.f32.mrb[35].mxu0 }
0x3bb7   :  { %v5609_v57 = vadd.f32 %v5600_v61, %v9076_v9 }
0x3bb8   :  { %v5616_v0 = vadd.f32 %v5614_v32, %v5610_v18 }
0x3bb9   :  { %v5615_v41 = vadd.f32 %v5614_v32, %v5609_v57 }
0x3bba   :  { %5618 = vst.msk [vmem:[%s9178_s11 + $0x8] sm:$0x3] %vm380_vm1, %v5616_v0 }
0x3bbb   :  { %5617 = vst.msk [vmem:[%s9178_s11] sm:$0xff] %vm376_vm0, %v5615_v41 }

</bundles_post_ra>
